<compile_context>
chip_gen: v7x
topology: tpu7x:2x2x1
jax: 0.10.0
libtpu: 0.0.40
codegen_flags: <defaults>
</compile_context>

<pallas_src>
import jax
import jax.numpy as jnp
from jax.experimental import pallas as pl
from jax.experimental.pallas import tpu as pltpu

LANE = 128


def _round_up(n, m):
    return ((n + m - 1) // m) * m


# ---------------------------------------------------------------------------
# Kernel
# ---------------------------------------------------------------------------
def _accum_conv3x3(src_ref, w_ref, b_ref, acc_ref, H, W):
    """acc = bias + sum_{dy,dx} src[dy:dy+H, dx:dx+W, :] @ w[3*dy+dx].

    src_ref: (H+2, W+2, C)   zero-halo padded activations (bf16, VMEM scratch)
    w_ref:   (9, C, Cout_p)  BN-scale-folded weights (bf16)
    b_ref:   (1, Cout_p)     folded bias (f32)
    acc_ref: (H*W, Cout_p)   f32 VMEM accumulator
    """
    C = src_ref.shape[-1]
    # Initialize the accumulator with the folded bias (saves a separate add).
    acc_ref[...] = jnp.broadcast_to(b_ref[...], acc_ref.shape)
    for dx in range(3):
        # One column-shifted slab per dx (3 shifted reads/stage instead of 9).
        xs = src_ref[:, dx:dx + W, :]            # (H+2, W, C)
        for dy in range(3):
            patch = xs[dy:dy + H].reshape(H * W, C)
            acc_ref[...] += jnp.dot(patch, w_ref[3 * dy + dx],
                                    preferred_element_type=jnp.float32)


def _double_conv_kernel(x_ref, w1_ref, b1_ref, w2_ref, b2_ref, o_ref,
                        xpad_ref, mid_ref, acc_ref):
    """One image per grid step: (conv3x3 + folded-BN + ReLU) x 2, fused.

    x_ref:   (1, H, W, Cin_p)    bf16 input tile (channels padded to 128)
    w1_ref:  (9, Cin_p, Cout_p)  bf16 folded weights, stage 1
    b1_ref:  (1, Cout_p)         f32 folded bias, stage 1
    w2_ref:  (9, Cout_p, Cout_p) bf16 folded weights, stage 2
    b2_ref:  (1, Cout_p)         f32 folded bias, stage 2
    o_ref:   (1, H, W, Cout_p)   f32 output tile (lane-dense, 128 lanes)
    scratch: xpad (H+2,W+2,Cin_p) bf16, mid (H+2,W+2,Cout_p) bf16,
             acc (H*W, Cout_p) f32
    """
    H, W = o_ref.shape[1], o_ref.shape[2]
    Co = o_ref.shape[3]

    # ---- Stage 1: halo handled in VMEM (no HBM-level jnp.pad) ----
    xpad_ref[...] = jnp.zeros_like(xpad_ref)
    xpad_ref[1:H + 1, 1:W + 1, :] = x_ref[0]
    _accum_conv3x3(xpad_ref, w1_ref, b1_ref, acc_ref, H, W)

    # ReLU -> bf16 -> interior of the stage-2 padded buffer (stays in VMEM).
    mid_ref[...] = jnp.zeros_like(mid_ref)
    mid_ref[1:H + 1, 1:W + 1, :] = (
        jnp.maximum(acc_ref[...], 0.0)
        .reshape(H, W, mid_ref.shape[-1])
        .astype(mid_ref.dtype))

    # ---- Stage 2 ----
    _accum_conv3x3(mid_ref, w2_ref, b2_ref, acc_ref, H, W)
    o_ref[...] = (jnp.maximum(acc_ref[...], 0.0)
                  .reshape(1, H, W, Co).astype(o_ref.dtype))


# ---------------------------------------------------------------------------
# Wrapper
# ---------------------------------------------------------------------------
def fold_bn_into_conv(w_hwio, b, gamma, beta, mean, var, eps=1e-5):
    """BN(conv(x)+b) == conv_{w*scale}(x) + (scale*(b-mean)+beta)."""
    scale = gamma / jnp.sqrt(var + eps)                   # (Cout,)
    w_folded = w_hwio * scale[None, None, None, :]
    bias = (b - mean) * scale + beta
    return w_folded, bias


def _prep_weights(w_hwio, bias, cin_p, cout_p):
    kh, kw, cin, cout = w_hwio.shape
    w = jnp.pad(w_hwio, ((0, 0), (0, 0), (0, cin_p - cin), (0, cout_p - cout)))
    w = w.reshape(kh * kw, cin_p, cout_p).astype(jnp.bfloat16)
    b = jnp.pad(bias, (0, cout_p - cout)).reshape(1, cout_p).astype(jnp.float32)
    return w, b


def double_conv_forward(x_nchw, w1_hwio, b1, bn1, w2_hwio, b2, bn2, eps=1e-5):
    """PyTorch-facing API: NCHW in, NCHW out (float32)."""
    B, Cin, H, W = x_nchw.shape
    Cout = w1_hwio.shape[-1]
    cin_p = _round_up(Cin, LANE)
    cout_p = _round_up(Cout, LANE)

    w1f, bias1 = fold_bn_into_conv(w1_hwio, b1, *bn1, eps=eps)
    w2f, bias2 = fold_bn_into_conv(w2_hwio, b2, *bn2, eps=eps)
    w1p, b1p = _prep_weights(w1f, bias1, cin_p, cout_p)
    w2p, b2p = _prep_weights(w2f, bias2, cout_p, cout_p)

    # NCHW -> NHWC once for the whole block; pad channels to the lane width.
    # TODO(synk): keep the surrounding model NHWC end-to-end to drop this
    # transpose pair entirely.
    x = jnp.transpose(x_nchw, (0, 2, 3, 1))
    x = jnp.pad(x, ((0, 0), (0, 0), (0, 0), (0, cin_p - Cin))).astype(jnp.bfloat16)

    out = pl.pallas_call(
        _double_conv_kernel,
        out_shape=jax.ShapeDtypeStruct((B, H, W, cout_p), jnp.float32),
        grid_spec=pltpu.PrefetchScalarGridSpec(
            num_scalar_prefetch=0,
            grid=(B,),
            in_specs=[
                pl.BlockSpec((1, H, W, cin_p), lambda b: (b, 0, 0, 0)),
                pl.BlockSpec((9, cin_p, cout_p), lambda b: (0, 0, 0)),
                pl.BlockSpec((1, cout_p), lambda b: (0, 0)),
                pl.BlockSpec((9, cout_p, cout_p), lambda b: (0, 0, 0)),
                pl.BlockSpec((1, cout_p), lambda b: (0, 0)),
            ],
            out_specs=pl.BlockSpec((1, H, W, cout_p), lambda b: (b, 0, 0, 0)),
            scratch_shapes=[
                pltpu.VMEM((H + 2, W + 2, cin_p), jnp.bfloat16),   # padded x
                pltpu.VMEM((H + 2, W + 2, cout_p), jnp.bfloat16),  # padded mid
                pltpu.VMEM((H * W, cout_p), jnp.float32),          # accumulator
            ],
        ),
        compiler_params=pltpu.CompilerParams(
            dimension_semantics=("parallel",),
            vmem_limit_bytes=32 * 1024 * 1024,
        ),
    )(x, w1p, b1p, w2p, b2p)

    # Drop channel padding, back to NCHW for the PyTorch-facing result.
    return jnp.transpose(out[..., :Cout], (0, 3, 1, 2))


# ---------------------------------------------------------------------------
# Parameters (mirror PyTorch module shapes/init) and pure-JAX reference
# ---------------------------------------------------------------------------
class DoubleConvParams:
    def __init__(self, key, in_channels, out_channels):
        ks = jax.random.split(key, 6)
        fan1 = in_channels * 9
        fan2 = out_channels * 9
        w1_oihw = jax.random.uniform(ks[0], (out_channels, in_channels, 3, 3),
                                     jnp.float32, -1.0, 1.0) / jnp.sqrt(fan1)
        b1 = jax.random.uniform(ks[1], (out_channels,), jnp.float32,
                                -1.0, 1.0) / jnp.sqrt(fan1)
        w2_oihw = jax.random.uniform(ks[2], (out_channels, out_channels, 3, 3),
                                     jnp.float32, -1.0, 1.0) / jnp.sqrt(fan2)
        b2 = jax.random.uniform(ks[3], (out_channels,), jnp.float32,
                                -1.0, 1.0) / jnp.sqrt(fan2)
        # Store HWIO (3, 3, Cin, Cout).
        self.w1 = jnp.transpose(w1_oihw, (2, 3, 1, 0))
        self.w2 = jnp.transpose(w2_oihw, (2, 3, 1, 0))
        self.b1, self.b2 = b1, b2

        co = out_channels

        def bn_params(k):
            kg, kb, km, kv = jax.random.split(k, 4)
            gamma = jax.random.uniform(kg, (co,), jnp.float32, 0.5, 1.5)
            beta = 0.1 * jax.random.normal(kb, (co,), jnp.float32)
            mean = 0.1 * jax.random.normal(km, (co,), jnp.float32)
            var = jax.random.uniform(kv, (co,), jnp.float32, 0.5, 1.5)
            return (gamma, beta, mean, var)

        self.bn1 = bn_params(ks[4])
        self.bn2 = bn_params(ks[5])


def _reference_forward(x_nchw, params, eps=1e-5):
    """Pure-JAX f32 reference (lax conv + explicit BN + ReLU)."""
    def block(x, w_hwio, b, bn):
        gamma, beta, mean, var = bn
        y = jax.lax.conv_general_dilated(
            x, jnp.transpose(w_hwio, (3, 2, 0, 1)),  # -> OIHW
            window_strides=(1, 1), padding=((1, 1), (1, 1)),
            dimension_numbers=("NCHW", "OIHW", "NCHW"))
        y = y + b[None, :, None, None]
        y = gamma[None, :, None, None] * (y - mean[None, :, None, None]) / \
            jnp.sqrt(var[None, :, None, None] + eps) + beta[None, :, None, None]
        return jnp.maximum(y, 0.0)

    y = block(x_nchw, params.w1, params.b1, params.bn1)
    return block(y, params.w2, params.b2, params.bn2)


if __name__ == "__main__":
    key = jax.random.PRNGKey(0)
    k_x, k_p = jax.random.split(key)

    B, Cin, H, W = 2, 4, 16, 16
    Cout = 8
    x = jax.random.normal(k_x, (B, Cin, H, W), dtype=jnp.float32)
    params = DoubleConvParams(k_p, Cin, Cout)

    fwd = jax.jit(double_conv_forward)
    out = fwd(x, params.w1, params.b1, params.bn1,
              params.w2, params.b2, params.bn2)
    out = jax.block_until_ready(out)

    ref = jax.block_until_ready(_reference_forward(x, params))
    assert out.shape == (B, Cout, H, W)
    # bf16 MXU inputs with f32 accumulation vs f32 reference: loose tolerance.
    assert jnp.allclose(out, ref, atol=5e-2, rtol=5e-2), "mismatch vs reference"

    print("KERNEL_OK")
</pallas_src>

<mosaic_0001>
module attributes {stable_mosaic.version = 11 : i64} {
  func.func @_double_conv_kernel(%arg0: i32, %arg1: memref<1x16x16x128xbf16, #tpu.memory_space<vmem>>, %arg2: memref<9x128x128xbf16, #tpu.memory_space<vmem>>, %arg3: memref<1x128xf32, #tpu.memory_space<vmem>>, %arg4: memref<9x128x128xbf16, #tpu.memory_space<vmem>>, %arg5: memref<1x128xf32, #tpu.memory_space<vmem>>, %arg6: memref<1x16x16x128xf32, #tpu.memory_space<vmem>>, %arg7: memref<18x18x128xbf16, #tpu.memory_space<vmem>>, %arg8: memref<18x18x128xbf16, #tpu.memory_space<vmem>>, %arg9: memref<256x128xf32, #tpu.memory_space<vmem>>) attributes {dimension_semantics = [#tpu.dimension_semantics<parallel>], iteration_bounds = array<i64: 2>, scalar_prefetch = 0 : i64, scratch_operands = 3 : i64, tpu.core_type = #tpu.core_type<tc>, window_params = [{transform_indices = @transform_0, window_bounds = array<i64: 1, 16, 16, 128>}, {pipeline_mode = #tpu.pipeline_mode<synchronous>, transform_indices = @transform_1, window_bounds = array<i64: 9, 128, 128>}, {pipeline_mode = #tpu.pipeline_mode<synchronous>, transform_indices = @transform_2, window_bounds = array<i64: 1, 128>}, {pipeline_mode = #tpu.pipeline_mode<synchronous>, transform_indices = @transform_3, window_bounds = array<i64: 9, 128, 128>}, {pipeline_mode = #tpu.pipeline_mode<synchronous>, transform_indices = @transform_4, window_bounds = array<i64: 1, 128>}, {transform_indices = @transform_5, window_bounds = array<i64: 1, 16, 16, 128>}]} {
    %cst = arith.constant 0.000000e+00 : bf16
    %0 = vector.broadcast %cst : bf16 to vector<18x18x128xbf16>
    %c0 = arith.constant 0 : index
    %c0_0 = arith.constant 0 : index
    %c0_1 = arith.constant 0 : index
    %1 = vector.load %arg7[%c0, %c0_0, %c0_1] : memref<18x18x128xbf16, #tpu.memory_space<vmem>>, vector<18x18x128xbf16>
    tpu.vector_store %arg7[%c0, %c0_0, %c0_1], %0 {strides = array<i32>} : memref<18x18x128xbf16, #tpu.memory_space<vmem>>, vector<18x18x128xbf16>,
    %c0_2 = arith.constant 0 : index
    %c0_3 = arith.constant 0 : index
    %c0_4 = arith.constant 0 : index
    %c0_5 = arith.constant 0 : index
    %2 = vector.load %arg1[%c0_2, %c0_3, %c0_4, %c0_5] : memref<1x16x16x128xbf16, #tpu.memory_space<vmem>>, vector<1x16x16x128xbf16>
    %3 = vector.shape_cast %2 : vector<1x16x16x128xbf16> to vector<16x16x128xbf16>
    %c1 = arith.constant 1 : index
    %c1_6 = arith.constant 1 : index
    %c0_7 = arith.constant 0 : index
    %4 = vector.load %arg7[%c1, %c1_6, %c0_7] : memref<18x18x128xbf16, #tpu.memory_space<vmem>>, vector<16x16x128xbf16>
    tpu.vector_store %arg7[%c1, %c1_6, %c0_7], %3 {strides = array<i32>} : memref<18x18x128xbf16, #tpu.memory_space<vmem>>, vector<16x16x128xbf16>,
    %c0_8 = arith.constant 0 : index
    %c0_9 = arith.constant 0 : index
    %5 = vector.load %arg3[%c0_8, %c0_9] : memref<1x128xf32, #tpu.memory_space<vmem>>, vector<1x128xf32>
    %6 = vector.shape_cast %5 : vector<1x128xf32> to vector<1x128xf32>
    %7 = vector.broadcast %6 : vector<1x128xf32> to vector<256x128xf32>
    %c0_10 = arith.constant 0 : index
    %c0_11 = arith.constant 0 : index
    %8 = vector.load %arg9[%c0_10, %c0_11] : memref<256x128xf32, #tpu.memory_space<vmem>>, vector<256x128xf32>
    tpu.vector_store %arg9[%c0_10, %c0_11], %7 {strides = array<i32>} : memref<256x128xf32, #tpu.memory_space<vmem>>, vector<256x128xf32>,
    %c0_12 = arith.constant 0 : index
    %c0_13 = arith.constant 0 : index
    %c0_14 = arith.constant 0 : index
    %9 = vector.load %arg7[%c0_12, %c0_13, %c0_14] : memref<18x18x128xbf16, #tpu.memory_space<vmem>>, vector<18x16x128xbf16>
    %10 = vector.extract_strided_slice %9 {offsets = [0, 0, 0], sizes = [16, 16, 128], strides = [1, 1, 1]} : vector<18x16x128xbf16> to vector<16x16x128xbf16>
    %11 = vector.shape_cast %10 : vector<16x16x128xbf16> to vector<256x128xbf16>
    %c0_15 = arith.constant 0 : index
    %c0_16 = arith.constant 0 : index
    %12 = vector.load %arg9[%c0_15, %c0_16] : memref<256x128xf32, #tpu.memory_space<vmem>>, vector<256x128xf32>
    %c0_17 = arith.constant 0 : index
    %c0_18 = arith.constant 0 : index
    %c0_19 = arith.constant 0 : index
    %13 = vector.load %arg2[%c0_17, %c0_18, %c0_19] : memref<9x128x128xbf16, #tpu.memory_space<vmem>>, vector<1x128x128xbf16>
    %14 = vector.shape_cast %13 : vector<1x128x128xbf16> to vector<128x128xbf16>
    %cst_20 = arith.constant dense<0.000000e+00> : vector<256x128xf32>
    %15 = tpu.matmul %11, %14, %cst_20 {dimension_numbers = #tpu.dot_dimension_numbers<[1], [0], [0], [1], [0, 0, 1, 1], [], []>} : vector<256x128xbf16>, vector<128x128xbf16>, vector<256x128xf32> -> vector<256x128xf32>
    %16 = arith.addf %12, %15 : vector<256x128xf32>
    %c0_21 = arith.constant 0 : index
    %c0_22 = arith.constant 0 : index
    %17 = vector.load %arg9[%c0_21, %c0_22] : memref<256x128xf32, #tpu.memory_space<vmem>>, vector<256x128xf32>
    tpu.vector_store %arg9[%c0_21, %c0_22], %16 {strides = array<i32>} : memref<256x128xf32, #tpu.memory_space<vmem>>, vector<256x128xf32>,
    %18 = vector.extract_strided_slice %9 {offsets = [1, 0, 0], sizes = [16, 16, 128], strides = [1, 1, 1]} : vector<18x16x128xbf16> to vector<16x16x128xbf16>
    %19 = vector.shape_cast %18 : vector<16x16x128xbf16> to vector<256x128xbf16>
    %c0_23 = arith.constant 0 : index
    %c0_24 = arith.constant 0 : index
    %20 = vector.load %arg9[%c0_23, %c0_24] : memref<256x128xf32, #tpu.memory_space<vmem>>, vector<256x128xf32>
    %c3 = arith.constant 3 : index
    %c0_25 = arith.constant 0 : index
    %c0_26 = arith.constant 0 : index
    %21 = vector.load %arg2[%c3, %c0_25, %c0_26] : memref<9x128x128xbf16, #tpu.memory_space<vmem>>, vector<1x128x128xbf16>
    %22 = vector.shape_cast %21 : vector<1x128x128xbf16> to vector<128x128xbf16>
    %cst_27 = arith.constant dense<0.000000e+00> : vector<256x128xf32>
    %23 = tpu.matmul %19, %22, %cst_27 {dimension_numbers = #tpu.dot_dimension_numbers<[1], [0], [0], [1], [0, 0, 1, 1], [], []>} : vector<256x128xbf16>, vector<128x128xbf16>, vector<256x128xf32> -> vector<256x128xf32>
    %24 = arith.addf %20, %23 : vector<256x128xf32>
    %c0_28 = arith.constant 0 : index
    %c0_29 = arith.constant 0 : index
    %25 = vector.load %arg9[%c0_28, %c0_29] : memref<256x128xf32, #tpu.memory_space<vmem>>, vector<256x128xf32>
    tpu.vector_store %arg9[%c0_28, %c0_29], %24 {strides = array<i32>} : memref<256x128xf32, #tpu.memory_space<vmem>>, vector<256x128xf32>,
    %26 = vector.extract_strided_slice %9 {offsets = [2, 0, 0], sizes = [16, 16, 128], strides = [1, 1, 1]} : vector<18x16x128xbf16> to vector<16x16x128xbf16>
    %27 = vector.shape_cast %26 : vector<16x16x128xbf16> to vector<256x128xbf16>
    %c0_30 = arith.constant 0 : index
    %c0_31 = arith.constant 0 : index
    %28 = vector.load %arg9[%c0_30, %c0_31] : memref<256x128xf32, #tpu.memory_space<vmem>>, vector<256x128xf32>
    %c6 = arith.constant 6 : index
    %c0_32 = arith.constant 0 : index
    %c0_33 = arith.constant 0 : index
    %29 = vector.load %arg2[%c6, %c0_32, %c0_33] : memref<9x128x128xbf16, #tpu.memory_space<vmem>>, vector<1x128x128xbf16>
    %30 = vector.shape_cast %29 : vector<1x128x128xbf16> to vector<128x128xbf16>
    %cst_34 = arith.constant dense<0.000000e+00> : vector<256x128xf32>
    %31 = tpu.matmul %27, %30, %cst_34 {dimension_numbers = #tpu.dot_dimension_numbers<[1], [0], [0], [1], [0, 0, 1, 1], [], []>} : vector<256x128xbf16>, vector<128x128xbf16>, vector<256x128xf32> -> vector<256x128xf32>
    %32 = arith.addf %28, %31 : vector<256x128xf32>
    %c0_35 = arith.constant 0 : index
    %c0_36 = arith.constant 0 : index
    %33 = vector.load %arg9[%c0_35, %c0_36] : memref<256x128xf32, #tpu.memory_space<vmem>>, vector<256x128xf32>
    tpu.vector_store %arg9[%c0_35, %c0_36], %32 {strides = array<i32>} : memref<256x128xf32, #tpu.memory_space<vmem>>, vector<256x128xf32>,
    %c0_37 = arith.constant 0 : index
    %c1_38 = arith.constant 1 : index
    %c0_39 = arith.constant 0 : index
    %34 = vector.load %arg7[%c0_37, %c1_38, %c0_39] : memref<18x18x128xbf16, #tpu.memory_space<vmem>>, vector<18x16x128xbf16>
    %35 = vector.extract_strided_slice %34 {offsets = [0, 0, 0], sizes = [16, 16, 128], strides = [1, 1, 1]} : vector<18x16x128xbf16> to vector<16x16x128xbf16>
    %36 = vector.shape_cast %35 : vector<16x16x128xbf16> to vector<256x128xbf16>
    %c0_40 = arith.constant 0 : index
    %c0_41 = arith.constant 0 : index
    %37 = vector.load %arg9[%c0_40, %c0_41] : memref<256x128xf32, #tpu.memory_space<vmem>>, vector<256x128xf32>
    %c1_42 = arith.constant 1 : index
    %c0_43 = arith.constant 0 : index
    %c0_44 = arith.constant 0 : index
    %38 = vector.load %arg2[%c1_42, %c0_43, %c0_44] : memref<9x128x128xbf16, #tpu.memory_space<vmem>>, vector<1x128x128xbf16>
    %39 = vector.shape_cast %38 : vector<1x128x128xbf16> to vector<128x128xbf16>
    %cst_45 = arith.constant dense<0.000000e+00> : vector<256x128xf32>
    %40 = tpu.matmul %36, %39, %cst_45 {dimension_numbers = #tpu.dot_dimension_numbers<[1], [0], [0], [1], [0, 0, 1, 1], [], []>} : vector<256x128xbf16>, vector<128x128xbf16>, vector<256x128xf32> -> vector<256x128xf32>
    %41 = arith.addf %37, %40 : vector<256x128xf32>
    %c0_46 = arith.constant 0 : index
    %c0_47 = arith.constant 0 : index
    %42 = vector.load %arg9[%c0_46, %c0_47] : memref<256x128xf32, #tpu.memory_space<vmem>>, vector<256x128xf32>
    tpu.vector_store %arg9[%c0_46, %c0_47], %41 {strides = array<i32>} : memref<256x128xf32, #tpu.memory_space<vmem>>, vector<256x128xf32>,
    %43 = vector.extract_strided_slice %34 {offsets = [1, 0, 0], sizes = [16, 16, 128], strides = [1, 1, 1]} : vector<18x16x128xbf16> to vector<16x16x128xbf16>
    %44 = vector.shape_cast %43 : vector<16x16x128xbf16> to vector<256x128xbf16>
    %c0_48 = arith.constant 0 : index
    %c0_49 = arith.constant 0 : index
    %45 = vector.load %arg9[%c0_48, %c0_49] : memref<256x128xf32, #tpu.memory_space<vmem>>, vector<256x128xf32>
    %c4 = arith.constant 4 : index
    %c0_50 = arith.constant 0 : index
    %c0_51 = arith.constant 0 : index
    %46 = vector.load %arg2[%c4, %c0_50, %c0_51] : memref<9x128x128xbf16, #tpu.memory_space<vmem>>, vector<1x128x128xbf16>
    %47 = vector.shape_cast %46 : vector<1x128x128xbf16> to vector<128x128xbf16>
    %cst_52 = arith.constant dense<0.000000e+00> : vector<256x128xf32>
    %48 = tpu.matmul %44, %47, %cst_52 {dimension_numbers = #tpu.dot_dimension_numbers<[1], [0], [0], [1], [0, 0, 1, 1], [], []>} : vector<256x128xbf16>, vector<128x128xbf16>, vector<256x128xf32> -> vector<256x128xf32>
    %49 = arith.addf %45, %48 : vector<256x128xf32>
    %c0_53 = arith.constant 0 : index
    %c0_54 = arith.constant 0 : index
    %50 = vector.load %arg9[%c0_53, %c0_54] : memref<256x128xf32, #tpu.memory_space<vmem>>, vector<256x128xf32>
    tpu.vector_store %arg9[%c0_53, %c0_54], %49 {strides = array<i32>} : memref<256x128xf32, #tpu.memory_space<vmem>>, vector<256x128xf32>,
    %51 = vector.extract_strided_slice %34 {offsets = [2, 0, 0], sizes = [16, 16, 128], strides = [1, 1, 1]} : vector<18x16x128xbf16> to vector<16x16x128xbf16>
    %52 = vector.shape_cast %51 : vector<16x16x128xbf16> to vector<256x128xbf16>
    %c0_55 = arith.constant 0 : index
    %c0_56 = arith.constant 0 : index
    %53 = vector.load %arg9[%c0_55, %c0_56] : memref<256x128xf32, #tpu.memory_space<vmem>>, vector<256x128xf32>
    %c7 = arith.constant 7 : index
    %c0_57 = arith.constant 0 : index
    %c0_58 = arith.constant 0 : index
    %54 = vector.load %arg2[%c7, %c0_57, %c0_58] : memref<9x128x128xbf16, #tpu.memory_space<vmem>>, vector<1x128x128xbf16>
    %55 = vector.shape_cast %54 : vector<1x128x128xbf16> to vector<128x128xbf16>
    %cst_59 = arith.constant dense<0.000000e+00> : vector<256x128xf32>
    %56 = tpu.matmul %52, %55, %cst_59 {dimension_numbers = #tpu.dot_dimension_numbers<[1], [0], [0], [1], [0, 0, 1, 1], [], []>} : vector<256x128xbf16>, vector<128x128xbf16>, vector<256x128xf32> -> vector<256x128xf32>
    %57 = arith.addf %53, %56 : vector<256x128xf32>
    %c0_60 = arith.constant 0 : index
    %c0_61 = arith.constant 0 : index
    %58 = vector.load %arg9[%c0_60, %c0_61] : memref<256x128xf32, #tpu.memory_space<vmem>>, vector<256x128xf32>
    tpu.vector_store %arg9[%c0_60, %c0_61], %57 {strides = array<i32>} : memref<256x128xf32, #tpu.memory_space<vmem>>, vector<256x128xf32>,
    %c0_62 = arith.constant 0 : index
    %c2 = arith.constant 2 : index
    %c0_63 = arith.constant 0 : index
    %59 = vector.load %arg7[%c0_62, %c2, %c0_63] : memref<18x18x128xbf16, #tpu.memory_space<vmem>>, vector<18x16x128xbf16>
    %60 = vector.extract_strided_slice %59 {offsets = [0, 0, 0], sizes = [16, 16, 128], strides = [1, 1, 1]} : vector<18x16x128xbf16> to vector<16x16x128xbf16>
    %61 = vector.shape_cast %60 : vector<16x16x128xbf16> to vector<256x128xbf16>
    %c0_64 = arith.constant 0 : index
    %c0_65 = arith.constant 0 : index
    %62 = vector.load %arg9[%c0_64, %c0_65] : memref<256x128xf32, #tpu.memory_space<vmem>>, vector<256x128xf32>
    %c2_66 = arith.constant 2 : index
    %c0_67 = arith.constant 0 : index
    %c0_68 = arith.constant 0 : index
    %63 = vector.load %arg2[%c2_66, %c0_67, %c0_68] : memref<9x128x128xbf16, #tpu.memory_space<vmem>>, vector<1x128x128xbf16>
    %64 = vector.shape_cast %63 : vector<1x128x128xbf16> to vector<128x128xbf16>
    %cst_69 = arith.constant dense<0.000000e+00> : vector<256x128xf32>
    %65 = tpu.matmul %61, %64, %cst_69 {dimension_numbers = #tpu.dot_dimension_numbers<[1], [0], [0], [1], [0, 0, 1, 1], [], []>} : vector<256x128xbf16>, vector<128x128xbf16>, vector<256x128xf32> -> vector<256x128xf32>
    %66 = arith.addf %62, %65 : vector<256x128xf32>
    %c0_70 = arith.constant 0 : index
    %c0_71 = arith.constant 0 : index
    %67 = vector.load %arg9[%c0_70, %c0_71] : memref<256x128xf32, #tpu.memory_space<vmem>>, vector<256x128xf32>
    tpu.vector_store %arg9[%c0_70, %c0_71], %66 {strides = array<i32>} : memref<256x128xf32, #tpu.memory_space<vmem>>, vector<256x128xf32>,
    %68 = vector.extract_strided_slice %59 {offsets = [1, 0, 0], sizes = [16, 16, 128], strides = [1, 1, 1]} : vector<18x16x128xbf16> to vector<16x16x128xbf16>
    %69 = vector.shape_cast %68 : vector<16x16x128xbf16> to vector<256x128xbf16>
    %c0_72 = arith.constant 0 : index
    %c0_73 = arith.constant 0 : index
    %70 = vector.load %arg9[%c0_72, %c0_73] : memref<256x128xf32, #tpu.memory_space<vmem>>, vector<256x128xf32>
    %c5 = arith.constant 5 : index
    %c0_74 = arith.constant 0 : index
    %c0_75 = arith.constant 0 : index
    %71 = vector.load %arg2[%c5, %c0_74, %c0_75] : memref<9x128x128xbf16, #tpu.memory_space<vmem>>, vector<1x128x128xbf16>
    %72 = vector.shape_cast %71 : vector<1x128x128xbf16> to vector<128x128xbf16>
    %cst_76 = arith.constant dense<0.000000e+00> : vector<256x128xf32>
    %73 = tpu.matmul %69, %72, %cst_76 {dimension_numbers = #tpu.dot_dimension_numbers<[1], [0], [0], [1], [0, 0, 1, 1], [], []>} : vector<256x128xbf16>, vector<128x128xbf16>, vector<256x128xf32> -> vector<256x128xf32>
    %74 = arith.addf %70, %73 : vector<256x128xf32>
    %c0_77 = arith.constant 0 : index
    %c0_78 = arith.constant 0 : index
    %75 = vector.load %arg9[%c0_77, %c0_78] : memref<256x128xf32, #tpu.memory_space<vmem>>, vector<256x128xf32>
    tpu.vector_store %arg9[%c0_77, %c0_78], %74 {strides = array<i32>} : memref<256x128xf32, #tpu.memory_space<vmem>>, vector<256x128xf32>,
    %76 = vector.extract_strided_slice %59 {offsets = [2, 0, 0], sizes = [16, 16, 128], strides = [1, 1, 1]} : vector<18x16x128xbf16> to vector<16x16x128xbf16>
    %77 = vector.shape_cast %76 : vector<16x16x128xbf16> to vector<256x128xbf16>
    %c0_79 = arith.constant 0 : index
    %c0_80 = arith.constant 0 : index
    %78 = vector.load %arg9[%c0_79, %c0_80] : memref<256x128xf32, #tpu.memory_space<vmem>>, vector<256x128xf32>
    %c8 = arith.constant 8 : index
    %c0_81 = arith.constant 0 : index
    %c0_82 = arith.constant 0 : index
    %79 = vector.load %arg2[%c8, %c0_81, %c0_82] : memref<9x128x128xbf16, #tpu.memory_space<vmem>>, vector<1x128x128xbf16>
    %80 = vector.shape_cast %79 : vector<1x128x128xbf16> to vector<128x128xbf16>
    %cst_83 = arith.constant dense<0.000000e+00> : vector<256x128xf32>
    %81 = tpu.matmul %77, %80, %cst_83 {dimension_numbers = #tpu.dot_dimension_numbers<[1], [0], [0], [1], [0, 0, 1, 1], [], []>} : vector<256x128xbf16>, vector<128x128xbf16>, vector<256x128xf32> -> vector<256x128xf32>
    %82 = arith.addf %78, %81 : vector<256x128xf32>
    %c0_84 = arith.constant 0 : index
    %c0_85 = arith.constant 0 : index
    %83 = vector.load %arg9[%c0_84, %c0_85] : memref<256x128xf32, #tpu.memory_space<vmem>>, vector<256x128xf32>
    tpu.vector_store %arg9[%c0_84, %c0_85], %82 {strides = array<i32>} : memref<256x128xf32, #tpu.memory_space<vmem>>, vector<256x128xf32>,
    %cst_86 = arith.constant 0.000000e+00 : bf16
    %84 = vector.broadcast %cst_86 : bf16 to vector<18x18x128xbf16>
    %c0_87 = arith.constant 0 : index
    %c0_88 = arith.constant 0 : index
    %c0_89 = arith.constant 0 : index
    %85 = vector.load %arg8[%c0_87, %c0_88, %c0_89] : memref<18x18x128xbf16, #tpu.memory_space<vmem>>, vector<18x18x128xbf16>
    tpu.vector_store %arg8[%c0_87, %c0_88, %c0_89], %84 {strides = array<i32>} : memref<18x18x128xbf16, #tpu.memory_space<vmem>>, vector<18x18x128xbf16>,
    %c0_90 = arith.constant 0 : index
    %c0_91 = arith.constant 0 : index
    %86 = vector.load %arg9[%c0_90, %c0_91] : memref<256x128xf32, #tpu.memory_space<vmem>>, vector<256x128xf32>
    %cst_92 = arith.constant 0.000000e+00 : f32
    %87 = vector.broadcast %cst_92 : f32 to vector<256x128xf32>
    %88 = arith.maximumf %86, %87 : vector<256x128xf32>
    %89 = vector.shape_cast %88 : vector<256x128xf32> to vector<16x16x128xf32>
    %90 = arith.truncf %89 : vector<16x16x128xf32> to vector<16x16x128xbf16>
    %c1_93 = arith.constant 1 : index
    %c1_94 = arith.constant 1 : index
    %c0_95 = arith.constant 0 : index
    %91 = vector.load %arg8[%c1_93, %c1_94, %c0_95] : memref<18x18x128xbf16, #tpu.memory_space<vmem>>, vector<16x16x128xbf16>
    tpu.vector_store %arg8[%c1_93, %c1_94, %c0_95], %90 {strides = array<i32>} : memref<18x18x128xbf16, #tpu.memory_space<vmem>>, vector<16x16x128xbf16>,
    %c0_96 = arith.constant 0 : index
    %c0_97 = arith.constant 0 : index
    %92 = vector.load %arg5[%c0_96, %c0_97] : memref<1x128xf32, #tpu.memory_space<vmem>>, vector<1x128xf32>
    %93 = vector.shape_cast %92 : vector<1x128xf32> to vector<1x128xf32>
    %94 = vector.broadcast %93 : vector<1x128xf32> to vector<256x128xf32>
    %c0_98 = arith.constant 0 : index
    %c0_99 = arith.constant 0 : index
    %95 = vector.load %arg9[%c0_98, %c0_99] : memref<256x128xf32, #tpu.memory_space<vmem>>, vector<256x128xf32>
    tpu.vector_store %arg9[%c0_98, %c0_99], %94 {strides = array<i32>} : memref<256x128xf32, #tpu.memory_space<vmem>>, vector<256x128xf32>,
    %c0_100 = arith.constant 0 : index
    %c0_101 = arith.constant 0 : index
    %c0_102 = arith.constant 0 : index
    %96 = vector.load %arg8[%c0_100, %c0_101, %c0_102] : memref<18x18x128xbf16, #tpu.memory_space<vmem>>, vector<18x16x128xbf16>
    %97 = vector.extract_strided_slice %96 {offsets = [0, 0, 0], sizes = [16, 16, 128], strides = [1, 1, 1]} : vector<18x16x128xbf16> to vector<16x16x128xbf16>
    %98 = vector.shape_cast %97 : vector<16x16x128xbf16> to vector<256x128xbf16>
    %c0_103 = arith.constant 0 : index
    %c0_104 = arith.constant 0 : index
    %99 = vector.load %arg9[%c0_103, %c0_104] : memref<256x128xf32, #tpu.memory_space<vmem>>, vector<256x128xf32>
    %c0_105 = arith.constant 0 : index
    %c0_106 = arith.constant 0 : index
    %c0_107 = arith.constant 0 : index
    %100 = vector.load %arg4[%c0_105, %c0_106, %c0_107] : memref<9x128x128xbf16, #tpu.memory_space<vmem>>, vector<1x128x128xbf16>
    %101 = vector.shape_cast %100 : vector<1x128x128xbf16> to vector<128x128xbf16>
    %cst_108 = arith.constant dense<0.000000e+00> : vector<256x128xf32>
    %102 = tpu.matmul %98, %101, %cst_108 {dimension_numbers = #tpu.dot_dimension_numbers<[1], [0], [0], [1], [0, 0, 1, 1], [], []>} : vector<256x128xbf16>, vector<128x128xbf16>, vector<256x128xf32> -> vector<256x128xf32>
    %103 = arith.addf %99, %102 : vector<256x128xf32>
    %c0_109 = arith.constant 0 : index
    %c0_110 = arith.constant 0 : index
    %104 = vector.load %arg9[%c0_109, %c0_110] : memref<256x128xf32, #tpu.memory_space<vmem>>, vector<256x128xf32>
    tpu.vector_store %arg9[%c0_109, %c0_110], %103 {strides = array<i32>} : memref<256x128xf32, #tpu.memory_space<vmem>>, vector<256x128xf32>,
    %105 = vector.extract_strided_slice %96 {offsets = [1, 0, 0], sizes = [16, 16, 128], strides = [1, 1, 1]} : vector<18x16x128xbf16> to vector<16x16x128xbf16>
    %106 = vector.shape_cast %105 : vector<16x16x128xbf16> to vector<256x128xbf16>
    %c0_111 = arith.constant 0 : index
    %c0_112 = arith.constant 0 : index
    %107 = vector.load %arg9[%c0_111, %c0_112] : memref<256x128xf32, #tpu.memory_space<vmem>>, vector<256x128xf32>
    %c3_113 = arith.constant 3 : index
    %c0_114 = arith.constant 0 : index
    %c0_115 = arith.constant 0 : index
    %108 = vector.load %arg4[%c3_113, %c0_114, %c0_115] : memref<9x128x128xbf16, #tpu.memory_space<vmem>>, vector<1x128x128xbf16>
    %109 = vector.shape_cast %108 : vector<1x128x128xbf16> to vector<128x128xbf16>
    %cst_116 = arith.constant dense<0.000000e+00> : vector<256x128xf32>
    %110 = tpu.matmul %106, %109, %cst_116 {dimension_numbers = #tpu.dot_dimension_numbers<[1], [0], [0], [1], [0, 0, 1, 1], [], []>} : vector<256x128xbf16>, vector<128x128xbf16>, vector<256x128xf32> -> vector<256x128xf32>
    %111 = arith.addf %107, %110 : vector<256x128xf32>
    %c0_117 = arith.constant 0 : index
    %c0_118 = arith.constant 0 : index
    %112 = vector.load %arg9[%c0_117, %c0_118] : memref<256x128xf32, #tpu.memory_space<vmem>>, vector<256x128xf32>
    tpu.vector_store %arg9[%c0_117, %c0_118], %111 {strides = array<i32>} : memref<256x128xf32, #tpu.memory_space<vmem>>, vector<256x128xf32>,
    %113 = vector.extract_strided_slice %96 {offsets = [2, 0, 0], sizes = [16, 16, 128], strides = [1, 1, 1]} : vector<18x16x128xbf16> to vector<16x16x128xbf16>
    %114 = vector.shape_cast %113 : vector<16x16x128xbf16> to vector<256x128xbf16>
    %c0_119 = arith.constant 0 : index
    %c0_120 = arith.constant 0 : index
    %115 = vector.load %arg9[%c0_119, %c0_120] : memref<256x128xf32, #tpu.memory_space<vmem>>, vector<256x128xf32>
    %c6_121 = arith.constant 6 : index
    %c0_122 = arith.constant 0 : index
    %c0_123 = arith.constant 0 : index
    %116 = vector.load %arg4[%c6_121, %c0_122, %c0_123] : memref<9x128x128xbf16, #tpu.memory_space<vmem>>, vector<1x128x128xbf16>
    %117 = vector.shape_cast %116 : vector<1x128x128xbf16> to vector<128x128xbf16>
    %cst_124 = arith.constant dense<0.000000e+00> : vector<256x128xf32>
    %118 = tpu.matmul %114, %117, %cst_124 {dimension_numbers = #tpu.dot_dimension_numbers<[1], [0], [0], [1], [0, 0, 1, 1], [], []>} : vector<256x128xbf16>, vector<128x128xbf16>, vector<256x128xf32> -> vector<256x128xf32>
    %119 = arith.addf %115, %118 : vector<256x128xf32>
    %c0_125 = arith.constant 0 : index
    %c0_126 = arith.constant 0 : index
    %120 = vector.load %arg9[%c0_125, %c0_126] : memref<256x128xf32, #tpu.memory_space<vmem>>, vector<256x128xf32>
    tpu.vector_store %arg9[%c0_125, %c0_126], %119 {strides = array<i32>} : memref<256x128xf32, #tpu.memory_space<vmem>>, vector<256x128xf32>,
    %c0_127 = arith.constant 0 : index
    %c1_128 = arith.constant 1 : index
    %c0_129 = arith.constant 0 : index
    %121 = vector.load %arg8[%c0_127, %c1_128, %c0_129] : memref<18x18x128xbf16, #tpu.memory_space<vmem>>, vector<18x16x128xbf16>
    %122 = vector.extract_strided_slice %121 {offsets = [0, 0, 0], sizes = [16, 16, 128], strides = [1, 1, 1]} : vector<18x16x128xbf16> to vector<16x16x128xbf16>
    %123 = vector.shape_cast %122 : vector<16x16x128xbf16> to vector<256x128xbf16>
    %c0_130 = arith.constant 0 : index
    %c0_131 = arith.constant 0 : index
    %124 = vector.load %arg9[%c0_130, %c0_131] : memref<256x128xf32, #tpu.memory_space<vmem>>, vector<256x128xf32>
    %c1_132 = arith.constant 1 : index
    %c0_133 = arith.constant 0 : index
    %c0_134 = arith.constant 0 : index
    %125 = vector.load %arg4[%c1_132, %c0_133, %c0_134] : memref<9x128x128xbf16, #tpu.memory_space<vmem>>, vector<1x128x128xbf16>
    %126 = vector.shape_cast %125 : vector<1x128x128xbf16> to vector<128x128xbf16>
    %cst_135 = arith.constant dense<0.000000e+00> : vector<256x128xf32>
    %127 = tpu.matmul %123, %126, %cst_135 {dimension_numbers = #tpu.dot_dimension_numbers<[1], [0], [0], [1], [0, 0, 1, 1], [], []>} : vector<256x128xbf16>, vector<128x128xbf16>, vector<256x128xf32> -> vector<256x128xf32>
    %128 = arith.addf %124, %127 : vector<256x128xf32>
    %c0_136 = arith.constant 0 : index
    %c0_137 = arith.constant 0 : index
    %129 = vector.load %arg9[%c0_136, %c0_137] : memref<256x128xf32, #tpu.memory_space<vmem>>, vector<256x128xf32>
    tpu.vector_store %arg9[%c0_136, %c0_137], %128 {strides = array<i32>} : memref<256x128xf32, #tpu.memory_space<vmem>>, vector<256x128xf32>,
    %130 = vector.extract_strided_slice %121 {offsets = [1, 0, 0], sizes = [16, 16, 128], strides = [1, 1, 1]} : vector<18x16x128xbf16> to vector<16x16x128xbf16>
    %131 = vector.shape_cast %130 : vector<16x16x128xbf16> to vector<256x128xbf16>
    %c0_138 = arith.constant 0 : index
    %c0_139 = arith.constant 0 : index
    %132 = vector.load %arg9[%c0_138, %c0_139] : memref<256x128xf32, #tpu.memory_space<vmem>>, vector<256x128xf32>
    %c4_140 = arith.constant 4 : index
    %c0_141 = arith.constant 0 : index
    %c0_142 = arith.constant 0 : index
    %133 = vector.load %arg4[%c4_140, %c0_141, %c0_142] : memref<9x128x128xbf16, #tpu.memory_space<vmem>>, vector<1x128x128xbf16>
    %134 = vector.shape_cast %133 : vector<1x128x128xbf16> to vector<128x128xbf16>
    %cst_143 = arith.constant dense<0.000000e+00> : vector<256x128xf32>
    %135 = tpu.matmul %131, %134, %cst_143 {dimension_numbers = #tpu.dot_dimension_numbers<[1], [0], [0], [1], [0, 0, 1, 1], [], []>} : vector<256x128xbf16>, vector<128x128xbf16>, vector<256x128xf32> -> vector<256x128xf32>
    %136 = arith.addf %132, %135 : vector<256x128xf32>
    %c0_144 = arith.constant 0 : index
    %c0_145 = arith.constant 0 : index
    %137 = vector.load %arg9[%c0_144, %c0_145] : memref<256x128xf32, #tpu.memory_space<vmem>>, vector<256x128xf32>
    tpu.vector_store %arg9[%c0_144, %c0_145], %136 {strides = array<i32>} : memref<256x128xf32, #tpu.memory_space<vmem>>, vector<256x128xf32>,
    %138 = vector.extract_strided_slice %121 {offsets = [2, 0, 0], sizes = [16, 16, 128], strides = [1, 1, 1]} : vector<18x16x128xbf16> to vector<16x16x128xbf16>
    %139 = vector.shape_cast %138 : vector<16x16x128xbf16> to vector<256x128xbf16>
    %c0_146 = arith.constant 0 : index
    %c0_147 = arith.constant 0 : index
    %140 = vector.load %arg9[%c0_146, %c0_147] : memref<256x128xf32, #tpu.memory_space<vmem>>, vector<256x128xf32>
    %c7_148 = arith.constant 7 : index
    %c0_149 = arith.constant 0 : index
    %c0_150 = arith.constant 0 : index
    %141 = vector.load %arg4[%c7_148, %c0_149, %c0_150] : memref<9x128x128xbf16, #tpu.memory_space<vmem>>, vector<1x128x128xbf16>
    %142 = vector.shape_cast %141 : vector<1x128x128xbf16> to vector<128x128xbf16>
    %cst_151 = arith.constant dense<0.000000e+00> : vector<256x128xf32>
    %143 = tpu.matmul %139, %142, %cst_151 {dimension_numbers = #tpu.dot_dimension_numbers<[1], [0], [0], [1], [0, 0, 1, 1], [], []>} : vector<256x128xbf16>, vector<128x128xbf16>, vector<256x128xf32> -> vector<256x128xf32>
    %144 = arith.addf %140, %143 : vector<256x128xf32>
    %c0_152 = arith.constant 0 : index
    %c0_153 = arith.constant 0 : index
    %145 = vector.load %arg9[%c0_152, %c0_153] : memref<256x128xf32, #tpu.memory_space<vmem>>, vector<256x128xf32>
    tpu.vector_store %arg9[%c0_152, %c0_153], %144 {strides = array<i32>} : memref<256x128xf32, #tpu.memory_space<vmem>>, vector<256x128xf32>,
    %c0_154 = arith.constant 0 : index
    %c2_155 = arith.constant 2 : index
    %c0_156 = arith.constant 0 : index
    %146 = vector.load %arg8[%c0_154, %c2_155, %c0_156] : memref<18x18x128xbf16, #tpu.memory_space<vmem>>, vector<18x16x128xbf16>
    %147 = vector.extract_strided_slice %146 {offsets = [0, 0, 0], sizes = [16, 16, 128], strides = [1, 1, 1]} : vector<18x16x128xbf16> to vector<16x16x128xbf16>
    %148 = vector.shape_cast %147 : vector<16x16x128xbf16> to vector<256x128xbf16>
    %c0_157 = arith.constant 0 : index
    %c0_158 = arith.constant 0 : index
    %149 = vector.load %arg9[%c0_157, %c0_158] : memref<256x128xf32, #tpu.memory_space<vmem>>, vector<256x128xf32>
    %c2_159 = arith.constant 2 : index
    %c0_160 = arith.constant 0 : index
    %c0_161 = arith.constant 0 : index
    %150 = vector.load %arg4[%c2_159, %c0_160, %c0_161] : memref<9x128x128xbf16, #tpu.memory_space<vmem>>, vector<1x128x128xbf16>
    %151 = vector.shape_cast %150 : vector<1x128x128xbf16> to vector<128x128xbf16>
    %cst_162 = arith.constant dense<0.000000e+00> : vector<256x128xf32>
    %152 = tpu.matmul %148, %151, %cst_162 {dimension_numbers = #tpu.dot_dimension_numbers<[1], [0], [0], [1], [0, 0, 1, 1], [], []>} : vector<256x128xbf16>, vector<128x128xbf16>, vector<256x128xf32> -> vector<256x128xf32>
    %153 = arith.addf %149, %152 : vector<256x128xf32>
    %c0_163 = arith.constant 0 : index
    %c0_164 = arith.constant 0 : index
    %154 = vector.load %arg9[%c0_163, %c0_164] : memref<256x128xf32, #tpu.memory_space<vmem>>, vector<256x128xf32>
    tpu.vector_store %arg9[%c0_163, %c0_164], %153 {strides = array<i32>} : memref<256x128xf32, #tpu.memory_space<vmem>>, vector<256x128xf32>,
    %155 = vector.extract_strided_slice %146 {offsets = [1, 0, 0], sizes = [16, 16, 128], strides = [1, 1, 1]} : vector<18x16x128xbf16> to vector<16x16x128xbf16>
    %156 = vector.shape_cast %155 : vector<16x16x128xbf16> to vector<256x128xbf16>
    %c0_165 = arith.constant 0 : index
    %c0_166 = arith.constant 0 : index
    %157 = vector.load %arg9[%c0_165, %c0_166] : memref<256x128xf32, #tpu.memory_space<vmem>>, vector<256x128xf32>
    %c5_167 = arith.constant 5 : index
    %c0_168 = arith.constant 0 : index
    %c0_169 = arith.constant 0 : index
    %158 = vector.load %arg4[%c5_167, %c0_168, %c0_169] : memref<9x128x128xbf16, #tpu.memory_space<vmem>>, vector<1x128x128xbf16>
    %159 = vector.shape_cast %158 : vector<1x128x128xbf16> to vector<128x128xbf16>
    %cst_170 = arith.constant dense<0.000000e+00> : vector<256x128xf32>
    %160 = tpu.matmul %156, %159, %cst_170 {dimension_numbers = #tpu.dot_dimension_numbers<[1], [0], [0], [1], [0, 0, 1, 1], [], []>} : vector<256x128xbf16>, vector<128x128xbf16>, vector<256x128xf32> -> vector<256x128xf32>
    %161 = arith.addf %157, %160 : vector<256x128xf32>
    %c0_171 = arith.constant 0 : index
    %c0_172 = arith.constant 0 : index
    %162 = vector.load %arg9[%c0_171, %c0_172] : memref<256x128xf32, #tpu.memory_space<vmem>>, vector<256x128xf32>
    tpu.vector_store %arg9[%c0_171, %c0_172], %161 {strides = array<i32>} : memref<256x128xf32, #tpu.memory_space<vmem>>, vector<256x128xf32>,
    %163 = vector.extract_strided_slice %146 {offsets = [2, 0, 0], sizes = [16, 16, 128], strides = [1, 1, 1]} : vector<18x16x128xbf16> to vector<16x16x128xbf16>
    %164 = vector.shape_cast %163 : vector<16x16x128xbf16> to vector<256x128xbf16>
    %c0_173 = arith.constant 0 : index
    %c0_174 = arith.constant 0 : index
    %165 = vector.load %arg9[%c0_173, %c0_174] : memref<256x128xf32, #tpu.memory_space<vmem>>, vector<256x128xf32>
    %c8_175 = arith.constant 8 : index
    %c0_176 = arith.constant 0 : index
    %c0_177 = arith.constant 0 : index
    %166 = vector.load %arg4[%c8_175, %c0_176, %c0_177] : memref<9x128x128xbf16, #tpu.memory_space<vmem>>, vector<1x128x128xbf16>
    %167 = vector.shape_cast %166 : vector<1x128x128xbf16> to vector<128x128xbf16>
    %cst_178 = arith.constant dense<0.000000e+00> : vector<256x128xf32>
    %168 = tpu.matmul %164, %167, %cst_178 {dimension_numbers = #tpu.dot_dimension_numbers<[1], [0], [0], [1], [0, 0, 1, 1], [], []>} : vector<256x128xbf16>, vector<128x128xbf16>, vector<256x128xf32> -> vector<256x128xf32>
    %169 = arith.addf %165, %168 : vector<256x128xf32>
    %c0_179 = arith.constant 0 : index
    %c0_180 = arith.constant 0 : index
    %170 = vector.load %arg9[%c0_179, %c0_180] : memref<256x128xf32, #tpu.memory_space<vmem>>, vector<256x128xf32>
    tpu.vector_store %arg9[%c0_179, %c0_180], %169 {strides = array<i32>} : memref<256x128xf32, #tpu.memory_space<vmem>>, vector<256x128xf32>,
    %c0_181 = arith.constant 0 : index
    %c0_182 = arith.constant 0 : index
    %171 = vector.load %arg9[%c0_181, %c0_182] : memref<256x128xf32, #tpu.memory_space<vmem>>, vector<256x128xf32>
    %cst_183 = arith.constant 0.000000e+00 : f32
    %172 = vector.broadcast %cst_183 : f32 to vector<256x128xf32>
    %173 = arith.maximumf %171, %172 : vector<256x128xf32>
    %174 = vector.shape_cast %173 : vector<256x128xf32> to vector<1x16x16x128xf32>
    %c0_184 = arith.constant 0 : index
    %c0_185 = arith.constant 0 : index
    %c0_186 = arith.constant 0 : index
    %c0_187 = arith.constant 0 : index
    %175 = vector.load %arg6[%c0_184, %c0_185, %c0_186, %c0_187] : memref<1x16x16x128xf32, #tpu.memory_space<vmem>>, vector<1x16x16x128xf32>
    tpu.vector_store %arg6[%c0_184, %c0_185, %c0_186, %c0_187], %174 {strides = array<i32>} : memref<1x16x16x128xf32, #tpu.memory_space<vmem>>, vector<1x16x16x128xf32>,
    return
  }
  func.func @transform_0(%arg0: i32) -> (i32, i32, i32, i32) {
    %c0_i32 = arith.constant 0 : i32
    %c0_i32_0 = arith.constant 0 : i32
    %c0_i32_1 = arith.constant 0 : i32
    %c0_i32_2 = arith.constant 0 : i32
    return %arg0, %c0_i32, %c0_i32_0, %c0_i32_1 : i32, i32, i32, i32
  }
  func.func @transform_1(%arg0: i32) -> (i32, i32, i32) {
    %c0_i32 = arith.constant 0 : i32
    %c0_i32_0 = arith.constant 0 : i32
    %c0_i32_1 = arith.constant 0 : i32
    %c0_i32_2 = arith.constant 0 : i32
    return %c0_i32, %c0_i32_0, %c0_i32_1 : i32, i32, i32
  }
  func.func @transform_2(%arg0: i32) -> (i32, i32) {
    %c0_i32 = arith.constant 0 : i32
    %c0_i32_0 = arith.constant 0 : i32
    %c0_i32_1 = arith.constant 0 : i32
    return %c0_i32, %c0_i32_0 : i32, i32
  }
  func.func @transform_3(%arg0: i32) -> (i32, i32, i32) {
    %c0_i32 = arith.constant 0 : i32
    %c0_i32_0 = arith.constant 0 : i32
    %c0_i32_1 = arith.constant 0 : i32
    %c0_i32_2 = arith.constant 0 : i32
    return %c0_i32, %c0_i32_0, %c0_i32_1 : i32, i32, i32
  }
  func.func @transform_4(%arg0: i32) -> (i32, i32) {
    %c0_i32 = arith.constant 0 : i32
    %c0_i32_0 = arith.constant 0 : i32
    %c0_i32_1 = arith.constant 0 : i32
    return %c0_i32, %c0_i32_0 : i32, i32
  }
  func.func @transform_5(%arg0: i32) -> (i32, i32, i32, i32) {
    %c0_i32 = arith.constant 0 : i32
    %c0_i32_0 = arith.constant 0 : i32
    %c0_i32_1 = arith.constant 0 : i32
    %c0_i32_2 = arith.constant 0 : i32
    return %arg0, %c0_i32, %c0_i32_0, %c0_i32_1 : i32, i32, i32, i32
  }
}

</mosaic_0001>

<bundles_post_ra>
// kernel: double_conv_forward.1
= control target key start
LH: loop header
LB: loop body
LE: loop exit
PB: predicated region body
PF: predicated region fallthrough
CT: control target
= control target key end

     0   :  { %s12168_s18 = smov 0   ;;  %s14167_s0 = inlined_call_operand.vmem [shape: bf16[2,16,16,128], index: 0, kind: input, shape index: {}]   ;;  %s14168_s1 = inlined_call_operand.vmem [shape: bf16[9,128,128], index: 1, kind: input, shape index: {}]   ;;  %s14169_s2 = inlined_call_operand.vmem [shape: f32[1,128], index: 2, kind: input, shape index: {}]   ;;  %s14170_s3 = inlined_call_operand.vmem [shape: bf16[9,128,128], index: 3, kind: input, shape index: {}]   ;;  %s14171_s4 = inlined_call_operand.vmem [shape: f32[1,128], index: 4, kind: input, shape index: {}]   ;;  %s14172_s5 = inlined_call_operand.vmem [shape: f32[2,16,16,128], index: 5, kind: output, shape index: {}]  }
   0x1 LB: > { %s9445_s19 = sadd.s32 4294967295, %s12135_s18   ;;  %p9449_p0 = scmp.ge.s32.totalorder %s12135_s18, 1  ;;  %s12135_s18 = sphi %s12168_s18, %s15_s18  }
   0x2   : > { %p187_p1 = scmp.lt.s32.totalorder %s12135_s18, 3 }
   0x4   : > { %p188_p2 = pnand %p9449_p0, %p187_p1 }
   0x5   : > { %v12179_v0 = vld [vmem:[%s14168_s1] sm:$0xff] (!%p188_p2)   ;;  %v12184_v1 = vld [vmem:[%s14168_s1 + $0x8] sm:$0xff] (!%p188_p2)   ;;  %v12137_v2 = vmov (!%p188_p2), 0   ;;  %p215_p3 = scmp.lt.s32.totalorder (!%p188_p2), %s9445_s19, 1  ;;  %v11951_v3 = vld [vmem:[%s14168_s1 + $0x10] sm:$0xff] (!%p188_p2)   ;;  %vm643_vm0 = vcmask (!%p188_p2), 1040384  }
   0x6   : > { %191 = sbr.rel (%p188_p2) target bundleno = 1622 (0x656), region = 40  ;;  %226 = vst [vmem:[#allocation2] sm:$0xf] (!%p188_p2), %v12137_v2  ;;  %227 = vst [vmem:[#allocation2 + $0x4] sm:$0xf] (!%p188_p2), %v12137_v2  ;;  %10500 = vmatprep.subr.bf16.mxu0 (!%p188_p2), %v12179_v0  ;;  %v11952_v4 = vld [vmem:[%s14168_s1 + $0x18] sm:$0xff] (!%p188_p2)  }
   0x7   : > { %228 = vst [vmem:[#allocation2 + $0x8] sm:$0x1] (!%p188_p2), %v12137_v2  ;;  %229 = vst [vmem:[#allocation2 + $0xc] sm:$0xf] (!%p188_p2), %v12137_v2  ;;  %10501 = vmatpush3.bf16.msra.mxu0 (!%p188_p2), %v12179_v0  ;;  %vm636_vm1 = vcmask (!%p188_p2), 1043456   ;;  %v11953_v12 = vld [vmem:[%s14168_s1 + $0x20] sm:$0xff] (!%p188_p2)  }
   0x8   : > { %230 = vst [vmem:[#allocation2 + $0x10] sm:$0xf] (!%p188_p2), %v12137_v2  ;;  %231 = vst [vmem:[#allocation2 + $0x14] sm:$0x1] (!%p188_p2), %v12137_v2  ;;  %10502 = vmatprep.subr.bf16.mxu0 (!%p188_p2), %v12184_v1  ;;  %vm312_vm2 = vsmask.f32 (!%p188_p2), 256 }
   0x9   : > { %232 = vst [vmem:[#allocation2 + $0x18] sm:$0xf] (!%p188_p2), %v12137_v2  ;;  %233 = vst [vmem:[#allocation2 + $0x1c] sm:$0xf] (!%p188_p2), %v12137_v2  ;;  %vm313_vm3 = vsmask.f32 (!%p188_p2), 4368 }
   0xa   : > { %234 = vst [vmem:[#allocation2 + $0x20] sm:$0x1] (!%p188_p2), %v12137_v2  ;;  %235 = vst [vmem:[#allocation2 + $0x24] sm:$0xf] (!%p188_p2), %v12137_v2  ;;  %vm637_vm6 = vsmask.f32 (!%p188_p2), 7938 }
   0xb   : > { %236 = vst [vmem:[#allocation2 + $0x28] sm:$0xf] (!%p188_p2), %v12137_v2  ;;  %237 = vst [vmem:[#allocation2 + $0x2c] sm:$0x1] (!%p188_p2), %v12137_v2  ;;  %10503 = vmatpush3.bf16.msra.mxu0 (!%p188_p2), %v12184_v1  ;;  %v11954_v32 = vld [vmem:[%s14168_s1 + $0x28] sm:$0xff] (!%p188_p2)   ;;  %v11955_v50 = vld [vmem:[%s14168_s1 + $0x30] sm:$0xff] (!%p188_p2)  }
   0xc   : > { %238 = vst [vmem:[#allocation2 + $0x30] sm:$0xf] (!%p188_p2), %v12137_v2  ;;  %239 = vst [vmem:[#allocation2 + $0x34] sm:$0xf] (!%p188_p2), %v12137_v2  ;;  %10504 = vmatprep.subr.bf16.mxu0 (!%p188_p2), %v11951_v3  ;;  %vm1955_vm8 = vsmask.f32 (!%p188_p2), 3328 }
   0xd   : > { %240 = vst [vmem:[#allocation2 + $0x38] sm:$0x1] %v12137_v2  ;;  %241 = vst [vmem:[#allocation2 + $0x3c] sm:$0xf] %v12137_v2  ;;  %s14184_s19 = smov (!%p215_p3, %s9445_s19), 1  ;;  %v11957_v5 = vld [vmem:[#allocation2] sm:$0xff]  }
   0xe   : > { %242 = vst [vmem:[#allocation2 + $0x40] sm:$0xf] %v12137_v2  ;;  %243 = vst [vmem:[#allocation2 + $0x44] sm:$0x1] %v12137_v2  ;;  %s10034_s26 = sshll.u32 %s14184_s19, 7  ;;  %10516 = vmatprep.mubr.bf16.mxu0 %v11957_v5  ;;  %vm3530_vm11 = vcmask 1042432  }
   0xf   : > { %244 = vst [vmem:[#allocation2 + $0x48] sm:$0xf] %v12137_v2  ;;  %245 = vst [vmem:[#allocation2 + $0x4c] sm:$0xf] %v12137_v2  ;;  %s12310_s29 = scalar_lea.vmem %s14167_s0, %s10034_s26  ;;  %10505 = vmatpush3.bf16.msra.mxu0 %v11951_v3  ;;  %v639_v15 = vld [vmem:[#allocation2 + $0xc] sm:$0xf] }
  0x10   : > { %246 = vst [vmem:[#allocation2 + $0x50] sm:$0x1] %v12137_v2  ;;  %247 = vst [vmem:[#allocation2 + $0x54] sm:$0xf] %v12137_v2  ;;  %v280_v6 = vld [vmem:[%s12310_s29] sm:$0xf]  ;;  %10506 = vmatprep.subr.bf16.mxu0 %v11952_v4 }
  0x11   : > { %248 = vst [vmem:[#allocation2 + $0x58] sm:$0xf] %v12137_v2  ;;  %249 = vst [vmem:[#allocation2 + $0x5c] sm:$0x1] %v12137_v2  ;;  %v281_v7 = vld [vmem:[%s12310_s29 + $0x4] sm:$0xf] }
  0x12   : > { %250 = vst [vmem:[#allocation2 + $0x60] sm:$0xf] %v12137_v2  ;;  %251 = vst [vmem:[#allocation2 + $0x64] sm:$0xf] %v12137_v2  ;;  %v316_v8 = vshrl.u32 %v280_v6, 16  ;;  %v319_v9 = vshll.u32 %v280_v6, 16 }
  0x13   : > { %252 = vst [vmem:[#allocation2 + $0x68] sm:$0x1] %v12137_v2  ;;  %253 = vst [vmem:[#allocation2 + $0x6c] sm:$0xf] %v12137_v2  ;;  %v324_v10 = vshrl.u32 %v281_v7, 16  ;;  %v327_v14 = vshll.u32 %v281_v7, 16  ;;  %10507 = vmatpush3.bf16.msra.mxu0 %v11952_v4 }
  0x14   : > { %254 = vst [vmem:[#allocation2 + $0x70] sm:$0xf] %v12137_v2  ;;  %255 = vst [vmem:[#allocation2 + $0x74] sm:$0x1] %v12137_v2  ;;  %v318_v16 = vrot.slane %v316_v8, 7  ;;  %10508 = vmatprep.subr.bf16.mxu0 %v11953_v12  ;;  %v11956_v6 = vld [vmem:[%s14168_s1 + $0x38] sm:$0xff]  }
  0x15   : > { %256 = vst [vmem:[#allocation2 + $0x78] sm:$0xf] %v12137_v2  ;;  %257 = vst [vmem:[#allocation2 + $0x7c] sm:$0xf] %v12137_v2  ;;  %v326_v17 = vrot.slane %v324_v10, 7  ;;  %vm3531_vm12 = vcmask 1046532  }
  0x16   : > { %258 = vst [vmem:[#allocation2 + $0x80] sm:$0x1] %v12137_v2  ;;  %259 = vst [vmem:[#allocation2 + $0x84] sm:$0xf] %v12137_v2  ;;  %v645_v19 = vld [vmem:[#allocation2 + $0x14] sm:$0x1]  ;;  %v321_v22 = vor.u32 %v319_v9, %v318_v16 }
  0x17   : > { %260 = vst [vmem:[#allocation2 + $0x88] sm:$0xf] %v12137_v2  ;;  %261 = vst [vmem:[#allocation2 + $0x8c] sm:$0x1] %v12137_v2  ;;  %v282_v20 = vld [vmem:[%s12310_s29 + $0x8] sm:$0xf]  ;;  %v329_v24 = vor.u32 %v327_v14, %v326_v17  ;;  %10509 = vmatpush3.bf16.msra.mxu0 %v11953_v12 }
  0x18   : > { %262 = vst [vmem:[#allocation2 + $0x90] sm:$0xf] %v12137_v2  ;;  %263 = vst [vmem:[#allocation2 + $0x94] sm:$0xf] %v12137_v2  ;;  %v283_v21 = vld [vmem:[%s12310_s29 + $0xc] sm:$0xf]  ;;  %10510 = vmatprep.subr.bf16.mxu0 %v11954_v32 }
  0x19   : > { %264 = vst [vmem:[#allocation2 + $0x98] sm:$0x1] %v12137_v2  ;;  %265 = vst [vmem:[#allocation2 + $0x9c] sm:$0xf] %v12137_v2  ;;  %v322_v23 = vrot.slane %v318_v16, 4  ;;  %v331_v25 = vrot.slane %v326_v17, 4 }
  0x1a   : > { %266 = vst [vmem:[#allocation2 + $0xa0] sm:$0xf] %v12137_v2  ;;  %267 = vst [vmem:[#allocation2 + $0xa4] sm:$0x1] %v12137_v2  ;;  %v284_v26 = vld [vmem:[%s12310_s29 + $0x10] sm:$0xf] }
  0x1b   : > { %268 = vst [vmem:[#allocation2 + $0xa8] sm:$0xf] %v12137_v2  ;;  %269 = vst [vmem:[#allocation2 + $0xac] sm:$0xf] %v12137_v2  ;;  %v333_v27 = vshrl.u32 %v282_v20, 16  ;;  %v336_v28 = vshll.u32 %v282_v20, 16  ;;  %10511 = vmatpush3.bf16.msra.mxu0 %v11954_v32 }
  0x1c   : > { %270 = vst [vmem:[#allocation2 + $0xb0] sm:$0x1] %v12137_v2  ;;  %271 = vst [vmem:[#allocation2 + $0xb4] sm:$0xf] %v12137_v2  ;;  %v341_v29 = vshrl.u32 %v283_v21, 16  ;;  %v344_v30 = vshll.u32 %v283_v21, 16  ;;  %10512 = vmatprep.subr.bf16.mxu0 %v11955_v50 }
  0x1d   : > { %272 = vst [vmem:[#allocation2 + $0xb8] sm:$0xf] %v12137_v2  ;;  %273 = vst [vmem:[#allocation2 + $0xbc] sm:$0x1] %v12137_v2  ;;  %v285_v31 = vld [vmem:[%s12310_s29 + $0x14] sm:$0xf] }
  0x1e   : > { %274 = vst [vmem:[#allocation2 + $0xc0] sm:$0xf] %v12137_v2  ;;  %275 = vst [vmem:[#allocation2 + $0xc4] sm:$0xf] %v12137_v2  ;;  %v648_v36 = vld [vmem:[#allocation2 + $0x18] sm:$0xf] }
  0x1f   : > { %276 = vst [vmem:[#allocation2 + $0xc8] sm:$0x1] %v12137_v2  ;;  %277 = vst [vmem:[#allocation2 + $0xcc] sm:$0xf] %v12137_v2  ;;  %v350_v37 = vshrl.u32 %v284_v26, 16  ;;  %v335_v38 = vrot.slane %v333_v27, 7  ;;  %10513 = vmatpush3.bf16.msra.mxu0 %v11955_v50 }
  0x20   : > { %278 = vst [vmem:[#allocation2 + $0xd0] sm:$0xf] %v12137_v2  ;;  %279 = vst [vmem:[#allocation2 + $0xd4] sm:$0x1] %v12137_v2  ;;  %v12347_v39 = vrot.slane %v341_v29, 7  ;;  %v353_v40 = vshll.u32 %v284_v26, 16  ;;  %10514 = vmatprep.subr.bf16.mxu0 %v11956_v6 }
  0x21   : > { %4703 = vst [vmem:[#allocation3] sm:$0xf] %v12137_v2  ;;  %4704 = vst [vmem:[#allocation3 + $0x4] sm:$0xf] %v12137_v2  ;;  %v358_v41 = vshrl.u32 %v285_v31, 16  ;;  %v352_v42 = vrot.slane %v350_v37, 7  ;;  %v338_v46 = vor.u32 %v336_v28, %v335_v38 }
  0x22   : > { %4705 = vst [vmem:[#allocation3 + $0x8] sm:$0x1] %v12137_v2  ;;  %4706 = vst [vmem:[#allocation3 + $0xc] sm:$0xf] %v12137_v2  ;;  %v361_v43 = vshll.u32 %v285_v31, 16  ;;  %v339_v47 = vrot.slane %v335_v38, 4  ;;  %v346_v48 = vor.u32 %v344_v30, %v12347_v39 }
  0x23   : > { %4707 = vst [vmem:[#allocation3 + $0x10] sm:$0xf] %v12137_v2  ;;  %4708 = vst [vmem:[#allocation3 + $0x14] sm:$0x1] %v12137_v2  ;;  %v286_v44 = vld [vmem:[%s12310_s29 + $0x18] sm:$0xf]  ;;  %v355_v51 = vor.u32 %v353_v40, %v352_v42  ;;  %10515 = vmatpush3.bf16.msra.mxu0 %v11956_v6 }
  0x24   : > { %4709 = vst [vmem:[#allocation3 + $0x18] sm:$0xf] %v12137_v2  ;;  %4710 = vst [vmem:[#allocation3 + $0x1c] sm:$0xf] %v12137_v2  ;;  %v287_v45 = vld [vmem:[%s12310_s29 + $0x1c] sm:$0xf] }
  0x25   : > { %4711 = vst [vmem:[#allocation3 + $0x20] sm:$0x1] %v12137_v2  ;;  %4712 = vst [vmem:[#allocation3 + $0x24] sm:$0xf] %v12137_v2  ;;  %v655_v49 = vld [vmem:[#allocation2 + $0x24] sm:$0xf] }
  0x26   : > { %4713 = vst [vmem:[#allocation3 + $0x28] sm:$0xf] %v12137_v2  ;;  %4714 = vst [vmem:[#allocation3 + $0x2c] sm:$0x1] %v12137_v2  ;;  %v356_v52 = vrot.slane %v352_v42, 4  ;;  %v12355_v53 = vrot.slane %v358_v41, 7 }
  0x27   : > { %4715 = vst [vmem:[#allocation3 + $0x30] sm:$0xf] %v12137_v2  ;;  %4716 = vst [vmem:[#allocation3 + $0x34] sm:$0xf] %v12137_v2  ;;  %v367_v54 = vshrl.u32 %v286_v44, 16  ;;  %v370_v58 = vshll.u32 %v286_v44, 16 }
  0x28   : > { %4717 = vst [vmem:[#allocation3 + $0x38] sm:$0x1] %v12137_v2  ;;  %4718 = vst [vmem:[#allocation3 + $0x3c] sm:$0xf] %v12137_v2  ;;  %v288_v55 = vld [vmem:[%s12310_s29 + $0x20] sm:$0xf]  ;;  %v363_v61 = vor.u32 %v361_v43, %v12355_v53 }
  0x29   : > { %4719 = vst [vmem:[#allocation3 + $0x40] sm:$0xf] %v12137_v2  ;;  %4720 = vst [vmem:[#allocation3 + $0x44] sm:$0x1] %v12137_v2  ;;  %v375_v59 = vshrl.u32 %v287_v45, 16  ;;  %v369_v63 = vrot.slane %v367_v54, 7 }
  0x2a   : > { %4721 = vst [vmem:[#allocation3 + $0x48] sm:$0xf] %v12137_v2  ;;  %4722 = vst [vmem:[#allocation3 + $0x4c] sm:$0xf] %v12137_v2  ;;  %v662_v60 = vld [vmem:[#allocation2 + $0x30] sm:$0xf] }
  0x2b   : > { %4723 = vst [vmem:[#allocation3 + $0x50] sm:$0x1] %v12137_v2  ;;  %4724 = vst [vmem:[#allocation3 + $0x54] sm:$0xf] %v12137_v2  ;;  %v289_v0 = vld [vmem:[%s12310_s29 + $0x24] sm:$0xf]  ;;  %v372_v8 = vor.u32 %v370_v58, %v369_v63 }
  0x2c   : > { %4725 = vst [vmem:[#allocation3 + $0x58] sm:$0xf] %v12137_v2  ;;  %4726 = vst [vmem:[#allocation3 + $0x5c] sm:$0x1] %v12137_v2  ;;  %v12366_v1 = vrot.slane %v375_v59, 7  ;;  %v384_v3 = vshrl.u32 %v288_v55, 16 }
  0x2d   : > { %4727 = vst [vmem:[#allocation3 + $0x60] sm:$0xf] %v12137_v2  ;;  %4728 = vst [vmem:[#allocation3 + $0x64] sm:$0xf] %v12137_v2  ;;  %v387_v4 = vshll.u32 %v288_v55, 16  ;;  %v373_v9 = vrot.slane %v369_v63, 4 }
  0x2e   : > { %4729 = vst [vmem:[#allocation3 + $0x68] sm:$0x1] %v12137_v2  ;;  %4730 = vst [vmem:[#allocation3 + $0x6c] sm:$0xf] %v12137_v2  ;;  %v290_v5 = vld [vmem:[%s12310_s29 + $0x28] sm:$0xf] }
  0x2f   : > { %4731 = vst [vmem:[#allocation3 + $0x70] sm:$0xf] %v12137_v2  ;;  %4732 = vst [vmem:[#allocation3 + $0x74] sm:$0x1] %v12137_v2  ;;  %v386_v12 = vrot.slane %v384_v3, 7  ;;  %v392_v14 = vshrl.u32 %v289_v0, 16 }
  0x30   : > { %4733 = vst [vmem:[#allocation3 + $0x78] sm:$0xf] %v12137_v2  ;;  %4734 = vst [vmem:[#allocation3 + $0x7c] sm:$0xf] %v12137_v2  ;;  %v291_v16 = vld [vmem:[%s12310_s29 + $0x2c] sm:$0xf] }
  0x31   : > { %4735 = vst [vmem:[#allocation3 + $0x80] sm:$0x1] %v12137_v2  ;;  %4736 = vst [vmem:[#allocation3 + $0x84] sm:$0xf] %v12137_v2  ;;  %v401_v20 = vshrl.u32 %v290_v5, 16  ;;  %v404_v21 = vshll.u32 %v290_v5, 16 }
  0x32   : > { %4737 = vst [vmem:[#allocation3 + $0x88] sm:$0xf] %v12137_v2  ;;  %4738 = vst [vmem:[#allocation3 + $0x8c] sm:$0x1] %v12137_v2  ;;  %v390_v26 = vrot.slane %v386_v12, 4  ;;  %v12384_v27 = vrot.slane %v392_v14, 7 }
  0x33   : > { %4739 = vst [vmem:[#allocation3 + $0x90] sm:$0xf] %v12137_v2  ;;  %4740 = vst [vmem:[#allocation3 + $0x94] sm:$0xf] %v12137_v2  ;;  %v293_v28 = vld [vmem:[%s12310_s29 + $0x34] sm:$0xf] }
  0x34   : > { %4741 = vst [vmem:[#allocation3 + $0x98] sm:$0x1] %v12137_v2  ;;  %4742 = vst [vmem:[#allocation3 + $0x9c] sm:$0xf] %v12137_v2  ;;  %v403_v29 = vrot.slane %v401_v20, 7  ;;  %v409_v30 = vshrl.u32 %v291_v16, 16 }
  0x35   : > { %4743 = vst [vmem:[#allocation3 + $0xa0] sm:$0xf] %v12137_v2  ;;  %4744 = vst [vmem:[#allocation3 + $0xa4] sm:$0x1] %v12137_v2  ;;  %v412_v31 = vshll.u32 %v291_v16, 16  ;;  %v12072_v13 = vld [vmem:[%s14170_s3 + $0x188] sm:$0xff]  }
  0x36   : > { %4745 = vst [vmem:[#allocation3 + $0xa8] sm:$0xf] %v12137_v2  ;;  %4746 = vst [vmem:[#allocation3 + $0xac] sm:$0xf] %v12137_v2  ;;  %v406_v37 = vor.u32 %v404_v21, %v403_v29  ;;  %v407_v38 = vrot.slane %v403_v29, 4  ;;  %v12392_v40 = vrot.slane %v409_v30, 7 }
  0x37   : > { %4747 = vst [vmem:[#allocation3 + $0xb0] sm:$0x1] %v12137_v2  ;;  %4748 = vst [vmem:[#allocation3 + $0xb4] sm:$0xf] %v12137_v2  ;;  %v683_v50 = vld [vmem:[#allocation2 + $0x54] sm:$0xf] }
  0x38   : > { %4749 = vst [vmem:[#allocation3 + $0xb8] sm:$0xf] %v12137_v2  ;;  %4750 = vst [vmem:[#allocation3 + $0xbc] sm:$0x1] %v12137_v2  ;;  %v294_v55 = vld [vmem:[%s12310_s29 + $0x38] sm:$0xf] }
  0x39   : > { %4751 = vst [vmem:[#allocation3 + $0xc0] sm:$0xf] %v12137_v2  ;;  %4752 = vst [vmem:[#allocation3 + $0xc4] sm:$0xf] %v12137_v2  ;;  %v435_v58 = vshrl.u32 %v294_v55, 16  ;;  %v438_v59 = vshll.u32 %v294_v55, 16 }
  0x3a   : > { %4753 = vst [vmem:[#allocation3 + $0xc8] sm:$0x1] %v12137_v2  ;;  %4754 = vst [vmem:[#allocation3 + $0xcc] sm:$0xf] %v12137_v2  ;;  %v296_v5 = vld [vmem:[%s12310_s29 + $0x40] sm:$0xf] }
  0x3b   : > { %4755 = vst [vmem:[#allocation3 + $0xd0] sm:$0xf] %v12137_v2  ;;  %4756 = vst [vmem:[#allocation3 + $0xd4] sm:$0x1] %v12137_v2  ;;  %v378_v2 = vshll.u32 %v287_v45, 16  ;;  %v426_v45 = vshrl.u32 %v293_v28, 16 }
  0x3c   : > { %vm12318_vm4 = vmand %vm643_vm0, %vm312_vm2  ;;  %v299_v30 = vld [vmem:[%s12310_s29 + $0x4c] sm:$0xf]  ;;  %vm1956_vm9 = vsmask.f32 7440  ;;  %v12073_v11 = vld [vmem:[%s14170_s3 + $0x190] sm:$0xff]   ;;  %s10035_s15 = sshll.u32 %s14184_s19, 8 }
  0x3d   : > { %vm12325_vm5 = vmor %vm312_vm2, %vm313_vm3  ;;  %v646_v35 = vsel %vm12318_vm4, %v331_v25, %v645_v19  ;;  %v380_v10 = vor.u32 %v378_v2, %v12366_v1  ;;  %v395_v19 = vshll.u32 %v289_v0, 16  ;;  %v389_v25 = vor.u32 %v387_v4, %v386_v12  ;;  %v690_v4 = vld [vmem:[#allocation2 + $0x60] sm:$0xf]  ;;  %v11968_v12 = vld [vmem:[%s14168_s1 + $0xd8] sm:$0xff]   ;;  %s14099_s20 = scalar_lea.vmem %s14172_s5, %s10035_s15 }
  0x3e   : > { %vm12330_vm7 = vmand %vm636_vm1, %vm637_vm6  ;;  %v330_v33 = vsel %vm12325_vm5, %v322_v23, %v329_v24  ;;  %647 = vst [vmem:[#allocation2 + $0x14] sm:$0x1] %v646_v35  ;;  %v347_v56 = vsel %vm12325_vm5, %v339_v47, %v346_v48  ;;  %v364_v7 = vsel %vm12325_vm5, %v356_v52, %v363_v61  ;;  %v11959_v23 = vld [vmem:[%s14168_s1 + $0xc0] sm:$0xff]   ;;  %v676_v35 = vld [vmem:[#allocation2 + $0x48] sm:$0xf]  ;;  %v414_v48 = vor.u32 %v412_v31, %v12392_v40 }
  0x3f   : > { %v640_v34 = vsel %vm12330_vm7, %v321_v22, %v639_v15  ;;  %642 = vst [vmem:[#allocation2 + $0x10] sm:$0xf] %v330_v33  ;;  %v649_v57 = vsel %vm12330_vm7, %v338_v46, %v648_v36  ;;  %651 = vst [vmem:[#allocation2 + $0x1c] sm:$0xf] %v347_v56  ;;  %v656_v62 = vsel %vm12330_vm7, %v355_v51, %v655_v49  ;;  %v669_v15 = vld [vmem:[#allocation2 + $0x3c] sm:$0xf]  ;;  %10548 = vmatprep.subr.bf16.mxu0 %v11959_v23 }
  0x40   : > { %641 = vst [vmem:[#allocation2 + $0xc] sm:$0xf] %v640_v34  ;;  %650 = vst [vmem:[#allocation2 + $0x18] sm:$0xf] %v649_v57  ;;  %v663_v17 = vsel %vm12330_vm7, %v372_v8, %v662_v60  ;;  %v292_v22 = vld [vmem:[%s12310_s29 + $0x30] sm:$0xf]  ;;  %v381_v24 = vsel %vm12325_vm5, %v373_v9, %v380_v10  ;;  %v397_v33 = vor.u32 %v395_v19, %v12384_v27 }
  0x41   : > { %657 = vst [vmem:[#allocation2 + $0x24] sm:$0xf] %v656_v62  ;;  %658 = vst [vmem:[#allocation2 + $0x28] sm:$0xf] %v364_v7  ;;  %v418_v32 = vshrl.u32 %v292_v22, 16  ;;  %v670_v34 = vsel %vm12330_vm7, %v389_v25, %v669_v15  ;;  %v421_v44 = vshll.u32 %v292_v22, 16  ;;  %v677_v49 = vsel %vm12330_vm7, %v406_v37, %v676_v35 }
  0x42   : > { %664 = vst [vmem:[#allocation2 + $0x30] sm:$0xf] %v663_v17  ;;  %665 = vst [vmem:[#allocation2 + $0x34] sm:$0xf] %v381_v24  ;;  %v398_v43 = vsel %vm12325_vm5, %v390_v26, %v397_v33  ;;  %v429_v46 = vshll.u32 %v293_v28, 16  ;;  %v11962_v47 = vld [vmem:[%s14168_s1 + $0xc8] sm:$0xff]   ;;  %v415_v57 = vsel %vm12325_vm5, %v407_v38, %v414_v48 }
  0x43   : > { %671 = vst [vmem:[#allocation2 + $0x3c] sm:$0xf] %v670_v34  ;;  %v420_v41 = vrot.slane %v418_v32, 7  ;;  %672 = vst [vmem:[#allocation2 + $0x40] sm:$0xf] %v398_v43  ;;  %v12404_v54 = vrot.slane %v426_v45, 7 }
  0x44   : > { %678 = vst [vmem:[#allocation2 + $0x48] sm:$0xf] %v677_v49  ;;  %v295_v56 = vld [vmem:[%s12310_s29 + $0x3c] sm:$0xf]  ;;  %v11965_v61 = vld [vmem:[%s14168_s1 + $0xd0] sm:$0xff]   ;;  %v437_v2 = vrot.slane %v435_v58, 7  ;;  %vm12747_vm10 = vmor %vm1955_vm8, %vm1956_vm9 }
  0x45   : > { %v423_v51 = vor.u32 %v421_v44, %v420_v41  ;;  %v424_v52 = vrot.slane %v420_v41, 4  ;;  %v443_v60 = vshrl.u32 %v295_v56, 16  ;;  %679 = vst [vmem:[#allocation2 + $0x4c] sm:$0xf] %v415_v57  ;;  %v431_v62 = vor.u32 %v429_v46, %v12404_v54  ;;  %v297_v7 = vld [vmem:[%s12310_s29 + $0x44] sm:$0xf]  ;;  %vm13040_vm13 = vmor %vm3530_vm11, %vm3531_vm12 }
  0x46   : > { %v446_v0 = vshll.u32 %v295_v56, 16  ;;  %v452_v8 = vshrl.u32 %v296_v5, 16  ;;  %v455_v9 = vshll.u32 %v296_v5, 16  ;;  %v440_v14 = vor.u32 %v438_v59, %v437_v2  ;;  %v697_v17 = vld [vmem:[#allocation2 + $0x6c] sm:$0xf]  ;;  %v11971_v43 = vld [vmem:[%s14168_s1 + $0xe0] sm:$0xff]  }
  0x47   : > { %v12390_v36 = vld [vmem:[#allocation2 + $0xc] sm:$0xff]   ;;  %v12394_v42 = vld [vmem:[#allocation2 + $0x18] sm:$0xff]   ;;  %v684_v63 = vsel %vm12330_vm7, %v423_v51, %v683_v50  ;;  %v12418_v3 = vrot.slane %v443_v60, 7  ;;  %v432_v6 = vsel %vm12325_vm5, %v424_v52, %v431_v62  ;;  %v441_v15 = vrot.slane %v437_v2, 4  ;;  %v298_v25 = vld [vmem:[%s12310_s29 + $0x48] sm:$0xf] }
  0x48   : > { %10517 = vmatmul.mubr.bf16.vlgmr.msra.gmra.mrb[0].mxu0 %v12390_v36  ;;  %685 = vst [vmem:[#allocation2 + $0x54] sm:$0xf] %v684_v63  ;;  %v12424_v10 = vld [vmem:[#allocation2 + $0x24] sm:$0xff]   ;;  %686 = vst [vmem:[#allocation2 + $0x58] sm:$0xf] %v432_v6  ;;  %v454_v20 = vrot.slane %v452_v8, 7  ;;  %v691_v24 = vsel %vm12330_vm7, %v440_v14, %v690_v4 }
  0x49   : > { %10549 = vmatpush3.bf16.msra.mxu0 %v11959_v23  ;;  %10520 = vmatprep.mubr.bf16.mxu0 %v12394_v42  ;;  %v448_v16 = vor.u32 %v446_v0, %v12418_v3  ;;  %v12430_v19 = vld [vmem:[#allocation2 + $0x30] sm:$0xff]   ;;  %v460_v21 = vshrl.u32 %v297_v7, 16  ;;  %v463_v22 = vshll.u32 %v297_v7, 16  ;;  %692 = vst [vmem:[#allocation2 + $0x60] sm:$0xf] %v691_v24  ;;  %v469_v31 = vshrl.u32 %v298_v25, 16 }
  0x4a   : > { %10550 = vmatprep.subr.bf16.mxu0 %v11962_v47  ;;  %v457_v26 = vor.u32 %v455_v9, %v454_v20  ;;  %v458_v28 = vrot.slane %v454_v20, 4  ;;  %v472_v32 = vshll.u32 %v298_v25, 16  ;;  %v477_v33 = vshrl.u32 %v299_v30, 16  ;;  %v704_v41 = vld [vmem:[#allocation2 + $0x78] sm:$0xf]  ;;  %v12454_v51 = vld [vmem:[#allocation2 + $0x3c] sm:$0xff]  }
  0x4b   : > { %v449_v23 = vsel %vm12325_vm5, %v441_v15, %v448_v16  ;;  %v12437_v29 = vrot.slane %v460_v21, 7  ;;  %v480_v34 = vshll.u32 %v299_v30, 16  ;;  %v471_v38 = vrot.slane %v469_v31, 7  ;;  %v300_v45 = vld [vmem:[%s12310_s29 + $0x50] sm:$0xf]  ;;  %v11974_v0 = vld [vmem:[%s14168_s1 + $0xe8] sm:$0xff]  }
  0x4c   : > { %693 = vst [vmem:[#allocation2 + $0x64] sm:$0xf] %v449_v23  ;;  %v698_v37 = vsel %vm12330_vm7, %v457_v26, %v697_v17  ;;  %v12448_v44 = vrot.slane %v477_v33, 7  ;;  %v301_v46 = vld [vmem:[%s12310_s29 + $0x54] sm:$0xf]  ;;  %v486_v50 = vshrl.u32 %v300_v45, 16 }
  0x4d   : > { %10551 = vmatpush3.bf16.msra.mxu0 %v11962_v47  ;;  %v465_v35 = vor.u32 %v463_v22, %v12437_v29  ;;  %699 = vst [vmem:[#allocation2 + $0x6c] sm:$0xf] %v698_v37  ;;  %v474_v48 = vor.u32 %v472_v32, %v471_v38  ;;  %v475_v49 = vrot.slane %v471_v38, 4  ;;  %v12456_v52 = vld [vmem:[#allocation2 + $0x48] sm:$0xff]   ;;  %v489_v56 = vshll.u32 %v300_v45, 16  ;;  %v11977_v25 = vld [vmem:[%s14168_s1 + $0xf0] sm:$0xff]  }
  0x4e   : > { %10552 = vmatprep.subr.bf16.mxu0 %v11965_v61  ;;  %v482_v55 = vor.u32 %v480_v34, %v12448_v44  ;;  %v494_v57 = vshrl.u32 %v301_v46, 16  ;;  %v711_v58 = vld [vmem:[#allocation2 + $0x84] sm:$0xf]  ;;  %v488_v60 = vrot.slane %v486_v50, 7  ;;  %v302_v5 = vld [vmem:[%s12310_s29 + $0x58] sm:$0xf] }
  0x4f   : > { %v466_v47 = vsel %vm12325_vm5, %v458_v28, %v465_v35  ;;  %v705_v59 = vsel %vm12330_vm7, %v474_v48, %v704_v41  ;;  %v303_v6 = vld [vmem:[%s12310_s29 + $0x5c] sm:$0xf]  ;;  %v503_v8 = vshrl.u32 %v302_v5, 16  ;;  %v506_v9 = vshll.u32 %v302_v5, 16  ;;  %v718_v16 = vld [vmem:[#allocation2 + $0x90] sm:$0xf] }
  0x50   : > { %10521 = vmatmul.mubr.bf16.gmra.mrb[4].mxu0 %v12424_v10  ;;  %700 = vst [vmem:[#allocation2 + $0x70] sm:$0xf] %v466_v47  ;;  %v483_v62 = vsel %vm12325_vm5, %v475_v49, %v482_v55  ;;  %706 = vst [vmem:[#allocation2 + $0x78] sm:$0xf] %v705_v59  ;;  %v12463_v63 = vrot.slane %v494_v57, 7  ;;  %v491_v2 = vor.u32 %v489_v56, %v488_v60  ;;  %v492_v4 = vrot.slane %v488_v60, 4 }
  0x51   : > { %10524 = vmatprep.mubr.bf16.mxu0 %v12430_v19  ;;  %10553 = vmatpush3.bf16.msra.mxu0 %v11965_v61  ;;  %v497_v61 = vshll.u32 %v301_v46, 16  ;;  %707 = vst [vmem:[#allocation2 + $0x7c] sm:$0xf] %v483_v62  ;;  %v511_v14 = vshrl.u32 %v303_v6, 16  ;;  %v514_v15 = vshll.u32 %v303_v6, 16  ;;  %v505_v21 = vrot.slane %v503_v8, 7 }
  0x52   : > { %10554 = vmatprep.subr.bf16.mxu0 %v11968_v12  ;;  %v304_v17 = vld [vmem:[%s12310_s29 + $0x60] sm:$0xf]  ;;  %v305_v22 = vld [vmem:[%s12310_s29 + $0x64] sm:$0xf]  ;;  %v12482_v26 = vld [vmem:[#allocation2 + $0x54] sm:$0xff]  }
  0x53   : > { %v499_v7 = vor.u32 %v497_v61, %v12463_v63  ;;  %v520_v23 = vshrl.u32 %v304_v17, 16  ;;  %v523_v24 = vshll.u32 %v304_v17, 16  ;;  %v12484_v28 = vrot.slane %v511_v14, 7  ;;  %v725_v35 = vld [vmem:[#allocation2 + $0x9c] sm:$0xf]  ;;  %v12486_v37 = vld [vmem:[#allocation2 + $0x60] sm:$0xff]  }
  0x54   : > { %v528_v30 = vshrl.u32 %v305_v22, 16  ;;  %v531_v31 = vshll.u32 %v305_v22, 16  ;;  %v508_v32 = vor.u32 %v506_v9, %v505_v21  ;;  %v509_v33 = vrot.slane %v505_v21, 4  ;;  %v306_v47 = vld [vmem:[%s12310_s29 + $0x68] sm:$0xf]  ;;  %v11980_v48 = vld [vmem:[%s14168_s1 + $0xf8] sm:$0xff]  }
  0x55   : > { %10555 = vmatpush3.bf16.msra.mxu0 %v11968_v12  ;;  %v712_v12 = vsel %vm12330_vm7, %v491_v2, %v711_v58  ;;  %v500_v20 = vsel %vm12325_vm5, %v492_v4, %v499_v7  ;;  %v522_v34 = vrot.slane %v520_v23, 7  ;;  %v516_v38 = vor.u32 %v514_v15, %v12484_v28  ;;  %v307_v55 = vld [vmem:[%s12310_s29 + $0x6c] sm:$0xf]  ;;  %v732_v61 = vld [vmem:[#allocation2 + $0xa8] sm:$0xf]  ;;  %v12514_v9 = vld [vmem:[%s14168_s1 + $0x180] sm:$0xff]  }
  0x56   : > { %10556 = vmatprep.subr.bf16.mxu0 %v11971_v43  ;;  %713 = vst [vmem:[#allocation2 + $0x84] sm:$0xf] %v712_v12  ;;  %714 = vst [vmem:[#allocation2 + $0x88] sm:$0xf] %v500_v20  ;;  %v12489_v41 = vrot.slane %v528_v30, 7  ;;  %v537_v56 = vshrl.u32 %v306_v47, 16 }
  0x57   : > { %v525_v45 = vor.u32 %v523_v24, %v522_v34  ;;  %v526_v46 = vrot.slane %v522_v34, 4  ;;  %v517_v49 = vsel %vm12325_vm5, %v509_v33, %v516_v38  ;;  %v540_v58 = vshll.u32 %v306_v47, 16  ;;  %v308_v62 = vld [vmem:[%s12310_s29 + $0x70] sm:$0xf]  ;;  %v309_v4 = vld [vmem:[%s12310_s29 + $0x74] sm:$0xf] }
  0x58   : > { %10525 = vmatmul.mubr.bf16.gmra.mrb[8].mxu0 %v12454_v51  ;;  %v533_v50 = vor.u32 %v531_v31, %v12489_v41  ;;  %721 = vst [vmem:[#allocation2 + $0x94] sm:$0xf] %v517_v49  ;;  %v545_v59 = vshrl.u32 %v307_v55, 16  ;;  %v548_v60 = vshll.u32 %v307_v55, 16  ;;  %v539_v2 = vrot.slane %v537_v56, 7  ;;  %v12516_v20 = vld [vmem:[#allocation2 + $0x6c] sm:$0xff]  }
  0x59   : > { %10528 = vmatprep.mubr.bf16.mxu0 %v12456_v52  ;;  %10557 = vmatpush3.bf16.msra.mxu0 %v11971_v43  ;;  %v719_v43 = vsel %vm12330_vm7, %v508_v32, %v718_v16  ;;  %v726_v57 = vsel %vm12330_vm7, %v525_v45, %v725_v35  ;;  %v554_v5 = vshrl.u32 %v308_v62, 16  ;;  %v557_v7 = vshll.u32 %v308_v62, 16  ;;  %v739_v17 = vld [vmem:[#allocation2 + $0xb4] sm:$0xf]  ;;  %v12521_v23 = vld [vmem:[#allocation2 + $0x78] sm:$0xff]  }
  0x5a   : > { %10558 = vmatprep.subr.bf16.mxu0 %v11974_v0  ;;  %720 = vst [vmem:[#allocation2 + $0x90] sm:$0xf] %v719_v43  ;;  %727 = vst [vmem:[#allocation2 + $0x9c] sm:$0xf] %v726_v57  ;;  %v12509_v6 = vrot.slane %v545_v59, 7  ;;  %v562_v8 = vshrl.u32 %v309_v4, 16  ;;  %v542_v12 = vor.u32 %v540_v58, %v539_v2 }
  0x5b   : > { %v543_v14 = vrot.slane %v539_v2, 4  ;;  %v556_v15 = vrot.slane %v554_v5, 7  ;;  %v565_v16 = vshll.u32 %v309_v4, 16  ;;  %v310_v43 = vld [vmem:[%s12310_s29 + $0x78] sm:$0xf]  ;;  %v348_v2 = vrot.slane %v12347_v39, 4 }
  0x5c   : > { %v550_v21 = vor.u32 %v548_v60, %v12509_v6  ;;  %v12519_v22 = vrot.slane %v562_v8, 7  ;;  %v733_v24 = vsel %vm12330_vm7, %v542_v12, %v732_v61  ;;  %v311_v45 = vld [vmem:[%s12310_s29 + $0x7c] sm:$0xf]  ;;  %v574_v47 = vshll.u32 %v310_v43, 16  ;;  %v746_v56 = vld [vmem:[#allocation2 + $0xc0] sm:$0xf] }
  0x5d   : > { %10559 = vmatpush3.bf16.msra.mxu0 %v11974_v0  ;;  %v534_v0 = vsel %vm12325_vm5, %v526_v46, %v533_v50  ;;  %v560_v30 = vrot.slane %v556_v15, 4  ;;  %734 = vst [vmem:[#allocation2 + $0xa8] sm:$0xf] %v733_v24  ;;  %v12535_v35 = vld [vmem:[#allocation2 + $0x84] sm:$0xff]   ;;  %v571_v46 = vshrl.u32 %v310_v43, 16  ;;  %v582_v49 = vshll.u32 %v311_v45, 16 }
  0x5e   : > { %10560 = vmatprep.subr.bf16.mxu0 %v11977_v25  ;;  %728 = vst [vmem:[#allocation2 + $0xa0] sm:$0xf] %v534_v0  ;;  %v551_v31 = vsel %vm12325_vm5, %v543_v14, %v550_v21  ;;  %v567_v32 = vor.u32 %v565_v16, %v12519_v22  ;;  %v652_v5 = vld [vmem:[#allocation2 + $0x20] sm:$0x1]  ;;  %v659_v12 = vld [vmem:[#allocation2 + $0x2c] sm:$0x1] }
  0x5f   : > { %735 = vst [vmem:[#allocation2 + $0xac] sm:$0xf] %v551_v31  ;;  %v573_v50 = vrot.slane %v571_v46, 7  ;;  %v653_v8 = vsel %vm12318_vm4, %v348_v2, %v652_v5  ;;  %v11982_v39 = vld [vmem:[%s14168_s1 + $0x188] sm:$0xff]   ;;  %v666_v16 = vld [vmem:[#allocation2 + $0x38] sm:$0x1] }
  0x60   : > { %10529 = vmatmul.mubr.bf16.gmra.mrb[12].mxu0 %v12482_v26  ;;  %v568_v34 = vsel %vm12325_vm5, %v560_v30, %v567_v32  ;;  %654 = vst [vmem:[#allocation2 + $0x20] sm:$0x1] %v653_v8  ;;  %v433_v24 = vrot.slane %v12404_v54, 4  ;;  %v687_v30 = vld [vmem:[#allocation2 + $0x5c] sm:$0x1]  ;;  %v11985_v31 = vld [vmem:[%s14168_s1 + $0x1a0] sm:$0xff]  }
  0x61   : > { %10532 = vmatprep.mubr.bf16.mxu0 %v12486_v37  ;;  %10561 = vmatpush3.bf16.msra.mxu0 %v11977_v25  ;;  %v559_v25 = vor.u32 %v557_v7, %v556_v15  ;;  %742 = vst [vmem:[#allocation2 + $0xb8] sm:$0xf] %v568_v34  ;;  %v12537_v38 = vld [vmem:[#allocation2 + $0x90] sm:$0xff]   ;;  %v576_v57 = vor.u32 %v574_v47, %v573_v50  ;;  %v577_v58 = vrot.slane %v573_v50, 4  ;;  %v365_v7 = vrot.slane %v12355_v53, 4  ;;  %v11986_v54 = vld [vmem:[%s14168_s1 + $0x1a8] sm:$0xff]  }
  0x62   : > { %10562 = vmatprep.subr.bf16.mxu0 %v11980_v48  ;;  %v382_v15 = vrot.slane %v12366_v1, 4  ;;  %v399_v53 = vrot.slane %v12384_v27, 4  ;;  %v416_v27 = vrot.slane %v12392_v40, 4  ;;  %v688_v32 = vsel %vm12318_vm4, %v433_v24, %v687_v30  ;;  %v11987_v34 = vld [vmem:[%s14168_s1 + $0x1b0] sm:$0xff]   ;;  %v694_v43 = vld [vmem:[#allocation2 + $0x68] sm:$0x1] }
  0x63   : > { %v740_v33 = vsel %vm12330_vm7, %v559_v25, %v739_v17  ;;  %v747_v61 = vsel %vm12330_vm7, %v576_v57, %v746_v56  ;;  %v660_v14 = vsel %vm12318_vm4, %v365_v7, %v659_v12  ;;  %v673_v17 = vld [vmem:[#allocation2 + $0x44] sm:$0x1]  ;;  %v680_v25 = vld [vmem:[#allocation2 + $0x50] sm:$0x1]  ;;  %689 = vst [vmem:[#allocation2 + $0x5c] sm:$0x1] %v688_v32 }
  0x64   : > { %741 = vst [vmem:[#allocation2 + $0xb4] sm:$0xf] %v740_v33  ;;  %748 = vst [vmem:[#allocation2 + $0xc0] sm:$0xf] %v747_v61  ;;  %v667_v21 = vsel %vm12318_vm4, %v382_v15, %v666_v16  ;;  %v674_v1 = vsel %vm12318_vm4, %v399_v53, %v673_v17  ;;  %v681_v40 = vsel %vm12318_vm4, %v416_v27, %v680_v25  ;;  %v450_v33 = vrot.slane %v12418_v3, 4  ;;  %v11989_v46 = vld [vmem:[%s14168_s1 + $0x1b8] sm:$0xff]  }
  0x65   : > { %10563 = vmatpush3.bf16.msra.mxu0 %v11980_v48  ;;  %v579_v48 = vshrl.u32 %v311_v45, 16  ;;  %v12550_v62 = vld [vmem:[#allocation2 + $0x9c] sm:$0xff]   ;;  %661 = vst [vmem:[#allocation2 + $0x2c] sm:$0x1] %v660_v14  ;;  %668 = vst [vmem:[#allocation2 + $0x38] sm:$0x1] %v667_v21 }
  0x66   : > { %10596 = vmatprep.subr.bf16.mxu0 %v12514_v9  ;;  %v12552_v0 = vld [vmem:[#allocation2 + $0xa8] sm:$0xff]   ;;  %675 = vst [vmem:[#allocation2 + $0x44] sm:$0x1] %v674_v1  ;;  %682 = vst [vmem:[#allocation2 + $0x50] sm:$0x1] %v681_v40  ;;  %v467_v45 = vrot.slane %v12437_v29, 4  ;;  %v695_v47 = vsel %vm12318_vm4, %v450_v33, %v694_v43 }
  0x67   : > { %v12541_v55 = vrot.slane %v579_v48, 7  ;;  %v701_v48 = vld [vmem:[#allocation2 + $0x74] sm:$0x1]  ;;  %696 = vst [vmem:[#allocation2 + $0x68] sm:$0x1] %v695_v47  ;;  %v484_v3 = vrot.slane %v12448_v44, 4 }
  0x68   : > { %10533 = vmatmul.mubr.bf16.gmra.mrb[16].mxu0 %v12516_v20  ;;  %v702_v29 = vsel %vm12318_vm4, %v467_v45, %v701_v48  ;;  %v708_v50 = vld [vmem:[#allocation2 + $0x80] sm:$0x1]  ;;  %v1902_v57 = vld [vmem:[#allocation2 + $0x4] sm:$0xf]  ;;  %v715_v5 = vld [vmem:[#allocation2 + $0x8c] sm:$0x1] }
  0x69   : > { %10536 = vmatprep.mubr.bf16.mxu0 %v12521_v23  ;;  %v584_v59 = vor.u32 %v582_v49, %v12541_v55  ;;  %v1901_v49 = vld [vmem:[#allocation2] sm:$0xf]  ;;  %703 = vst [vmem:[#allocation2 + $0x74] sm:$0x1] %v702_v29  ;;  %v709_v44 = vsel %vm12318_vm4, %v484_v3, %v708_v50  ;;  %v1968_v61 = vshll.u32 %v1902_v57, 16  ;;  %v1972_v2 = vshrl.u32 %v1902_v57, 16 }
  0x6a   : > { %v12618_v56 = vld [vmem:[%s14168_s1 + $0x40] sm:$0xff]   ;;  %710 = vst [vmem:[#allocation2 + $0x80] sm:$0x1] %v709_v44  ;;  %v1904_v7 = vld [vmem:[#allocation2 + $0xc] sm:$0xf]  ;;  %v518_v1 = vrot.slane %v12484_v28, 4 }
  0x6b   : > { %v585_v60 = vsel %vm12325_vm5, %v577_v58, %v584_v59  ;;  %v12557_v4 = vld [vmem:[#allocation2 + $0xb4] sm:$0xff]   ;;  %v1959_v58 = vshrl.u32 %v1901_v49, 16  ;;  %v501_v59 = vrot.slane %v12463_v63, 4  ;;  %v1905_v8 = vld [vmem:[#allocation2 + $0x10] sm:$0xf]  ;;  %v12626_v15 = vrot.slane %v1968_v61, 5 }
  0x6c   : > { %749 = vst [vmem:[#allocation2 + $0xc4] sm:$0xf] %v585_v60  ;;  %v1962_v60 = vshll.u32 %v1901_v49, 16  ;;  %v1903_v12 = vld [vmem:[#allocation2 + $0x8] sm:$0x1]  ;;  %v1974_v63 = vrot.slane %v1972_v2, 4 }
  0x6d   : > { %v1961_v14 = vrot.slane %v1959_v58, 4  ;;  %v716_v53 = vsel %vm12318_vm4, %v501_v59, %v715_v5  ;;  %v1983_v16 = vshrl.u32 %v1904_v7, 16  ;;  %v1986_v17 = vshll.u32 %v1904_v7, 16  ;;  %v1906_v27 = vld [vmem:[#allocation2 + $0x14] sm:$0x1] }
  0x6e   : > { %717 = vst [vmem:[#allocation2 + $0x8c] sm:$0x1] %v716_v53  ;;  %v1992_v21 = vshll.u32 %v1905_v8, 16  ;;  %v1907_v24 = vld [vmem:[#allocation2 + $0x18] sm:$0xf]  ;;  %v535_v25 = vrot.slane %v12489_v41, 4  ;;  %v1975_v40 = vor.u32 %v1974_v63, %v12626_v15 }
  0x6f   : > { %v552_v30 = vrot.slane %v12509_v6, 4  ;;  %v722_v32 = vld [vmem:[#allocation2 + $0x98] sm:$0x1]  ;;  %v586_v33 = vrot.slane %v12541_v55, 4  ;;  %v1988_v43 = vrot.slane %v1986_v17, 5  ;;  %v2007_v48 = vshrl.u32 %v1907_v24, 16 }
  0x70   : > { %10537 = vmatmul.mubr.bf16.gmra.mrb[20].mxu0 %v12535_v35  ;;  %v12638_v28 = vrot.slane %v1992_v21, 5  ;;  %v1908_v47 = vld [vmem:[#allocation2 + $0x1c] sm:$0xf]  ;;  %v2010_v6 = vshll.u32 %v1907_v24, 16  ;;  %v1910_v3 = vld [vmem:[#allocation2 + $0x24] sm:$0xf]  ;;  %v723_v49 = vsel %vm12318_vm4, %v518_v1, %v722_v32 }
  0x71   : > { %10540 = vmatprep.mubr.bf16.mxu0 %v12537_v38  ;;  %v12646_v29 = vrot.slane %v1975_v40, 4  ;;  %v1911_v50 = vld [vmem:[#allocation2 + $0x28] sm:$0xf]  ;;  %724 = vst [vmem:[#allocation2 + $0x98] sm:$0x1] %v723_v49  ;;  %v2016_v58 = vshll.u32 %v1908_v47, 16 }
  0x72   : > { %v729_v57 = vld [vmem:[#allocation2 + $0xa4] sm:$0x1]  ;;  %v2020_v44 = vshrl.u32 %v1908_v47, 16  ;;  %v2031_v61 = vshrl.u32 %v1910_v3, 16  ;;  %v2034_v2 = vshll.u32 %v1910_v3, 16  ;;  %v2012_v7 = vrot.slane %v2010_v6, 5 }
  0x73   : > { %v736_v5 = vld [vmem:[#allocation2 + $0xb0] sm:$0x1]  ;;  %v743_v63 = vld [vmem:[#allocation2 + $0xbc] sm:$0x1]  ;;  %v12652_v53 = vrot.slane %v2016_v58, 5  ;;  %v12668_v3 = vld [vmem:[#allocation2 + $0xc0] sm:$0xff]  }
  0x74   : > { %v737_v17 = vsel %vm12318_vm4, %v552_v30, %v736_v5  ;;  %v2033_v1 = vrot.slane %v2031_v61, 4  ;;  %v1912_v30 = vld [vmem:[#allocation2 + $0x2c] sm:$0x1] }
  0x75   : > { %738 = vst [vmem:[#allocation2 + $0xb0] sm:$0x1] %v737_v17 }
  0x78   : > { %10541 = vmatmul.mubr.bf16.gmra.mrb[24].mxu0 %v12550_v62 }
  0x79   : > { %10544 = vmatprep.mubr.bf16.mxu0 %v12552_v0 }
  0x80   : > { %10545 = vmatmul.mubr.bf16.gmra.mrb[28].mxu0 %v12557_v4 }
  0x81   : > { %10564 = vmatprep.mubr.bf16.mxu0 %v12390_v36  ;;  %v11983_v36 = vld [vmem:[%s14168_s1 + $0x190] sm:$0xff]  }
  0x88   : > { %10565 = vmatmul.mubr.bf16.vlgmr.msra.gmra.mrb[0].mxu0 %v12394_v42 }
  0x89   : > { %10597 = vmatpush3.bf16.msra.mxu0 %v12514_v9  ;;  %10568 = vmatprep.mubr.bf16.mxu0 %v12424_v10  ;;  %v11984_v9 = vld [vmem:[%s14168_s1 + $0x198] sm:$0xff]  }
  0x8a   : > { %10598 = vmatprep.subr.bf16.mxu0 %v11982_v39 }
  0x8d   : > { %10599 = vmatpush3.bf16.msra.mxu0 %v11982_v39  ;;  %v1964_v39 = vrot.slane %v1962_v60, 5  ;;  %v2009_v60 = vrot.slane %v2007_v48, 4 }
  0x8e   : > { %10600 = vmatprep.subr.bf16.mxu0 %v11983_v36 }
  0x8f   : > { %v2013_v32 = vor.u32 %v2012_v7, %v2009_v60 }
  0x90   : > { %10569 = vmatmul.mubr.bf16.gmra.mrb[4].mxu0 %v12430_v19 }
  0x91   : > { %10572 = vmatprep.mubr.bf16.mxu0 %v12454_v51  ;;  %10601 = vmatpush3.bf16.msra.mxu0 %v11983_v36  ;;  %v1978_v36 = vshll.u32 %v1903_v12, 16  ;;  %v2044_v12 = vshrl.u32 %v1911_v50, 16  ;;  %v12671_v58 = vrot.slane %v2013_v32, 4 }
  0x92   : > { %10602 = vmatprep.subr.bf16.mxu0 %v11984_v9 }
  0x93   : > { %v12636_v45 = vrot.slane %v1978_v36, 5 }
  0x95   : > { %10603 = vmatpush3.bf16.msra.mxu0 %v11984_v9  ;;  %v1996_v9 = vshrl.u32 %v1905_v8, 16  ;;  %v2040_v8 = vshll.u32 %v1911_v50, 16 }
  0x96   : > { %10604 = vmatprep.subr.bf16.mxu0 %v11985_v31 }
  0x97   : > { %v1998_v41 = vrot.slane %v1996_v9, 4  ;;  %v1913_v9 = vld [vmem:[#allocation2 + $0x30] sm:$0xf] }
  0x98   : > { %10573 = vmatmul.mubr.bf16.gmra.mrb[8].mxu0 %v12456_v52 }
  0x99   : > { %10576 = vmatprep.mubr.bf16.mxu0 %v12482_v26  ;;  %10605 = vmatpush3.bf16.msra.mxu0 %v11985_v31  ;;  %v1965_v31 = vor.u32 %v1964_v39, %v1961_v14  ;;  %v730_v14 = vsel %vm12318_vm4, %v535_v25, %v729_v57  ;;  %v1909_v39 = vld [vmem:[#allocation2 + $0x20] sm:$0x1]  ;;  %v1999_v21 = vor.u32 %v1998_v41, %v12638_v28  ;;  %v12658_v25 = vrot.slane %v2040_v8, 5 }
  0x9a   : > { %10606 = vmatprep.subr.bf16.mxu0 %v11986_v54  ;;  %731 = vst [vmem:[#allocation2 + $0xa4] sm:$0x1] %v730_v14  ;;  %v2026_v24 = vshll.u32 %v1909_v39, 16  ;;  %v1917_v8 = vld [vmem:[#allocation2 + $0x40] sm:$0xf] }
  0x9b   : > { %v12665_v48 = vrot.slane %v1999_v21, 4  ;;  %v2088_v21 = vshll.u32 %v1917_v8, 16 }
  0x9d   : > { %10607 = vmatpush3.bf16.msra.mxu0 %v11986_v54  ;;  %v569_v54 = vrot.slane %v12519_v22, 4  ;;  %v12644_v22 = vrot.slane %v1965_v31, 4  ;;  %v2046_v31 = vrot.slane %v2044_v12, 4 }
  0x9e   : > { %10608 = vmatprep.subr.bf16.mxu0 %v11987_v34 }
  0x9f   : > { %v744_v40 = vsel %vm12318_vm4, %v569_v54, %v743_v63  ;;  %v2047_v49 = vor.u32 %v2046_v31, %v12658_v25  ;;  %v2050_v54 = vshll.u32 %v1912_v30, 16 }
  0xa0   : > { %10577 = vmatmul.mubr.bf16.gmra.mrb[12].mxu0 %v12486_v37  ;;  %745 = vst [vmem:[#allocation2 + $0xbc] sm:$0x1] %v744_v40 }
  0xa1   : > { %10580 = vmatprep.mubr.bf16.mxu0 %v12516_v20  ;;  %10609 = vmatpush3.bf16.msra.mxu0 %v11987_v34  ;;  %v1985_v34 = vrot.slane %v1983_v16, 4  ;;  %v2022_v16 = vrot.slane %v2020_v44, 4  ;;  %v12673_v44 = vrot.slane %v2026_v24, 5  ;;  %v12680_v12 = vrot.slane %v2047_v49, 4  ;;  %v11998_v49 = vld [vmem:[%s14168_s1 + $0x78] sm:$0xff]  }
  0xa2   : > { %10610 = vmatprep.subr.bf16.mxu0 %v11989_v46  ;;  %v12682_v14 = vrot.slane %v2050_v54, 5 }
  0xa3   : > { %v1989_v36 = vor.u32 %v1988_v43, %v1985_v34  ;;  %v1914_v34 = vld [vmem:[#allocation2 + $0x34] sm:$0xf]  ;;  %v2055_v43 = vshrl.u32 %v1913_v9, 16  ;;  %v2023_v41 = vor.u32 %v2022_v16, %v12652_v53 }
  0xa4   : > { %v2064_v50 = vshll.u32 %v1914_v34, 16  ;;  %v2068_v57 = vshrl.u32 %v1914_v34, 16  ;;  %v11993_v34 = vld [vmem:[%s14168_s1 + $0x58] sm:$0xff]  }
  0xa5   : > { %10611 = vmatpush3.bf16.msra.mxu0 %v11989_v46  ;;  %v2002_v46 = vshll.u32 %v1906_v27, 16  ;;  %v2036_v27 = vrot.slane %v2034_v2, 5  ;;  %v12663_v47 = vrot.slane %v1989_v36, 4  ;;  %v2057_v60 = vrot.slane %v2055_v43, 4  ;;  %v1916_v2 = vld [vmem:[#allocation2 + $0x3c] sm:$0xf] }
  0xa6   : > { %10644 = vmatprep.subr.bf16.mxu0 %v12618_v56  ;;  %v12675_v5 = vrot.slane %v2023_v41, 4  ;;  %v12684_v39 = vrot.slane %v2064_v50, 5  ;;  %v2070_v63 = vrot.slane %v2068_v57, 4  ;;  %v2079_v16 = vshrl.u32 %v1916_v2, 16 }
  0xa7   : > { %v12648_v59 = vrot.slane %v2002_v46, 5  ;;  %v2058_v46 = vshll.u32 %v1913_v9, 16  ;;  %v2037_v6 = vor.u32 %v2036_v27, %v2033_v1  ;;  %v2082_v17 = vshll.u32 %v1916_v2, 16  ;;  %v11991_v27 = vld [vmem:[%s14168_s1 + $0x48] sm:$0xff]   ;;  %v1915_v9 = vld [vmem:[#allocation2 + $0x38] sm:$0x1] }
  0xa8   : > { %10581 = vmatmul.mubr.bf16.gmra.mrb[16].mxu0 %v12521_v23  ;;  %v2092_v1 = vshrl.u32 %v1917_v8, 16  ;;  %v2071_v24 = vor.u32 %v2070_v63, %v12684_v39  ;;  %v2081_v40 = vrot.slane %v2079_v16, 4  ;;  %v2074_v30 = vshll.u32 %v1915_v9, 16 }
  0xa9   : > { %10584 = vmatprep.mubr.bf16.mxu0 %v12535_v35  ;;  %v2060_v61 = vrot.slane %v2058_v46, 5  ;;  %v12677_v7 = vrot.slane %v2037_v6, 4  ;;  %v2084_v43 = vrot.slane %v2082_v17, 5  ;;  %v12708_v46 = vrot.slane %v2088_v21, 5  ;;  %v1923_v17 = vld [vmem:[#allocation2 + $0x58] sm:$0xf] }
  0xaa   : > { %v12697_v32 = vrot.slane %v2071_v24, 4  ;;  %v2094_v41 = vrot.slane %v2092_v1, 4  ;;  %v2136_v24 = vshll.u32 %v1923_v17, 16 }
  0xab   : > { %v2061_v36 = vor.u32 %v2060_v61, %v2057_v60 }
  0xac   : > { %v2095_v63 = vor.u32 %v2094_v41, %v12708_v46 }
  0xad   : > { %v12691_v31 = vrot.slane %v2061_v36, 4  ;;  %v1921_v36 = vld [vmem:[#allocation2 + $0x50] sm:$0x1] }
  0xb0   : > { %10585 = vmatmul.mubr.bf16.gmra.mrb[20].mxu0 %v12537_v38 }
  0xb1   : > { %10588 = vmatprep.mubr.bf16.mxu0 %v12550_v62 }
  0xb8   : > { %10589 = vmatmul.mubr.bf16.gmra.mrb[24].mxu0 %v12552_v0 }
  0xb9   : > { %10592 = vmatprep.mubr.bf16.mxu0 %v12557_v4 }
  0xc0   : > { %10593 = vmatmul.mubr.bf16.gmra.mrb[28].mxu0 %v12668_v3 }
  0xc1   : > { %10612 = vmatprep.mubr.bf16.mxu0 %v12394_v42  ;;  %v11992_v42 = vld [vmem:[%s14168_s1 + $0x50] sm:$0xff]  }
  0xc8   : > { %10613 = vmatmul.mubr.bf16.vlgmr.msra.gmra.mrb[0].mxu0 %v12424_v10  ;;  %v11994_v10 = vld [vmem:[%s14168_s1 + $0x60] sm:$0xff]  }
  0xc9   : > { %10645 = vmatpush3.bf16.msra.mxu0 %v12618_v56  ;;  %10616 = vmatprep.mubr.bf16.mxu0 %v12430_v19  ;;  %v1918_v19 = vld [vmem:[#allocation2 + $0x44] sm:$0x1]  ;;  %v11995_v56 = vld [vmem:[%s14168_s1 + $0x68] sm:$0xff]  }
  0xca   : > { %10646 = vmatprep.subr.bf16.mxu0 %v11991_v27  ;;  %v2098_v6 = vshll.u32 %v1918_v19, 16  ;;  %v2140_v19 = vshrl.u32 %v1923_v17, 16 }
  0xcc   : > { %v12741_v16 = vrot.slane %v2098_v6, 5 }
  0xcd   : > { %10647 = vmatpush3.bf16.msra.mxu0 %v11991_v27 }
  0xce   : > { %10648 = vmatprep.subr.bf16.mxu0 %v11992_v42 }
  0xd0   : > { %10617 = vmatmul.mubr.bf16.gmra.mrb[4].mxu0 %v12454_v51  ;;  %v11996_v51 = vld [vmem:[%s14168_s1 + $0x70] sm:$0xff]  }
  0xd1   : > { %10620 = vmatprep.mubr.bf16.mxu0 %v12456_v52  ;;  %10649 = vmatpush3.bf16.msra.mxu0 %v11992_v42  ;;  %v1919_v52 = vld [vmem:[#allocation2 + $0x48] sm:$0xf]  ;;  %v2122_v42 = vshll.u32 %v1921_v36, 16 }
  0xd2   : > { %10650 = vmatprep.subr.bf16.mxu0 %v11993_v34  ;;  %v2103_v54 = vshrl.u32 %v1919_v52, 16  ;;  %v2106_v50 = vshll.u32 %v1919_v52, 16 }
  0xd4   : > { %v2105_v57 = vrot.slane %v2103_v54, 4  ;;  %v2108_v61 = vrot.slane %v2106_v50, 5  ;;  %v1924_v54 = vld [vmem:[#allocation2 + $0x5c] sm:$0x1]  ;;  %v1929_v50 = vld [vmem:[#allocation2 + $0x70] sm:$0xf] }
  0xd5   : > { %10651 = vmatpush3.bf16.msra.mxu0 %v11993_v34  ;;  %v11997_v34 = vld [vmem:[#allocation2 + $0xcc] sm:$0xff]  }
  0xd6   : > { %10652 = vmatprep.subr.bf16.mxu0 %v11994_v10 }
  0xd8   : > { %10621 = vmatmul.mubr.bf16.gmra.mrb[8].mxu0 %v12482_v26  ;;  %v12726_v26 = vld [vmem:[%s14168_s1 + $0x100] sm:$0xff]  }
  0xd9   : > { %10624 = vmatprep.mubr.bf16.mxu0 %v12486_v37  ;;  %10653 = vmatpush3.bf16.msra.mxu0 %v11994_v10  ;;  %v1920_v37 = vld [vmem:[#allocation2 + $0x4c] sm:$0xf]  ;;  %v1971_v10 = vsel %vm12747_vm10, %v12644_v22, %v12626_v15  ;;  %v1995_v15 = vsel %vm12747_vm10, %v12663_v47, %v12638_v28  ;;  %v2019_v22 = vsel %vm12747_vm10, %v12671_v58, %v12652_v53 }
  0xda   : > { %10654 = vmatprep.subr.bf16.mxu0 %v11995_v56  ;;  %v2112_v60 = vshll.u32 %v1920_v37, 16  ;;  %v2116_v2 = vshrl.u32 %v1920_v37, 16  ;;  %v12000_v28 = vld [vmem:[%s14168_s1 + $0x108] sm:$0xff]   ;;  %v2043_v53 = vsel %vm12747_vm10, %v12677_v7, %v12658_v25  ;;  %v2053_v58 = vsel %vm12747_vm10, %v12680_v12, %v12682_v14 }
  0xdb   : > { %v12810_v25 = vrot.slane %v2136_v24, 5  ;;  %v2142_v7 = vrot.slane %v2140_v19, 4  ;;  %v2124_v12 = vrot.slane %v2122_v42, 5  ;;  %v2146_v14 = vshll.u32 %v1924_v54, 16  ;;  %v1932_v24 = vld [vmem:[#allocation2 + $0x7c] sm:$0xf] }
  0xdc   : > { %v12753_v1 = vrot.slane %v2112_v60, 5  ;;  %v2118_v27 = vrot.slane %v2116_v2, 4  ;;  %v2188_v2 = vshrl.u32 %v1929_v50, 16 }
  0xdd   : > { %10655 = vmatpush3.bf16.msra.mxu0 %v11995_v56  ;;  %v1926_v56 = vld [vmem:[#allocation2 + $0x64] sm:$0xf]  ;;  %v2143_v36 = vor.u32 %v2142_v7, %v12810_v25  ;;  %v1938_v7 = vld [vmem:[#allocation2 + $0x94] sm:$0xf] }
  0xde   : > { %10656 = vmatprep.subr.bf16.mxu0 %v11996_v51  ;;  %v2160_v6 = vshll.u32 %v1926_v56, 16  ;;  %v2164_v52 = vshrl.u32 %v1926_v56, 16  ;;  %v2119_v47 = vor.u32 %v2118_v27, %v12753_v1 }
  0xdf   : > { %v2144_v56 = vrot.slane %v2143_v36, 4 }
  0xe0   : > { %10625 = vmatmul.mubr.bf16.gmra.mrb[12].mxu0 %v12516_v20  ;;  %v750_v20 = vld [vmem:[#allocation2 + $0xc8] sm:$0x1]  ;;  %v2120_v37 = vrot.slane %v2119_v47, 4 }
  0xe1   : > { %10628 = vmatprep.mubr.bf16.mxu0 %v12521_v23  ;;  %10657 = vmatpush3.bf16.msra.mxu0 %v11996_v51  ;;  %v1922_v23 = vld [vmem:[#allocation2 + $0x54] sm:$0xf]  ;;  %v751_v8 = vsel %vm12318_vm4, %v586_v33, %v750_v20  ;;  %v2109_v33 = vor.u32 %v2108_v61, %v2105_v57  ;;  %v2184_v61 = vshll.u32 %v1929_v50, 16  ;;  %v1935_v47 = vld [vmem:[#allocation2 + $0x88] sm:$0xf] }
  0xe2   : > { %10658 = vmatprep.subr.bf16.mxu0 %v11998_v49  ;;  %752 = vst [vmem:[#allocation2 + $0xc8] sm:$0x1] %v751_v8  ;;  %v2127_v21 = vshrl.u32 %v1922_v23, 16  ;;  %v2130_v9 = vshll.u32 %v1922_v23, 16  ;;  %v12817_v23 = vcombine.low %v2043_v53, %v2053_v58 }
  0xe3   : > { %v12844_v42 = vrot.slane %v2184_v61, 5 }
  0xe4   : > { %v2132_v57 = vrot.slane %v2130_v9, 5 }
  0xe5   : > { %10659 = vmatpush3.bf16.msra.mxu0 %v11998_v49 }
  0xe6   : > { %10692 = vmatprep.subr.bf16.mxu0 %v12726_v26 }
  0xe8   : > { %10629 = vmatmul.mubr.bf16.gmra.mrb[16].mxu0 %v12535_v35  ;;  %v2085_v35 = vor.u32 %v2084_v43, %v2081_v40  ;;  %v1925_v40 = vld [vmem:[#allocation2 + $0x60] sm:$0xf]  ;;  %v1981_v43 = vsel %vm12747_vm10, %v12646_v29, %v12636_v45  ;;  %v2005_v45 = vsel %vm12747_vm10, %v12665_v48, %v12648_v59  ;;  %v2029_v29 = vsel %vm12747_vm10, %v12675_v5, %v12673_v44  ;;  %v1928_v48 = vld [vmem:[#allocation2 + $0x6c] sm:$0xf] }
  0xe9   : > { %10632 = vmatprep.mubr.bf16.mxu0 %v12537_v38  ;;  %v12739_v38 = vrot.slane %v2074_v30, 5  ;;  %v12757_v30 = vrot.slane %v2127_v21, 4  ;;  %v2151_v51 = vshrl.u32 %v1925_v40, 16  ;;  %v9545_v41 = vcombine.low %v1971_v10, %v1981_v43  ;;  %v1927_v21 = vld [vmem:[#allocation2 + $0x68] sm:$0x1] }
  0xea   : > { %v12785_v49 = vcombine.low %v1995_v15, %v2005_v45  ;;  %v12791_v59 = vcombine.low %v2019_v22, %v2029_v29  ;;  %v2067_v44 = vsel %vm12747_vm10, %v12691_v31, %v12684_v39  ;;  %v12001_v31 = vld [vmem:[%s14168_s1 + $0x110] sm:$0xff]   ;;  %v2178_v20 = vshll.u32 %v1928_v48, 16  ;;  %v12003_v29 = vld [vmem:[%s14168_s1 + $0x120] sm:$0xff]  }
  0xeb   : > { %v2077_v5 = vsel %vm12747_vm10, %v12697_v32, %v12739_v38  ;;  %v2153_v60 = vrot.slane %v2151_v51, 4  ;;  %v2175_v32 = vshrl.u32 %v1928_v48, 16  ;;  %v2133_v17 = vor.u32 %v2132_v57, %v12757_v30  ;;  %v1930_v10 = vld [vmem:[#allocation2 + $0x74] sm:$0x1]  ;;  %v1937_v57 = vld [vmem:[#allocation2 + $0x90] sm:$0xf] }
  0xec   : > { %v12819_v8 = vcombine.low %v2067_v44, %v2077_v5  ;;  %v2190_v30 = vrot.slane %v2188_v2, 4  ;;  %v2208_v51 = vshll.u32 %v1932_v24, 16  ;;  %v2194_v22 = vshll.u32 %v1930_v10, 16  ;;  %v12004_v2 = vld [vmem:[%s14168_s1 + $0x128] sm:$0xff]  }
  0xed   : > { %v2134_v19 = vrot.slane %v2133_v17, 4  ;;  %v2260_v17 = vshrl.u32 %v1938_v7, 16 }
  0xee   : > { %v2191_v45 = vor.u32 %v2190_v30, %v12844_v42  ;;  %v12863_v5 = vrot.slane %v2208_v51, 5  ;;  %v2196_v61 = vrot.slane %v2194_v22, 5 }
  0xef   : > { %v2139_v58 = vsel %vm12747_vm10, %v2134_v19, %v12810_v25  ;;  %v1936_v19 = vld [vmem:[#allocation2 + $0x8c] sm:$0x1] }
  0xf0   : > { %10633 = vmatmul.mubr.bf16.gmra.mrb[20].mxu0 %v12550_v62  ;;  %v12743_v62 = vrot.slane %v2085_v35, 4  ;;  %v2166_v35 = vrot.slane %v2164_v52, 4 }
  0xf1   : > { %10636 = vmatprep.mubr.bf16.mxu0 %v12552_v0  ;;  %v12751_v0 = vrot.slane %v2095_v63, 4 }
  0xf2   : > { %v2091_v63 = vsel %vm12747_vm10, %v12743_v62, %v12708_v46  ;;  %v2125_v46 = vsel %vm12747_vm10, %v2120_v37, %v2124_v12  ;;  %v12839_v62 = vrot.slane %v2146_v14, 5  ;;  %v1933_v12 = vld [vmem:[#allocation2 + $0x80] sm:$0x1] }
  0xf3   : > { %v2101_v38 = vsel %vm12747_vm10, %v12751_v0, %v12741_v16  ;;  %v12002_v16 = vld [vmem:[%s14168_s1 + $0x118] sm:$0xff]   ;;  %v2177_v0 = vrot.slane %v2175_v32, 4 }
  0xf4   : > { %v2149_v44 = vsel %vm12747_vm10, %v2144_v56, %v12839_v62 }
  0xf5   : > { %v12888_v10 = vcombine.low %v2139_v58, %v2149_v44 }
  0xf8   : > { %10637 = vmatmul.mubr.bf16.gmra.mrb[24].mxu0 %v12557_v4  ;;  %v12767_v4 = vrot.slane %v2109_v33, 4  ;;  %v1931_v33 = vld [vmem:[#allocation2 + $0x78] sm:$0xf] }
  0xf9   : > { %10640 = vmatprep.mubr.bf16.mxu0 %v12668_v3  ;;  %v2154_v3 = vshll.u32 %v1925_v40, 16  ;;  %v2180_v40 = vrot.slane %v2178_v20, 5  ;;  %v2199_v43 = vshrl.u32 %v1931_v33, 16  ;;  %v2192_v20 = vrot.slane %v2191_v45, 4  ;;  %v1941_v45 = vld [vmem:[#allocation2 + $0xa0] sm:$0xf] }
  0xfa   : > { %v2115_v27 = vsel %vm12747_vm10, %v12767_v4, %v12753_v1  ;;  %v2170_v1 = vshll.u32 %v1927_v21, 16  ;;  %v2202_v4 = vshll.u32 %v1931_v33, 16  ;;  %v2218_v33 = vshll.u32 %v1933_v12, 16 }
  0xfb   : > { %v2156_v39 = vrot.slane %v2154_v3, 5  ;;  %v2212_v3 = vshrl.u32 %v1932_v24, 16  ;;  %v12851_v52 = vcombine.low %v2115_v27, %v2125_v46  ;;  %v2181_v15 = vor.u32 %v2180_v40, %v2177_v0  ;;  %v12005_v0 = vld [vmem:[%s14168_s1 + $0x130] sm:$0xff]  }
  0xfc   : > { %v2172_v48 = vrot.slane %v2170_v1, 5  ;;  %v2201_v50 = vrot.slane %v2199_v43, 4  ;;  %v2204_v53 = vrot.slane %v2202_v4, 5  ;;  %v2262_v1 = vrot.slane %v2260_v17, 4 }
  0xfd   : > { %v2157_v9 = vor.u32 %v2156_v39, %v2153_v60  ;;  %v2214_v37 = vrot.slane %v2212_v3, 4  ;;  %v2232_v39 = vshll.u32 %v1935_v47, 16  ;;  %v2182_v25 = vrot.slane %v2181_v15, 4  ;;  %v1939_v15 = vld [vmem:[#allocation2 + $0x98] sm:$0x1] }
  0xfe   : > { %v2205_v21 = vor.u32 %v2204_v53, %v2201_v50  ;;  %v2220_v51 = vrot.slane %v2218_v33, 5  ;;  %v1943_v50 = vld [vmem:[#allocation2 + $0xa8] sm:$0xf]  ;;  %v1944_v53 = vld [vmem:[#allocation2 + $0xac] sm:$0xf]  ;;  %v2266_v58 = vshll.u32 %v1939_v15, 16 }
  0xff   : > { %v12876_v62 = vrot.slane %v2232_v39, 5  ;;  %v2187_v24 = vsel %vm12747_vm10, %v2182_v25, %v12844_v42  ;;  %v1940_v42 = vld [vmem:[#allocation2 + $0x9c] sm:$0xf]  ;;  %v2295_v39 = vshrl.u32 %v1943_v50, 16  ;;  %v2308_v25 = vshrl.u32 %v1944_v53, 16 }
 0x100   : > { %10641 = vmatmul.mubr.bf16.gmra.mrb[28].mxu0 %v11997_v34  ;;  %v2206_v4 = vrot.slane %v2205_v21, 4  ;;  %v2274_v44 = vshll.u32 %v1940_v42, 16  ;;  %v1947_v33 = vld [vmem:[#allocation2 + $0xb8] sm:$0xf] }
 0x101   : > { %10660 = vmatprep.mubr.bf16.mxu0 %v9545_v41  ;;  %v12849_v41 = vcombine.low %v2091_v63, %v2101_v38  ;;  %v2250_v63 = vshll.u32 %v1937_v57, 16  ;;  %v2256_v38 = vshll.u32 %v1938_v7, 16 }
 0x102   : > { %v2211_v7 = vsel %vm12747_vm10, %v2206_v4, %v12863_v5 }
 0x103   : > { %v2252_v30 = vrot.slane %v2250_v63, 5  ;;  %v2268_v63 = vrot.slane %v2266_v58, 5 }
 0x108   : > { %10661 = vmatmul.mubr.bf16.vlgmr.msra.gmra.mrb[0].mxu0 %v12785_v49 }
 0x109   : > { %10693 = vmatpush3.bf16.msra.mxu0 %v12726_v26  ;;  %10664 = vmatprep.mubr.bf16.mxu0 %v12791_v59  ;;  %v12821_v26 = vrot.slane %v2160_v6, 5  ;;  %v2158_v6 = vrot.slane %v2157_v9, 4 }
 0x10a   : > { %10694 = vmatprep.subr.bf16.mxu0 %v12000_v28 }
 0x10b   : > { %v2167_v34 = vor.u32 %v2166_v35, %v12821_v26  ;;  %v2163_v32 = vsel %vm12747_vm10, %v2158_v6, %v12821_v26  ;;  %v2247_v35 = vshrl.u32 %v1937_v57, 16  ;;  %v2215_v26 = vor.u32 %v2214_v37, %v12863_v5 }
 0x10c   : > { %v2280_v37 = vshll.u32 %v1941_v45, 16  ;;  %v2284_v57 = vshrl.u32 %v1941_v45, 16 }
 0x10d   : > { %10695 = vmatpush3.bf16.msra.mxu0 %v12000_v28  ;;  %v1934_v28 = vld [vmem:[#allocation2 + $0x84] sm:$0xf]  ;;  %v2168_v54 = vrot.slane %v2167_v34, 4  ;;  %v2249_v40 = vrot.slane %v2247_v35, 4  ;;  %v12886_v34 = vrot.slane %v2256_v38, 5  ;;  %v2216_v56 = vrot.slane %v2215_v26, 4 }
 0x10e   : > { %10696 = vmatprep.subr.bf16.mxu0 %v12001_v31  ;;  %v2223_v14 = vshrl.u32 %v1934_v28, 16  ;;  %v2226_v60 = vshll.u32 %v1934_v28, 16  ;;  %v2242_v28 = vshll.u32 %v1936_v19, 16  ;;  %v2276_v38 = vrot.slane %v2274_v44, 5  ;;  %v1946_v26 = vld [vmem:[#allocation2 + $0xb4] sm:$0xf] }
 0x10f   : > { %v2173_v36 = vsel %vm12747_vm10, %v2168_v54, %v2172_v48  ;;  %v2263_v54 = vor.u32 %v2262_v1, %v12886_v34  ;;  %v2271_v48 = vshrl.u32 %v1940_v42, 16  ;;  %v2221_v12 = vsel %vm12747_vm10, %v2216_v56, %v2220_v51  ;;  %v1945_v1 = vld [vmem:[#allocation2 + $0xb0] sm:$0x1] }
 0x110   : > { %10665 = vmatmul.mubr.bf16.gmra.mrb[4].mxu0 %v12817_v23  ;;  %v2225_v27 = vrot.slane %v2223_v14, 4  ;;  %v2228_v46 = vrot.slane %v2226_v60, 5  ;;  %v12890_v43 = vcombine.low %v2163_v32, %v2173_v36  ;;  %v2304_v32 = vshll.u32 %v1944_v53, 16 }
 0x111   : > { %10668 = vmatprep.mubr.bf16.mxu0 %v12819_v8  ;;  %10697 = vmatpush3.bf16.msra.mxu0 %v12001_v31  ;;  %v2236_v31 = vshrl.u32 %v1935_v47, 16  ;;  %v2253_v47 = vor.u32 %v2252_v30, %v2249_v40  ;;  %v2264_v35 = vrot.slane %v2263_v54, 4  ;;  %v2273_v5 = vrot.slane %v2271_v48, 4 }
 0x112   : > { %10698 = vmatprep.subr.bf16.mxu0 %v12002_v16  ;;  %v2229_v3 = vor.u32 %v2228_v46, %v2225_v27  ;;  %v2282_v17 = vrot.slane %v2280_v37, 5  ;;  %v2286_v36 = vrot.slane %v2284_v57, 4  ;;  %v12911_v21 = vcombine.low %v2211_v7, %v2221_v12  ;;  %v1942_v27 = vld [vmem:[#allocation2 + $0xa4] sm:$0x1]  ;;  %v1948_v12 = vld [vmem:[#allocation2 + $0xbc] sm:$0x1] }
 0x113   : > { %v2238_v9 = vrot.slane %v2236_v31, 4  ;;  %v2298_v31 = vshll.u32 %v1943_v50, 16  ;;  %v2297_v46 = vrot.slane %v2295_v39, 4  ;;  %v2269_v4 = vsel %vm12747_vm10, %v2264_v35, %v2268_v63 }
 0x114   : > { %v2230_v14 = vrot.slane %v2229_v3, 4  ;;  %v2277_v19 = vor.u32 %v2276_v38, %v2273_v5  ;;  %v2287_v42 = vor.u32 %v2286_v36, %v2282_v17  ;;  %v2319_v56 = vshrl.u32 %v1946_v26, 16 }
 0x115   : > { %10699 = vmatpush3.bf16.msra.mxu0 %v12002_v16  ;;  %v2197_v16 = vsel %vm12747_vm10, %v2192_v20, %v2196_v61  ;;  %v2239_v6 = vor.u32 %v2238_v9, %v12876_v62  ;;  %v12909_v20 = vld [vmem:[%s14168_s1 + $0x1c0] sm:$0xff]   ;;  %v2244_v61 = vrot.slane %v2242_v28, 5  ;;  %v2300_v9 = vrot.slane %v2298_v31, 5 }
 0x116   : > { %10700 = vmatprep.subr.bf16.mxu0 %v12003_v29  ;;  %v12893_v22 = vcombine.low %v2187_v24, %v2197_v16  ;;  %v2306_v24 = vrot.slane %v2304_v32, 5  ;;  %v2310_v16 = vrot.slane %v2308_v25, 4  ;;  %v2290_v51 = vshll.u32 %v1942_v27, 16  ;;  %v12009_v27 = vld [vmem:[%s14168_s1 + $0x1d0] sm:$0xff]  }
 0x117   : > { %v2240_v60 = vrot.slane %v2239_v6, 4  ;;  %v2328_v3 = vshll.u32 %v1947_v33, 16  ;;  %v2332_v6 = vshrl.u32 %v1947_v33, 16  ;;  %v2301_v15 = vor.u32 %v2300_v9, %v2297_v46  ;;  %v12008_v33 = vld [vmem:[%s14168_s1 + $0x1c8] sm:$0xff]   ;;  %v12013_v9 = vld [vmem:[%s14168_s1 + $0x1f0] sm:$0xff]  }
 0x118   : > { %10669 = vmatmul.mubr.bf16.gmra.mrb[8].mxu0 %v12849_v41  ;;  %v2311_v45 = vor.u32 %v2310_v16, %v2306_v24  ;;  %v2288_v54 = vrot.slane %v2287_v42, 4  ;;  %v2321_v48 = vrot.slane %v2319_v56, 4  ;;  %v2292_v50 = vrot.slane %v2290_v51, 5  ;;  %v12012_v46 = vld [vmem:[%s14168_s1 + $0x1e8] sm:$0xff]   ;;  %v12015_v16 = vld [vmem:[%s14168_s1 + $0x80] sm:$0xff]  }
 0x119   : > { %10672 = vmatprep.mubr.bf16.mxu0 %v12851_v52  ;;  %10701 = vmatpush3.bf16.msra.mxu0 %v12003_v29  ;;  %v12006_v29 = vld [vmem:[%s14168_s1 + $0x138] sm:$0xff]   ;;  %v2245_v40 = vsel %vm12747_vm10, %v2240_v60, %v2244_v61  ;;  %v2330_v58 = vrot.slane %v2328_v3, 5  ;;  %v2334_v44 = vrot.slane %v2332_v6, 4  ;;  %v2302_v37 = vrot.slane %v2301_v15, 4  ;;  %v1951_v3 = vld [vmem:[#allocation2 + $0xc8] sm:$0x1] }
 0x11a   : > { %10702 = vmatprep.subr.bf16.mxu0 %v12004_v2  ;;  %v2312_v57 = vrot.slane %v2311_v45, 4  ;;  %v2293_v60 = vsel %vm12747_vm10, %v2288_v54, %v2292_v50  ;;  %v2338_v32 = vshll.u32 %v1948_v12, 16  ;;  %v2748_v45 = vshll.u32 %v1951_v3, 16 }
 0x11b   : > { %v2335_v31 = vor.u32 %v2334_v44, %v2330_v58  ;;  %v2307_v25 = vsel %vm12747_vm10, %v2302_v37, %v2306_v24  ;;  %v12014_v24 = vld [vmem:[%s14168_s1 + $0x1f8] sm:$0xff]   ;;  %v12017_v44 = vld [vmem:[%s14168_s1 + $0x90] sm:$0xff]  }
 0x11c   : > { %v2340_v38 = vrot.slane %v2338_v32, 5  ;;  %v2750_v54 = vrot.slane %v2748_v45, 5  ;;  %v1953_v37 = vld [vmem:[#allocation2 + $0xd0] sm:$0xf]  ;;  %v3429_v32 = vld [vmem:[#allocation2 + $0x4] sm:$0xf] }
 0x11d   : > { %10703 = vmatpush3.bf16.msra.mxu0 %v12004_v2  ;;  %v2254_v2 = vrot.slane %v2253_v47, 4  ;;  %v2278_v47 = vrot.slane %v2277_v19, 4  ;;  %v2336_v63 = vrot.slane %v2335_v31, 4  ;;  %v1954_v31 = vld [vmem:[#allocation2 + $0xd4] sm:$0x1] }
 0x11e   : > { %10704 = vmatprep.subr.bf16.mxu0 %v12005_v0  ;;  %v3438_v45 = vld [vmem:[#allocation2 + $0x28] sm:$0xf] }
 0x11f   : > { %v2259_v30 = vsel %vm12747_vm10, %v2254_v2, %v12886_v34  ;;  %v2341_v36 = vsel %vm12747_vm10, %v2336_v63, %v2340_v38  ;;  %v3428_v63 = vld [vmem:[#allocation2] sm:$0xe] }
 0x120   : > { %10673 = vmatmul.mubr.bf16.gmra.mrb[12].mxu0 %v12888_v10  ;;  %v12928_v34 = vcombine.low %v2259_v30, %v2269_v4 }
 0x121   : > { %10676 = vmatprep.mubr.bf16.mxu0 %v12890_v43  ;;  %10705 = vmatpush3.bf16.msra.mxu0 %v12005_v0  ;;  %v2235_v0 = vsel %vm12747_vm10, %v2230_v14, %v12876_v62  ;;  %v2322_v62 = vshll.u32 %v1946_v26, 16  ;;  %v2283_v14 = vsel %vm12747_vm10, %v2278_v47, %v2282_v17 }
 0x122   : > { %10706 = vmatprep.subr.bf16.mxu0 %v12006_v29  ;;  %v12926_v28 = vcombine.low %v2235_v0, %v2245_v40  ;;  %v12940_v2 = vcombine.low %v2283_v14, %v2293_v60  ;;  %v1949_v0 = vld [vmem:[#allocation2 + $0xc0] sm:$0xf]  ;;  %v1950_v40 = vld [vmem:[#allocation2 + $0xc4] sm:$0xf] }
 0x123   : > { %v2324_v53 = vrot.slane %v2322_v62, 5  ;;  %v2729_v30 = vshrl.u32 %v1949_v0, 16  ;;  %v2738_v4 = vshll.u32 %v1950_v40, 16  ;;  %v2742_v19 = vshrl.u32 %v1950_v40, 16  ;;  %v3431_v40 = vld [vmem:[#allocation2 + $0xc] sm:$0xe] }
 0x125   : > { %10707 = vmatpush3.bf16.msra.mxu0 %v12006_v29  ;;  %v2314_v29 = vshll.u32 %v1945_v1, 16  ;;  %v2325_v39 = vor.u32 %v2324_v53, %v2321_v48  ;;  %v2732_v1 = vshll.u32 %v1949_v0, 16  ;;  %v2731_v42 = vrot.slane %v2729_v30, 4  ;;  %v3433_v30 = vld [vmem:[#allocation2 + $0x14] sm:$0x1] }
 0x126   : > { %10740 = vmatprep.subr.bf16.mxu0 %v12909_v20  ;;  %v2740_v51 = vrot.slane %v2738_v4, 5  ;;  %v2744_v62 = vrot.slane %v2742_v19, 4  ;;  %v3434_v4 = vld [vmem:[#allocation2 + $0x18] sm:$0xe] }
 0x127   : > { %v2316_v7 = vrot.slane %v2314_v29, 5  ;;  %v2326_v5 = vrot.slane %v2325_v39, 4  ;;  %v2734_v56 = vrot.slane %v2732_v1, 5  ;;  %v9621_v3 = vrot.slane %v3434_v4, 9 }
 0x128   : > { %10677 = vmatmul.mubr.bf16.gmra.mrb[16].mxu0 %v12893_v22  ;;  %v2745_v15 = vor.u32 %v2744_v62, %v2740_v51  ;;  %v3545_v62 = vrot.slane %v3433_v30, 5 }
 0x129   : > { %10680 = vmatprep.mubr.bf16.mxu0 %v12911_v21  ;;  %v2317_v61 = vsel %vm12747_vm10, %v2312_v57, %v2316_v7  ;;  %v2331_v17 = vsel %vm12747_vm10, %v2326_v5, %v2330_v58  ;;  %v2735_v6 = vor.u32 %v2734_v56, %v2731_v42  ;;  %v12016_v58 = vld [vmem:[%s14168_s1 + $0x88] sm:$0xff]   ;;  %v3088_v7 = vshll.u32 %v1953_v37, 16 }
 0x12a   : > { %v12942_v35 = vcombine.low %v2307_v25, %v2317_v61  ;;  %v12950_v26 = vcombine.low %v2331_v17, %v2341_v36  ;;  %v2746_v47 = vrot.slane %v2745_v15, 4  ;;  %v3098_v5 = vshll.u32 %v1954_v31, 16 }
 0x12b   : > { %v2736_v29 = vrot.slane %v2735_v6, 4  ;;  %v3090_v60 = vrot.slane %v3088_v7, 5  ;;  %v9620_v56 = vrot.slane %v3431_v40, 9 }
 0x12c   : > { %v2751_v50 = vsel %vm12747_vm10, %v2746_v47, %v2750_v54  ;;  %v3100_v36 = vrot.slane %v3098_v5, 5  ;;  %v3443_v5 = vld [vmem:[#allocation2 + $0x3c] sm:$0xe] }
 0x12d   : > { %v2741_v48 = vsel %vm12747_vm10, %v2736_v29, %v2740_v51  ;;  %v3441_v29 = vld [vmem:[#allocation2 + $0x34] sm:$0xf] }
 0x12e   : > { %v12997_v53 = vcombine.low %v2741_v48, %v2751_v50  ;;  %v3556_v48 = vrot.slane %v3438_v45, 5 }
 0x130   : > { %10681 = vmatmul.mubr.bf16.gmra.mrb[20].mxu0 %v12926_v28 }
 0x131   : > { %10684 = vmatprep.mubr.bf16.mxu0 %v12928_v34 }
 0x138   : > { %10685 = vmatmul.mubr.bf16.gmra.mrb[24].mxu0 %v12940_v2 }
 0x139   : > { %10688 = vmatprep.mubr.bf16.mxu0 %v12942_v35 }
 0x140   : > { %10689 = vmatmul.mubr.bf16.gmra.mrb[28].mxu0 %v12950_v26 }
 0x141   : > { %10708 = vmatprep.mubr.bf16.mxu0 %v12785_v49  ;;  %v12010_v49 = vld [vmem:[%s14168_s1 + $0x1d8] sm:$0xff]  }
 0x148   : > { %10709 = vmatmul.mubr.bf16.vlgmr.msra.gmra.mrb[0].mxu0 %v12791_v59 }
 0x149   : > { %10741 = vmatpush3.bf16.msra.mxu0 %v12909_v20  ;;  %10712 = vmatprep.mubr.bf16.mxu0 %v12817_v23  ;;  %v12011_v20 = vld [vmem:[%s14168_s1 + $0x1e0] sm:$0xff]  }
 0x14a   : > { %10742 = vmatprep.subr.bf16.mxu0 %v12008_v33 }
 0x14d   : > { %10743 = vmatpush3.bf16.msra.mxu0 %v12008_v33  ;;  %v9619_v33 = vrot.slane %v3428_v63, 9 }
 0x14e   : > { %10744 = vmatprep.subr.bf16.mxu0 %v12009_v27 }
 0x150   : > { %10713 = vmatmul.mubr.bf16.gmra.mrb[4].mxu0 %v12819_v8 }
 0x151   : > { %10716 = vmatprep.mubr.bf16.mxu0 %v12849_v41  ;;  %10745 = vmatpush3.bf16.msra.mxu0 %v12009_v27 }
 0x152   : > { %10746 = vmatprep.subr.bf16.mxu0 %v12010_v49 }
 0x155   : > { %10747 = vmatpush3.bf16.msra.mxu0 %v12010_v49 }
 0x156   : > { %10748 = vmatprep.subr.bf16.mxu0 %v12011_v20 }
 0x158   : > { %10717 = vmatmul.mubr.bf16.gmra.mrb[8].mxu0 %v12851_v52 }
 0x159   : > { %10720 = vmatprep.mubr.bf16.mxu0 %v12888_v10  ;;  %10749 = vmatpush3.bf16.msra.mxu0 %v12011_v20  ;;  %v3432_v20 = vld [vmem:[#allocation2 + $0x10] sm:$0xf] }
 0x15a   : > { %10750 = vmatprep.subr.bf16.mxu0 %v12012_v46 }
 0x15d   : > { %10751 = vmatpush3.bf16.msra.mxu0 %v12012_v46 }
 0x15e   : > { %10752 = vmatprep.subr.bf16.mxu0 %v12013_v9 }
 0x160   : > { %10721 = vmatmul.mubr.bf16.gmra.mrb[12].mxu0 %v12890_v43 }
 0x161   : > { %10724 = vmatprep.mubr.bf16.mxu0 %v12893_v22  ;;  %10753 = vmatpush3.bf16.msra.mxu0 %v12013_v9 }
 0x162   : > { %10754 = vmatprep.subr.bf16.mxu0 %v12014_v24 }
 0x165   : > { %10755 = vmatpush3.bf16.msra.mxu0 %v12014_v24  ;;  %v3542_v24 = vrot.slane %v3432_v20, 5 }
 0x166   : > { %10788 = vmatprep.subr.bf16.mxu0 %v12015_v16 }
 0x167   : > { %v3544_v51 = vrot.slane %v3542_v24, 4  ;;  %v3543_v47 = vsel %vm13040_vm13, %v9620_v56, %v3542_v24  ;;  %v12026_v24 = vld [vmem:[%s14168_s1 + $0x158] sm:$0xff]   ;;  %v12027_v56 = vld [vmem:[%s14168_s1 + $0x160] sm:$0xff]  }
 0x168   : > { %10725 = vmatmul.mubr.bf16.gmra.mrb[16].mxu0 %v12911_v21 }
 0x169   : > { %10728 = vmatprep.mubr.bf16.mxu0 %v12926_v28  ;;  %v3546_v54 = vsel %vm13040_vm13, %v3544_v51, %v3545_v62  ;;  %v3452_v51 = vld [vmem:[#allocation2 + $0x60] sm:$0xe]  ;;  %v3454_v62 = vld [vmem:[#allocation2 + $0x68] sm:$0x1] }
 0x170   : > { %10729 = vmatmul.mubr.bf16.gmra.mrb[20].mxu0 %v12928_v34 }
 0x171   : > { %10732 = vmatprep.mubr.bf16.mxu0 %v12940_v2 }
 0x178   : > { %10733 = vmatmul.mubr.bf16.gmra.mrb[24].mxu0 %v12942_v35 }
 0x179   : > { %10736 = vmatprep.mubr.bf16.mxu0 %v12950_v26 }
 0x180   : > { %10737 = vmatmul.mubr.bf16.gmra.mrb[28].mxu0 %v12997_v53 }
 0x181   : > { %10756 = vmatprep.mubr.bf16.mxu0 %v12791_v59  ;;  %v12018_v59 = vld [vmem:[%s14168_s1 + $0x98] sm:$0xff]  }
 0x188   : > { %10757 = vmatmul.mubr.bf16.vlgmr.msra.gmra.mrb[0].mxu0 %v12817_v23  ;;  %v12019_v23 = vld [vmem:[%s14168_s1 + $0xa0] sm:$0xff]  }
 0x189   : > { %10789 = vmatpush3.bf16.msra.mxu0 %v12015_v16  ;;  %10760 = vmatprep.mubr.bf16.mxu0 %v12819_v8  ;;  %v12020_v8 = vld [vmem:[%s14168_s1 + $0xa8] sm:$0xff]  }
 0x18a   : > { %10790 = vmatprep.subr.bf16.mxu0 %v12016_v58 }
 0x18d   : > { %10791 = vmatpush3.bf16.msra.mxu0 %v12016_v58  ;;  %v3437_v58 = vld [vmem:[#allocation2 + $0x24] sm:$0xe] }
 0x18e   : > { %10792 = vmatprep.subr.bf16.mxu0 %v12017_v44 }
 0x190   : > { %10761 = vmatmul.mubr.bf16.gmra.mrb[4].mxu0 %v12849_v41  ;;  %v12021_v41 = vld [vmem:[%s14168_s1 + $0xb0] sm:$0xff]  }
 0x191   : > { %10764 = vmatprep.mubr.bf16.mxu0 %v12851_v52  ;;  %10793 = vmatpush3.bf16.msra.mxu0 %v12017_v44  ;;  %v12022_v52 = vld [vmem:[%s14168_s1 + $0xb8] sm:$0xff]   ;;  %v3439_v44 = vld [vmem:[#allocation2 + $0x2c] sm:$0x1] }
 0x192   : > { %10794 = vmatprep.subr.bf16.mxu0 %v12018_v59 }
 0x195   : > { %10795 = vmatpush3.bf16.msra.mxu0 %v12018_v59  ;;  %v3563_v59 = vrot.slane %v3441_v29, 5 }
 0x196   : > { %10796 = vmatprep.subr.bf16.mxu0 %v12019_v23 }
 0x198   : > { %10765 = vmatmul.mubr.bf16.gmra.mrb[8].mxu0 %v12888_v10  ;;  %v13033_v10 = vld [vmem:[%s14168_s1 + $0x140] sm:$0xff]  }
 0x199   : > { %10768 = vmatprep.mubr.bf16.mxu0 %v12890_v43  ;;  %10797 = vmatpush3.bf16.msra.mxu0 %v12019_v23  ;;  %v1952_v43 = vld [vmem:[#allocation2 + $0xcc] sm:$0xf]  ;;  %v3440_v23 = vld [vmem:[#allocation2 + $0x30] sm:$0xe] }
 0x19a   : > { %10798 = vmatprep.subr.bf16.mxu0 %v12020_v8  ;;  %v3079_v57 = vshrl.u32 %v1952_v43, 16  ;;  %v9623_v7 = vrot.slane %v3440_v23, 9 }
 0x19c   : > { %v3081_v12 = vrot.slane %v3079_v57, 4  ;;  %v3559_v57 = vrot.slane %v3439_v44, 5 }
 0x19d   : > { %10799 = vmatpush3.bf16.msra.mxu0 %v12020_v8  ;;  %v3442_v8 = vld [vmem:[#allocation2 + $0x38] sm:$0x1] }
 0x19e   : > { %10800 = vmatprep.subr.bf16.mxu0 %v12021_v41 }
 0x1a0   : > { %10769 = vmatmul.mubr.bf16.gmra.mrb[12].mxu0 %v12893_v22  ;;  %v3082_v22 = vshll.u32 %v1952_v43, 16  ;;  %v9622_v43 = vrot.slane %v3437_v58, 9  ;;  %v3459_v58 = vld [vmem:[#allocation2 + $0x7c] sm:$0xf] }
 0x1a1   : > { %10772 = vmatprep.mubr.bf16.mxu0 %v12911_v21  ;;  %10801 = vmatpush3.bf16.msra.mxu0 %v12021_v41  ;;  %v3092_v21 = vshrl.u32 %v1953_v37, 16  ;;  %v13062_v41 = vcombine.low %v3543_v47, %v3546_v54  ;;  %v3558_v37 = vrot.slane %v3556_v48, 4  ;;  %v9627_v47 = vrot.slane %v3452_v51, 9  ;;  %v3471_v51 = vld [vmem:[#allocation2 + $0xac] sm:$0xf] }
 0x1a2   : > { %10802 = vmatprep.subr.bf16.mxu0 %v12022_v52  ;;  %v3084_v14 = vrot.slane %v3082_v22, 5  ;;  %v12024_v22 = vld [vmem:[%s14168_s1 + $0x148] sm:$0xff]  }
 0x1a3   : > { %v3094_v39 = vrot.slane %v3092_v21, 4  ;;  %v3565_v21 = vrot.slane %v3563_v59, 4  ;;  %v3560_v31 = vsel %vm13040_vm13, %v3558_v37, %v3559_v57  ;;  %v3455_v37 = vld [vmem:[#allocation2 + $0x6c] sm:$0xe]  ;;  %v3457_v57 = vld [vmem:[#allocation2 + $0x74] sm:$0x1] }
 0x1a4   : > { %v3085_v25 = vor.u32 %v3084_v14, %v3081_v12  ;;  %v3566_v12 = vrot.slane %v3442_v8, 5  ;;  %v3444_v14 = vld [vmem:[#allocation2 + $0x40] sm:$0xf] }
 0x1a5   : > { %10803 = vmatpush3.bf16.msra.mxu0 %v12022_v52  ;;  %v3095_v61 = vor.u32 %v3094_v39, %v3090_v60  ;;  %v3557_v39 = vsel %vm13040_vm13, %v9622_v43, %v3556_v48  ;;  %v3594_v48 = vrot.slane %v3454_v62, 5 }
 0x1a6   : > { %10836 = vmatprep.subr.bf16.mxu0 %v13033_v10  ;;  %v3086_v38 = vrot.slane %v3085_v25, 4  ;;  %v3564_v25 = vsel %vm13040_vm13, %v9623_v7, %v3563_v59  ;;  %v12029_v7 = vld [vmem:[%s14168_s1 + $0x170] sm:$0xff]  }
 0x1a7   : > { %v3096_v17 = vrot.slane %v3095_v61, 4  ;;  %v3567_v61 = vsel %vm13040_vm13, %v3565_v21, %v3566_v12  ;;  %v3458_v21 = vld [vmem:[#allocation2 + $0x78] sm:$0xe]  ;;  %v3460_v12 = vld [vmem:[#allocation2 + $0x80] sm:$0x1] }
 0x1a8   : > { %10773 = vmatmul.mubr.bf16.gmra.mrb[16].mxu0 %v12926_v28  ;;  %v3535_v28 = vrot.slane %v3429_v32, 5  ;;  %v3570_v32 = vrot.slane %v3444_v14, 5 }
 0x1a9   : > { %10776 = vmatprep.mubr.bf16.mxu0 %v12928_v34  ;;  %v3430_v34 = vld [vmem:[#allocation2 + $0x8] sm:$0x1]  ;;  %v3101_v9 = vsel %vm12747_vm10, %v3096_v17, %v3100_v36  ;;  %v13083_v17 = vcombine.low %v3557_v39, %v3560_v31  ;;  %v13085_v36 = vcombine.low %v3564_v25, %v3567_v61  ;;  %v9628_v39 = vrot.slane %v3455_v37, 9 }
 0x1aa   : > { %v3537_v27 = vrot.slane %v3535_v28, 4  ;;  %v3538_v49 = vrot.slane %v3430_v34, 5  ;;  %v3536_v16 = vsel %vm13040_vm13, %v9619_v33, %v3535_v28  ;;  %v3445_v28 = vld [vmem:[#allocation2 + $0x44] sm:$0x1]  ;;  %v3446_v34 = vld [vmem:[#allocation2 + $0x48] sm:$0xe] }
 0x1ab   : > { %v9624_v33 = vrot.slane %v3443_v5, 9  ;;  %v9625_v20 = vrot.slane %v3446_v34, 9  ;;  %v9629_v25 = vrot.slane %v3458_v21, 9  ;;  %v3608_v5 = vrot.slane %v3460_v12, 5 }
 0x1ac   : > { %v3539_v0 = vsel %vm13040_vm13, %v3537_v27, %v3538_v49  ;;  %v3572_v27 = vrot.slane %v3570_v32, 4  ;;  %v3573_v49 = vrot.slane %v3445_v28, 5  ;;  %v3462_v28 = vld [vmem:[#allocation2 + $0x88] sm:$0xf] }
 0x1ad   : > { %v9651_v42 = vcombine.low %v3536_v16, %v3539_v0  ;;  %v3453_v16 = vld [vmem:[#allocation2 + $0x64] sm:$0xf]  ;;  %v3571_v0 = vsel %vm13040_vm13, %v9624_v33, %v3570_v32  ;;  %v3601_v32 = vrot.slane %v3457_v57, 5  ;;  %v3612_v33 = vrot.slane %v3462_v28, 5 }
 0x1ae   : > { %v3574_v40 = vsel %vm13040_vm13, %v3572_v27, %v3573_v49 }
 0x1b0   : > { %10777 = vmatmul.mubr.bf16.gmra.mrb[20].mxu0 %v12940_v2  ;;  %v3435_v2 = vld [vmem:[#allocation2 + $0x1c] sm:$0xf] }
 0x1b1   : > { %10780 = vmatprep.mubr.bf16.mxu0 %v12942_v35  ;;  %v3091_v35 = vsel %vm12747_vm10, %v3086_v38, %v3090_v60  ;;  %v3549_v1 = vrot.slane %v3435_v2, 5  ;;  %v3447_v60 = vld [vmem:[#allocation2 + $0x4c] sm:$0xf]  ;;  %v3448_v38 = vld [vmem:[#allocation2 + $0x50] sm:$0x1] }
 0x1b2   : > { %v9610_v19 = vcombine.low %v3091_v35, %v3101_v9  ;;  %v3577_v63 = vrot.slane %v3447_v60, 5  ;;  %v3580_v35 = vrot.slane %v3448_v38, 5  ;;  %v3450_v9 = vld [vmem:[#allocation2 + $0x58] sm:$0xf] }
 0x1b3   : > { %v3551_v6 = vrot.slane %v3549_v1, 4  ;;  %v3550_v50 = vsel %vm13040_vm13, %v9621_v3, %v3549_v1  ;;  %v3584_v30 = vrot.slane %v3450_v9, 5  ;;  %v13103_v3 = vcombine.low %v3571_v0, %v3574_v40  ;;  %v13143_v9 = vld [vmem:[%s14168_s1 + $0x200] sm:$0xff]  }
 0x1b4   : > { %v3579_v2 = vrot.slane %v3577_v63, 4  ;;  %v3578_v1 = vsel %vm13040_vm13, %v9625_v20, %v3577_v63  ;;  %v3465_v63 = vld [vmem:[#allocation2 + $0x94] sm:$0xf]  ;;  %v3461_v20 = vld [vmem:[#allocation2 + $0x84] sm:$0xe] }
 0x1b5   : > { %v3586_v45 = vrot.slane %v3584_v30, 4 }
 0x1b6   : > { %v3581_v4 = vsel %vm13040_vm13, %v3579_v2, %v3580_v35  ;;  %v3463_v2 = vld [vmem:[#allocation2 + $0x8c] sm:$0x1]  ;;  %v3619_v35 = vrot.slane %v3465_v63, 5 }
 0x1b8   : > { %10781 = vmatmul.mubr.bf16.gmra.mrb[24].mxu0 %v12950_v26  ;;  %v3436_v26 = vld [vmem:[#allocation2 + $0x20] sm:$0x1] }
 0x1b9   : > { %10784 = vmatprep.mubr.bf16.mxu0 %v12997_v53  ;;  %v3552_v15 = vrot.slane %v3436_v26, 5  ;;  %v3449_v26 = vld [vmem:[#allocation2 + $0x54] sm:$0xe] }
 0x1bb   : > { %v3553_v53 = vsel %vm13040_vm13, %v3551_v6, %v3552_v15  ;;  %v13105_v6 = vcombine.low %v3578_v1, %v3581_v4  ;;  %v9626_v15 = vrot.slane %v3449_v26, 9  ;;  %v3614_v1 = vrot.slane %v3612_v33, 4 }
 0x1bc   : > { %v13064_v52 = vcombine.low %v3550_v50, %v3553_v53  ;;  %v3456_v50 = vld [vmem:[#allocation2 + $0x70] sm:$0xf]  ;;  %v12028_v53 = vld [vmem:[%s14168_s1 + $0x168] sm:$0xff]   ;;  %v3615_v4 = vrot.slane %v3463_v2, 5 }
 0x1bd   : > { %v3585_v44 = vsel %vm13040_vm13, %v9626_v15, %v3584_v30  ;;  %v3598_v23 = vrot.slane %v3456_v50, 5  ;;  %v9630_v30 = vrot.slane %v3461_v20, 9  ;;  %v3633_v50 = vrot.slane %v3471_v51, 5  ;;  %v12040_v20 = vld [vmem:[%s14170_s3 + $0x8] sm:$0xff]  }
 0x1be   : > { %v3616_v15 = vsel %vm13040_vm13, %v3614_v1, %v3615_v4  ;;  %v12032_v2 = vld [vmem:[%s14168_s1 + $0x208] sm:$0xff]   ;;  %v3477_v1 = vld [vmem:[#allocation2 + $0xc4] sm:$0xf] }
 0x1bf   : > { %v3600_v31 = vrot.slane %v3598_v23, 4  ;;  %v3599_v34 = vsel %vm13040_vm13, %v9628_v39, %v3598_v23  ;;  %v3613_v62 = vsel %vm13040_vm13, %v9630_v30, %v3612_v33  ;;  %v3635_v57 = vrot.slane %v3633_v50, 4  ;;  %v12038_v30 = vld [vmem:[%s14168_s1 + $0x238] sm:$0xff]  }
 0x1c0   : > { %10785 = vmatmul.mubr.bf16.gmra.mrb[28].mxu0 %v9610_v19  ;;  %v3451_v19 = vld [vmem:[#allocation2 + $0x5c] sm:$0x1]  ;;  %v4036_v4 = vrot.slane %v3477_v1, 5 }
 0x1c1   : > { %10804 = vmatprep.mubr.bf16.mxu0 %v9651_v42  ;;  %v3591_v42 = vrot.slane %v3453_v16, 5  ;;  %v3587_v29 = vrot.slane %v3451_v19, 5  ;;  %v3602_v38 = vsel %vm13040_vm13, %v3600_v31, %v3601_v32  ;;  %v3466_v16 = vld [vmem:[#allocation2 + $0x98] sm:$0x1]  ;;  %v3621_v19 = vrot.slane %v3619_v35, 4 }
 0x1c2   : > { %v13145_v0 = vcombine.low %v3599_v34, %v3602_v38 }
 0x1c3   : > { %v3593_v54 = vrot.slane %v3591_v42, 4  ;;  %v3588_v59 = vsel %vm13040_vm13, %v3586_v45, %v3587_v29  ;;  %v3592_v8 = vsel %vm13040_vm13, %v9627_v47, %v3591_v42  ;;  %v3622_v42 = vrot.slane %v3466_v16, 5  ;;  %v12037_v16 = vld [vmem:[%s14168_s1 + $0x230] sm:$0xff]  }
 0x1c4   : > { %v13123_v14 = vcombine.low %v3585_v44, %v3588_v59  ;;  %v13160_v44 = vcombine.low %v3613_v62, %v3616_v15 }
 0x1c5   : > { %v3595_v43 = vsel %vm13040_vm13, %v3593_v54, %v3594_v48  ;;  %v3623_v47 = vsel %vm13040_vm13, %v3621_v19, %v3622_v42  ;;  %v3467_v54 = vld [vmem:[#allocation2 + $0x9c] sm:$0xe]  ;;  %v3469_v48 = vld [vmem:[#allocation2 + $0xa4] sm:$0x1]  ;;  %v3478_v19 = vld [vmem:[#allocation2 + $0xc8] sm:$0x1] }
 0x1c6   : > { %v13125_v60 = vcombine.low %v3592_v8, %v3595_v43  ;;  %v9632_v23 = vrot.slane %v3467_v54, 9  ;;  %v3629_v43 = vrot.slane %v3469_v48, 5  ;;  %v4039_v51 = vrot.slane %v3478_v19, 5  ;;  %v12042_v54 = vld [vmem:[%s14170_s3 + $0x18] sm:$0xff]   ;;  %v12043_v48 = vld [vmem:[%s14170_s3 + $0x20] sm:$0xff]  }
 0x1c8   : > { %10805 = vmatmul.mubr.bf16.vlgmr.msra.gmra.mrb[0].mxu0 %v13062_v41 }
 0x1c9   : > { %10837 = vmatpush3.bf16.msra.mxu0 %v13033_v10  ;;  %10808 = vmatprep.mubr.bf16.mxu0 %v13064_v52  ;;  %v12025_v10 = vld [vmem:[%s14168_s1 + $0x150] sm:$0xff]  }
 0x1ca   : > { %10838 = vmatprep.subr.bf16.mxu0 %v12024_v22 }
 0x1cd   : > { %10839 = vmatpush3.bf16.msra.mxu0 %v12024_v22  ;;  %v3605_v22 = vrot.slane %v3459_v58, 5  ;;  %v3472_v58 = vld [vmem:[#allocation2 + $0xb0] sm:$0x1] }
 0x1ce   : > { %10840 = vmatprep.subr.bf16.mxu0 %v12025_v10 }
 0x1cf   : > { %v3607_v61 = vrot.slane %v3605_v22, 4  ;;  %v3606_v27 = vsel %vm13040_vm13, %v9629_v25, %v3605_v22  ;;  %v3636_v22 = vrot.slane %v3472_v58, 5  ;;  %v3473_v25 = vld [vmem:[#allocation2 + $0xb4] sm:$0xe]  ;;  %v12046_v58 = vld [vmem:[%s14170_s3 + $0x38] sm:$0xff]  }
 0x1d0   : > { %10809 = vmatmul.mubr.bf16.gmra.mrb[4].mxu0 %v13083_v17 }
 0x1d1   : > { %10812 = vmatprep.mubr.bf16.mxu0 %v13085_v36  ;;  %10841 = vmatpush3.bf16.msra.mxu0 %v12025_v10  ;;  %v12030_v10 = vld [vmem:[%s14168_s1 + $0x178] sm:$0xff]   ;;  %v3609_v49 = vsel %vm13040_vm13, %v3607_v61, %v3608_v5  ;;  %v3637_v32 = vsel %vm13040_vm13, %v3635_v57, %v3636_v22 }
 0x1d2   : > { %10842 = vmatprep.subr.bf16.mxu0 %v12026_v24  ;;  %v13147_v40 = vcombine.low %v3606_v27, %v3609_v49  ;;  %v3475_v61 = vld [vmem:[#allocation2 + $0xbc] sm:$0x1]  ;;  %v12039_v49 = vld [vmem:[%s14170_s3] sm:$0xff]  }
 0x1d3   : > { %v3643_v34 = vrot.slane %v3475_v61, 5  ;;  %10932 = vmatprep.subr.bf16.mxu1 %v12039_v49 }
 0x1d4   : > { %10933 = vmatpush3.bf16.msra.mxu1 %v12039_v49 }
 0x1d5   : > { %10843 = vmatpush3.bf16.msra.mxu0 %v12026_v24  ;;  %v3464_v24 = vld [vmem:[#allocation2 + $0x90] sm:$0xe]  ;;  %10934 = vmatprep.subr.bf16.mxu1 %v12040_v20 }
 0x1d6   : > { %10844 = vmatprep.subr.bf16.mxu0 %v12027_v56  ;;  %v9631_v26 = vrot.slane %v3464_v24, 9  ;;  %v12036_v24 = vld [vmem:[%s14168_s1 + $0x228] sm:$0xff]  }
 0x1d8   : > { %10813 = vmatmul.mubr.bf16.gmra.mrb[8].mxu0 %v13103_v3  ;;  %v3620_v29 = vsel %vm13040_vm13, %v9631_v26, %v3619_v35  ;;  %10935 = vmatpush3.bf16.msra.mxu1 %v12040_v20  ;;  %v12033_v35 = vld [vmem:[%s14168_s1 + $0x210] sm:$0xff]   ;;  %v3476_v26 = vld [vmem:[#allocation2 + $0xc0] sm:$0xe] }
 0x1d9   : > { %10816 = vmatprep.mubr.bf16.mxu0 %v13105_v6  ;;  %10845 = vmatpush3.bf16.msra.mxu0 %v12027_v56  ;;  %v3468_v56 = vld [vmem:[#allocation2 + $0xa0] sm:$0xf]  ;;  %v13162_v59 = vcombine.low %v3620_v29, %v3623_v47  ;;  %v9675_v42 = vrot.slane %v3476_v26, 9  ;;  %v12041_v47 = vld [vmem:[%s14170_s3 + $0x10] sm:$0xff]  }
 0x1da   : > { %10846 = vmatprep.subr.bf16.mxu0 %v12028_v53  ;;  %v3626_v45 = vrot.slane %v3468_v56, 5  ;;  %v4038_v56 = vrot.slane %v4036_v4, 4  ;;  %10936 = vmatprep.subr.bf16.mxu1 %v12041_v47 }
 0x1db   : > { %v4037_v62 = vsel %vm13040_vm13, %v9675_v42, %v4036_v4  ;;  %v5238_v42 = vld [vmem:[#allocation3 + $0xc] sm:$0xf] }
 0x1dc   : > { %v3628_v8 = vrot.slane %v3626_v45, 4  ;;  %v3627_v21 = vsel %vm13040_vm13, %v9632_v23, %v3626_v45  ;;  %v4040_v15 = vsel %vm13040_vm13, %v4038_v56, %v4039_v51  ;;  %10937 = vmatpush3.bf16.msra.mxu1 %v12041_v47  ;;  %v13279_v23 = vld [vmem:[%s14169_s2] ss:$0 sm:$0xff] }
 0x1dd   : > { %10847 = vmatpush3.bf16.msra.mxu0 %v12028_v53  ;;  %v3470_v53 = vld [vmem:[#allocation2 + $0xa8] sm:$0xe]  ;;  %v9692_v45 = vcombine.low %v4037_v62, %v4040_v15  ;;  %10938 = vmatprep.subr.bf16.mxu1 %v12042_v54 }
 0x1de   : > { %10848 = vmatprep.subr.bf16.mxu0 %v12029_v7  ;;  %v9633_v37 = vrot.slane %v3470_v53, 9  ;;  %v3630_v12 = vsel %vm13040_vm13, %v3628_v8, %v3629_v43  ;;  %v12045_v53 = vld [vmem:[%s14170_s3 + $0x30] sm:$0xff]  }
 0x1df   : > { %v13174_v5 = vcombine.low %v3627_v21, %v3630_v12 }
 0x1e0   : > { %10817 = vmatmul.mubr.bf16.gmra.mrb[12].mxu0 %v13123_v14  ;;  %v3634_v31 = vsel %vm13040_vm13, %v9633_v37, %v3633_v50  ;;  %10939 = vmatpush3.bf16.msra.mxu1 %v12042_v54  ;;  %v12044_v50 = vld [vmem:[%s14170_s3 + $0x28] sm:$0xff]  }
 0x1e1   : > { %10820 = vmatprep.mubr.bf16.mxu0 %v13125_v60  ;;  %10849 = vmatpush3.bf16.msra.mxu0 %v12029_v7  ;;  %v3474_v7 = vld [vmem:[#allocation2 + $0xb8] sm:$0xf]  ;;  %v13176_v28 = vcombine.low %v3634_v31, %v3637_v32 }
 0x1e2   : > { %10850 = vmatprep.subr.bf16.mxu0 %v12030_v10  ;;  %v3640_v39 = vrot.slane %v3474_v7, 5  ;;  %10940 = vmatprep.subr.bf16.mxu1 %v12043_v48 }
 0x1e4   : > { %v3642_v63 = vrot.slane %v3640_v39, 4  ;;  %10941 = vmatpush3.bf16.msra.mxu1 %v12043_v48 }
 0x1e5   : > { %10851 = vmatpush3.bf16.msra.mxu0 %v12030_v10  ;;  %v9634_v10 = vrot.slane %v3473_v25, 9  ;;  %10942 = vmatprep.subr.bf16.mxu1 %v12044_v50 }
 0x1e6   : > { %10884 = vmatprep.subr.bf16.mxu0 %v13143_v9  ;;  %v3644_v33 = vsel %vm13040_vm13, %v3642_v63, %v3643_v34 }
 0x1e7   : > { %v3641_v38 = vsel %vm13040_vm13, %v9634_v10, %v3640_v39 }
 0x1e8   : > { %10821 = vmatmul.mubr.bf16.gmra.mrb[16].mxu0 %v13145_v0  ;;  %v13184_v27 = vcombine.low %v3641_v38, %v3644_v33  ;;  %10943 = vmatpush3.bf16.msra.mxu1 %v12044_v50 }
 0x1e9   : > { %10824 = vmatprep.mubr.bf16.mxu0 %v13147_v40  ;;  %10944 = vmatprep.subr.bf16.mxu1 %v12045_v53 }
 0x1ec   : > { %10945 = vmatpush3.bf16.msra.mxu1 %v12045_v53 }
 0x1ed   : > { %10946 = vmatprep.subr.bf16.mxu1 %v12046_v58 }
 0x1f0   : > { %10825 = vmatmul.mubr.bf16.gmra.mrb[20].mxu0 %v13160_v44  ;;  %10947 = vmatpush3.bf16.msra.mxu1 %v12046_v58 }
 0x1f1   : > { %10828 = vmatprep.mubr.bf16.mxu0 %v13162_v59 }
 0x1f8   : > { %10829 = vmatmul.mubr.bf16.gmra.mrb[24].mxu0 %v13174_v5 }
 0x1f9   : > { %10832 = vmatprep.mubr.bf16.mxu0 %v13176_v28 }
 0x200   : > { %10833 = vmatmul.mubr.bf16.gmra.mrb[28].mxu0 %v13184_v27 }
 0x201   : > { %10852 = vmatprep.mubr.bf16.mxu0 %v13062_v41  ;;  %v12034_v41 = vld [vmem:[%s14168_s1 + $0x218] sm:$0xff]  }
 0x208   : > { %10853 = vmatmul.mubr.bf16.vlgmr.msra.gmra.mrb[0].mxu0 %v13064_v52 }
 0x209   : > { %10885 = vmatpush3.bf16.msra.mxu0 %v13143_v9  ;;  %10856 = vmatprep.mubr.bf16.mxu0 %v13083_v17  ;;  %v12035_v9 = vld [vmem:[%s14168_s1 + $0x220] sm:$0xff]  }
 0x20a   : > { %10886 = vmatprep.subr.bf16.mxu0 %v12032_v2 }
 0x20d   : > { %10887 = vmatpush3.bf16.msra.mxu0 %v12032_v2 }
 0x20e   : > { %10888 = vmatprep.subr.bf16.mxu0 %v12033_v35 }
 0x210   : > { %10857 = vmatmul.mubr.bf16.gmra.mrb[4].mxu0 %v13085_v36 }
 0x211   : > { %10860 = vmatprep.mubr.bf16.mxu0 %v13103_v3  ;;  %10889 = vmatpush3.bf16.msra.mxu0 %v12033_v35 }
 0x212   : > { %10890 = vmatprep.subr.bf16.mxu0 %v12034_v41 }
 0x215   : > { %10891 = vmatpush3.bf16.msra.mxu0 %v12034_v41 }
 0x216   : > { %10892 = vmatprep.subr.bf16.mxu0 %v12035_v9 }
 0x218   : > { %10861 = vmatmul.mubr.bf16.gmra.mrb[8].mxu0 %v13105_v6 }
 0x219   : > { %10864 = vmatprep.mubr.bf16.mxu0 %v13123_v14  ;;  %10893 = vmatpush3.bf16.msra.mxu0 %v12035_v9  ;;  %v5245_v9 = vld [vmem:[#allocation3 + $0x18] sm:$0xf] }
 0x21a   : > { %10894 = vmatprep.subr.bf16.mxu0 %v12036_v24 }
 0x21d   : > { %10895 = vmatpush3.bf16.msra.mxu0 %v12036_v24 }
 0x21e   : > { %10896 = vmatprep.subr.bf16.mxu0 %v12037_v16 }
 0x220   : > { %10865 = vmatmul.mubr.bf16.gmra.mrb[12].mxu0 %v13125_v60 }
 0x221   : > { %10868 = vmatprep.mubr.bf16.mxu0 %v13145_v0  ;;  %10897 = vmatpush3.bf16.msra.mxu0 %v12037_v16 }
 0x222   : > { %10898 = vmatprep.subr.bf16.mxu0 %v12038_v30 }
 0x225   : > { %10899 = vmatpush3.bf16.msra.mxu0 %v12038_v30 }
 0x228   : > { %10869 = vmatmul.mubr.bf16.gmra.mrb[16].mxu0 %v13147_v40 }
 0x229   : > { %10872 = vmatprep.mubr.bf16.mxu0 %v13160_v44 }
 0x230   : > { %10873 = vmatmul.mubr.bf16.gmra.mrb[20].mxu0 %v13162_v59 }
 0x231   : > { %10876 = vmatprep.mubr.bf16.mxu0 %v13174_v5 }
 0x238   : > { %10877 = vmatmul.mubr.bf16.gmra.mrb[24].mxu0 %v13176_v28 }
 0x239   : > { %10880 = vmatprep.mubr.bf16.mxu0 %v13184_v27 }
 0x240   : > { %10881 = vmatmul.mubr.bf16.gmra.mrb[28].mxu0 %v9692_v45 }
 0x241   : > { %10900 = vmatprep.mubr.bf16.mxu0 %v13064_v52  ;;  %v3480_v52 = vld [vmem:[#allocation2 + $0xd0] sm:$0xf] }
 0x248   : > { %10901 = vmatmul.mubr.bf16.vlgmr.msra.gmra.mrb[0].mxu0 %v13083_v17  ;;  %v4372_v17 = vrot.slane %v3480_v52, 5  ;;  %v5249_v52 = vld [vmem:[#allocation3 + $0x20] sm:$0x1] }
 0x249   : > { %10904 = vmatprep.mubr.bf16.mxu0 %v13085_v36  ;;  %v3479_v36 = vld [vmem:[#allocation2 + $0xcc] sm:$0xe] }
 0x250   : > { %10905 = vmatmul.mubr.bf16.gmra.mrb[4].mxu0 %v13103_v3  ;;  %v3481_v3 = vld [vmem:[#allocation2 + $0xd4] sm:$0x1] }
 0x251   : > { %10908 = vmatprep.mubr.bf16.mxu0 %v13105_v6  ;;  %v9701_v6 = vrot.slane %v3479_v36, 9  ;;  %v4375_v29 = vrot.slane %v3481_v3, 5 }
 0x258   : > { %10909 = vmatmul.mubr.bf16.gmra.mrb[8].mxu0 %v13123_v14  ;;  %v4374_v14 = vrot.slane %v4372_v17, 4 }
 0x259   : > { %10912 = vmatprep.mubr.bf16.mxu0 %v13125_v60  ;;  %v4373_v60 = vsel %vm13040_vm13, %v9701_v6, %v4372_v17 }
 0x260   : > { %10913 = vmatmul.mubr.bf16.gmra.mrb[12].mxu0 %v13145_v0  ;;  %v4376_v0 = vsel %vm13040_vm13, %v4374_v14, %v4375_v29  ;;  %v5242_v29 = vld [vmem:[#allocation3 + $0x14] sm:$0x1] }
 0x261   : > { %10916 = vmatprep.mubr.bf16.mxu0 %v13147_v40  ;;  %v9718_v40 = vcombine.low %v4373_v60, %v4376_v0 }
 0x268   : > { %10917 = vmatmul.mubr.bf16.gmra.mrb[16].mxu0 %v13160_v44  ;;  %v12047_v44 = vld [vmem:[#allocation3] sm:$0xff]  }
 0x269   : > { %10920 = vmatprep.mubr.bf16.mxu0 %v13162_v59  ;;  %10948 = vmatprep.mubr.bf16.mxu1 %v12047_v44  ;;  %v13273_v59 = vld [vmem:[%s14170_s3 + $0xc0] sm:$0xff]  }
 0x26a   : > { %10980 = vmatprep.subr.bf16.mxu1 %v13273_v59 }
 0x270   : > { %10921 = vmatmul.mubr.bf16.gmra.mrb[20].mxu0 %v13174_v5 }
 0x271   : > { %10924 = vmatprep.mubr.bf16.mxu0 %v13176_v28 }
 0x278   : > { %10925 = vmatmul.mubr.bf16.gmra.mrb[24].mxu0 %v13184_v27 }
 0x279   : > { %10928 = vmatprep.mubr.bf16.mxu0 %v9692_v45 }
 0x280   : > { %10929 = vmatmul.mubr.bf16.gmra.mrb[28].mxu0 %v9718_v40 }
 0x31b   : > { %v10902_v8 = vpop.f32.mrb[0].mxu0 }
 0x31c   : > { %v11364_v43 = vadd.f32 %v10902_v8, %v13279_v23  ;;  %v4512_v37 = vpop.f32.mrb[1].mxu0 }
 0x31d   : > { %v11365_v57 = vadd.f32 %v13279_v23, %v4512_v37  ;;  %v10903_v22 = vpop.f32.mrb[2].mxu0 }
 0x31e   : > { %v4791_v7 = vmax.f32 %v11364_v43, 0.0  ;;  %v11366_v21 = vadd.f32 %v10903_v22, %v13279_v23  ;;  %v4515_v12 = vpop.f32.mrb[3].mxu0 }
 0x31f   : > { %v4789_v39 = vmax.f32 %v11365_v57, 0.0  ;;  %v11367_v31 = vadd.f32 %v13279_v23, %v4515_v12 }
 0x320   : > { %v10038_v32 = vpack.c.bf16 %v4791_v7, %v4791_v7  ;;  %v4792_v25 = vmax.f32 %v11366_v21, 0.0 }
 0x321   : > { %v10036_v61 = vpack.c.bf16 %v4789_v39, %v4789_v39  ;;  %v4790_v5 = vmax.f32 %v11367_v31, 0.0  ;;  %v5259_v39 = vld [vmem:[#allocation3 + $0x30] sm:$0xf] }
 0x322   : > { %v4935_v28 = vshrl.u32 %v10038_v32, 16  ;;  %v10039_v10 = vpack.c.bf16 %v4792_v25, %v4792_v25  ;;  %v4938_v63 = vshll.u32 %v10038_v32, 16 }
 0x323   : > { %v4918_v34 = vshrl.u32 %v10036_v61, 16  ;;  %v4921_v38 = vshll.u32 %v10036_v61, 16  ;;  %v10037_v33 = vpack.c.bf16 %v4790_v5, %v4790_v5  ;;  %v10906_v27 = vpop.f32.mrb[4].mxu0 }
 0x324   : > { %v4937_v49 = vrot.slane %v4935_v28, 7  ;;  %v4943_v20 = vshrl.u32 %v10039_v10, 16  ;;  %v4946_v2 = vshll.u32 %v10039_v10, 16  ;;  %v11368_v35 = vadd.f32 %v10906_v27, %v13279_v23  ;;  %v4528_v41 = vpop.f32.mrb[5].mxu0  ;;  %v5252_v10 = vld [vmem:[#allocation3 + $0x24] sm:$0xf] }
 0x325   : > { %v4920_v24 = vrot.slane %v4918_v34, 7  ;;  %v4926_v16 = vshrl.u32 %v10037_v33, 16  ;;  %v4929_v30 = vshll.u32 %v10037_v33, 16  ;;  %v11369_v1 = vadd.f32 %v13279_v23, %v4528_v41  ;;  %v10907_v4 = vpop.f32.mrb[6].mxu0 }
 0x326   : > { %v4940_v26 = vor.u32 %v4938_v63, %v4937_v49  ;;  %v4941_v19 = vrot.slane %v4937_v49, 4  ;;  %v4945_v56 = vrot.slane %v4943_v20, 7  ;;  %v4795_v51 = vmax.f32 %v11368_v35, 0.0  ;;  %v4531_v62 = vpop.f32.mrb[7].mxu0 }
 0x327   : > { %v4923_v15 = vor.u32 %v4921_v38, %v4920_v24  ;;  %v4924_v45 = vrot.slane %v4920_v24, 4  ;;  %v4928_v17 = vrot.slane %v4926_v16, 7  ;;  %v4793_v36 = vmax.f32 %v11369_v1, 0.0 }
 0x328   : > { %v5246_v3 = vsel %vm12330_vm7, %v4940_v26, %v5245_v9  ;;  %v4948_v6 = vor.u32 %v4946_v2, %v4945_v56  ;;  %v4950_v14 = vrot.slane %v4945_v56, 4  ;;  %v10042_v60 = vpack.c.bf16 %v4795_v51, %v4795_v51  ;;  %v5263_v51 = vld [vmem:[#allocation3 + $0x38] sm:$0x1] }
 0x329   : > { %5247 = vst [vmem:[#allocation3 + $0x18] sm:$0xf] %v5246_v3  ;;  %v5239_v0 = vsel %vm12330_vm7, %v4923_v15, %v5238_v42  ;;  %v4931_v40 = vor.u32 %v4929_v30, %v4928_v17  ;;  %v4933_v47 = vrot.slane %v4928_v17, 4  ;;  %v10040_v54 = vpack.c.bf16 %v4793_v36, %v4793_v36 }
 0x32a   : > { %5240 = vst [vmem:[#allocation3 + $0xc] sm:$0xf] %v5239_v0  ;;  %v4949_v48 = vsel %vm12325_vm5, %v4941_v19, %v4948_v6  ;;  %v5250_v50 = vsel %vm12318_vm4, %v4950_v14, %v5249_v52  ;;  %v4969_v53 = vshrl.u32 %v10042_v60, 16  ;;  %v4972_v8 = vshll.u32 %v10042_v60, 16 }
 0x32b   : > { %5248 = vst [vmem:[#allocation3 + $0x1c] sm:$0xf] %v4949_v48  ;;  %5251 = vst [vmem:[#allocation3 + $0x20] sm:$0x1] %v5250_v50  ;;  %v4932_v58 = vsel %vm12325_vm5, %v4924_v45, %v4931_v40  ;;  %v5243_v44 = vsel %vm12318_vm4, %v4933_v47, %v5242_v29  ;;  %v4952_v43 = vshrl.u32 %v10040_v54, 16  ;;  %v10910_v37 = vpop.f32.mrb[8].mxu0  ;;  %v11370_v22 = vadd.f32 %v10907_v4, %v13279_v23 }
 0x32c   : > { %5241 = vst [vmem:[#allocation3 + $0x10] sm:$0xf] %v4932_v58  ;;  %5244 = vst [vmem:[#allocation3 + $0x14] sm:$0x1] %v5243_v44  ;;  %v13299_v57 = vrot.slane %v4969_v53, 7  ;;  %v11371_v7 = vadd.f32 %v13279_v23, %v4531_v62  ;;  %v11372_v21 = vadd.f32 %v10910_v37, %v13279_v23  ;;  %v4544_v12 = vpop.f32.mrb[9].mxu0 }
 0x32d   : > { %v13304_v31 = vrot.slane %v4952_v43, 7  ;;  %v4955_v32 = vshll.u32 %v10040_v54, 16  ;;  %v11373_v25 = vadd.f32 %v13279_v23, %v4544_v12  ;;  %v10911_v61 = vpop.f32.mrb[10].mxu0  ;;  %v4796_v63 = vmax.f32 %v11370_v22, 0.0  ;;  %v12052_v4 = vld [vmem:[%s14170_s3 + $0xc8] sm:$0xff]  }
 0x32e   : > { %v4974_v5 = vor.u32 %v4972_v8, %v13299_v57  ;;  %v4975_v28 = vrot.slane %v13299_v57, 4  ;;  %v4794_v34 = vmax.f32 %v11371_v7, 0.0  ;;  %v4547_v38 = vpop.f32.mrb[11].mxu0  ;;  %v4799_v49 = vmax.f32 %v11372_v21, 0.0  ;;  %v5256_v62 = vld [vmem:[#allocation3 + $0x2c] sm:$0x1] }
 0x32f   : > { %v4957_v33 = vor.u32 %v4955_v32, %v13304_v31  ;;  %v4958_v27 = vrot.slane %v13304_v31, 4  ;;  %v4797_v20 = vmax.f32 %v11373_v25, 0.0  ;;  %v10043_v35 = vpack.c.bf16 %v4796_v63, %v4796_v63  ;;  %v5273_v29 = vld [vmem:[#allocation3 + $0x48] sm:$0xf]  ;;  %v5266_v57 = vld [vmem:[#allocation3 + $0x3c] sm:$0xf] }
 0x330   : > { %v5260_v2 = vsel %vm12330_vm7, %v4974_v5, %v5259_v39  ;;  %v10041_v41 = vpack.c.bf16 %v4794_v34, %v4794_v34  ;;  %v11374_v9 = vadd.f32 %v10911_v61, %v13279_v23  ;;  %v10046_v16 = vpack.c.bf16 %v4799_v49, %v4799_v49  ;;  %v12055_v31 = vld [vmem:[%s14170_s3 + $0xd0] sm:$0xff]  }
 0x331   : > { %5261 = vst [vmem:[#allocation3 + $0x30] sm:$0xf] %v5260_v2  ;;  %v5253_v24 = vsel %vm12330_vm7, %v4957_v33, %v5252_v10  ;;  %v10044_v30 = vpack.c.bf16 %v4797_v20, %v4797_v20  ;;  %v11375_v1 = vadd.f32 %v13279_v23, %v4547_v38  ;;  %v4977_v26 = vshrl.u32 %v10043_v35, 16 }
 0x332   : > { %5254 = vst [vmem:[#allocation3 + $0x24] sm:$0xf] %v5253_v24  ;;  %v4980_v19 = vshll.u32 %v10043_v35, 16  ;;  %v4960_v42 = vshrl.u32 %v10041_v41, 16  ;;  %v4963_v56 = vshll.u32 %v10041_v41, 16  ;;  %v5003_v15 = vshrl.u32 %v10046_v16, 16 }
 0x333   : > { %v5006_v45 = vshll.u32 %v10046_v16, 16  ;;  %v4986_v52 = vshrl.u32 %v10044_v30, 16  ;;  %v4989_v17 = vshll.u32 %v10044_v30, 16  ;;  %v10914_v36 = vpop.f32.mrb[12].mxu0  ;;  %v13320_v3 = vld [vmem:[#allocation3 + $0xc] sm:$0xff]   ;;  %v4979_v6 = vrot.slane %v4977_v26, 7 }
 0x334   : > { %v4962_v14 = vrot.slane %v4960_v42, 7  ;;  %v4800_v60 = vmax.f32 %v11374_v9, 0.0  ;;  %v4798_v0 = vmax.f32 %v11375_v1, 0.0  ;;  %v4560_v40 = vpop.f32.mrb[13].mxu0  ;;  %v13322_v47 = vld [vmem:[#allocation3 + $0x18] sm:$0xff]   ;;  %v13324_v54 = vrot.slane %v5003_v15, 7  ;;  %10949 = vmatmul.mubr.bf16.vlgmr.msra.gmra.mrb[0].mxu1 %v13320_v3 }
 0x335   : > { %v13326_v48 = vrot.slane %v4986_v52, 7  ;;  %v11376_v50 = vadd.f32 %v10914_v36, %v13279_v23  ;;  %v11377_v53 = vadd.f32 %v13279_v23, %v4560_v40  ;;  %v10915_v58 = vpop.f32.mrb[14].mxu0  ;;  %v4982_v44 = vor.u32 %v4980_v19, %v4979_v6  ;;  %10952 = vmatprep.mubr.bf16.mxu1 %v13322_v47  ;;  %10981 = vmatpush3.bf16.msra.mxu1 %v13273_v59  ;;  %v12058_v9 = vld [vmem:[%s14170_s3 + $0xd8] sm:$0xff]   ;;  %v5277_v24 = vld [vmem:[#allocation3 + $0x50] sm:$0x1] }
 0x336   : > { %v4984_v8 = vrot.slane %v4979_v6, 4  ;;  %v4965_v43 = vor.u32 %v4963_v56, %v4962_v14  ;;  %v4967_v37 = vrot.slane %v4962_v14, 4  ;;  %v4563_v22 = vpop.f32.mrb[15].mxu0  ;;  %v5008_v7 = vor.u32 %v5006_v45, %v13324_v54  ;;  %10982 = vmatprep.subr.bf16.mxu1 %v12052_v4  ;;  %v5287_v40 = vld [vmem:[#allocation3 + $0x60] sm:$0xf] }
 0x337   : > { %v5009_v21 = vrot.slane %v13324_v54, 4  ;;  %v4991_v12 = vor.u32 %v4989_v17, %v13326_v48  ;;  %v4992_v39 = vrot.slane %v13326_v48, 4  ;;  %v4983_v32 = vsel %vm12325_vm5, %v4975_v28, %v4982_v44 }
 0x338   : > { %v5264_v25 = vsel %vm12318_vm4, %v4984_v8, %v5263_v51  ;;  %v4966_v59 = vsel %vm12325_vm5, %v4958_v27, %v4965_v43  ;;  %v5257_v61 = vsel %vm12318_vm4, %v4967_v37, %v5256_v62  ;;  %5262 = vst [vmem:[#allocation3 + $0x34] sm:$0xf] %v4983_v32  ;;  %v5274_v5 = vsel %vm12330_vm7, %v5008_v7, %v5273_v29  ;;  %v5270_v51 = vld [vmem:[#allocation3 + $0x44] sm:$0x1] }
 0x339   : > { %5265 = vst [vmem:[#allocation3 + $0x38] sm:$0x1] %v5264_v25  ;;  %5255 = vst [vmem:[#allocation3 + $0x28] sm:$0xf] %v4966_v59  ;;  %v5267_v10 = vsel %vm12330_vm7, %v4991_v12, %v5266_v57  ;;  %v10047_v28 = vpack.c.bf16 %v4800_v60, %v4800_v60  ;;  %v10045_v63 = vpack.c.bf16 %v4798_v0, %v4798_v0  ;;  %v4803_v34 = vmax.f32 %v11376_v50, 0.0 }
 0x33a   : > { %5258 = vst [vmem:[#allocation3 + $0x2c] sm:$0x1] %v5257_v61  ;;  %5275 = vst [vmem:[#allocation3 + $0x48] sm:$0xf] %v5274_v5  ;;  %v4801_v38 = vmax.f32 %v11377_v53, 0.0  ;;  %v11378_v33 = vadd.f32 %v10915_v58, %v13279_v23  ;;  %v11379_v27 = vadd.f32 %v13279_v23, %v4563_v22  ;;  %10983 = vmatpush3.bf16.msra.mxu1 %v12052_v4  ;;  %v12061_v53 = vld [vmem:[%s14170_s3 + $0xe0] sm:$0xff]  }
 0x33b   : > { %5268 = vst [vmem:[#allocation3 + $0x3c] sm:$0xf] %v5267_v10  ;;  %v5011_v49 = vshrl.u32 %v10047_v28, 16  ;;  %v5014_v20 = vshll.u32 %v10047_v28, 16  ;;  %v4994_v2 = vshrl.u32 %v10045_v63, 16  ;;  %v4997_v35 = vshll.u32 %v10045_v63, 16  ;;  %10984 = vmatprep.subr.bf16.mxu1 %v12055_v31 }
 0x33c   : > { %v10918_v41 = vpop.f32.mrb[16].mxu0  ;;  %v10050_v16 = vpack.c.bf16 %v4803_v34, %v4803_v34  ;;  %v10048_v30 = vpack.c.bf16 %v4801_v38, %v4801_v38  ;;  %v4804_v1 = vmax.f32 %v11378_v33, 0.0  ;;  %v4802_v26 = vmax.f32 %v11379_v27, 0.0  ;;  %v5280_v50 = vld [vmem:[#allocation3 + $0x54] sm:$0xf] }
 0x33d   : > { %v4576_v19 = vpop.f32.mrb[17].mxu0  ;;  %v5013_v42 = vrot.slane %v5011_v49, 7  ;;  %v4996_v56 = vrot.slane %v4994_v2, 7  ;;  %v11380_v4 = vadd.f32 %v10918_v41, %v13279_v23  ;;  %v12064_v33 = vld [vmem:[%s14170_s3 + $0xe8] sm:$0xff]   ;;  %v5291_v41 = vld [vmem:[#allocation3 + $0x68] sm:$0x1] }
 0x33e   : > { %v11381_v62 = vadd.f32 %v13279_v23, %v4576_v19  ;;  %v10919_v15 = vpop.f32.mrb[18].mxu0  ;;  %v5037_v45 = vshrl.u32 %v10050_v16, 16  ;;  %v5040_v52 = vshll.u32 %v10050_v16, 16  ;;  %v5020_v17 = vshrl.u32 %v10048_v30, 16  ;;  %10985 = vmatpush3.bf16.msra.mxu1 %v12055_v31 }
 0x33f   : > { %v5023_v36 = vshll.u32 %v10048_v30, 16  ;;  %v4579_v6 = vpop.f32.mrb[19].mxu0  ;;  %v5016_v14 = vor.u32 %v5014_v20, %v5013_v42  ;;  %v5018_v29 = vrot.slane %v5013_v42, 4  ;;  %v4999_v60 = vor.u32 %v4997_v35, %v4996_v56  ;;  %10986 = vmatprep.subr.bf16.mxu1 %v12058_v9  ;;  %v13364_v57 = vld [vmem:[#allocation3 + $0x30] sm:$0xff]  }
 0x340   : > { %v5001_v0 = vrot.slane %v4996_v56, 4  ;;  %v5039_v58 = vrot.slane %v5037_v45, 7  ;;  %v5022_v44 = vrot.slane %v5020_v17, 7  ;;  %v10051_v8 = vpack.c.bf16 %v4804_v1, %v4804_v1  ;;  %v13362_v37 = vld [vmem:[#allocation3 + $0x24] sm:$0xff]  }
 0x341   : > { %v10049_v43 = vpack.c.bf16 %v4802_v26, %v4802_v26  ;;  %v5017_v22 = vsel %vm12325_vm5, %v5009_v21, %v5016_v14  ;;  %v5278_v7 = vsel %vm12318_vm4, %v5018_v29, %v5277_v24  ;;  %v5000_v12 = vsel %vm12325_vm5, %v4992_v39, %v4999_v60  ;;  %10953 = vmatmul.mubr.bf16.gmra.mrb[4].mxu1 %v13362_v37  ;;  %v5301_v29 = vld [vmem:[#allocation3 + $0x78] sm:$0xf] }
 0x342   : > { %v5271_v31 = vsel %vm12318_vm4, %v5001_v0, %v5270_v51  ;;  %5276 = vst [vmem:[#allocation3 + $0x4c] sm:$0xf] %v5017_v22  ;;  %5279 = vst [vmem:[#allocation3 + $0x50] sm:$0x1] %v5278_v7  ;;  %v5042_v32 = vor.u32 %v5040_v52, %v5039_v58  ;;  %v5043_v54 = vrot.slane %v5039_v58, 4  ;;  %v5025_v25 = vor.u32 %v5023_v36, %v5022_v44  ;;  %v12067_v52 = vld [vmem:[%s14170_s3 + $0xf0] sm:$0xff]  }
 0x343   : > { %5269 = vst [vmem:[#allocation3 + $0x40] sm:$0xf] %v5000_v12  ;;  %5272 = vst [vmem:[#allocation3 + $0x44] sm:$0x1] %v5271_v31  ;;  %v5026_v59 = vrot.slane %v5022_v44, 4  ;;  %v5045_v21 = vshrl.u32 %v10051_v8, 16  ;;  %10956 = vmatprep.mubr.bf16.mxu1 %v13364_v57  ;;  %10987 = vmatpush3.bf16.msra.mxu1 %v12058_v9  ;;  %v11382_v20 = vadd.f32 %v10919_v15, %v13279_v23 }
 0x344   : > { %v5048_v61 = vshll.u32 %v10051_v8, 16  ;;  %v5028_v5 = vshrl.u32 %v10049_v43, 16  ;;  %v5031_v48 = vshll.u32 %v10049_v43, 16  ;;  %v10922_v39 = vpop.f32.mrb[20].mxu0  ;;  %v5288_v10 = vsel %vm12330_vm7, %v5042_v32, %v5287_v40  ;;  %10988 = vmatprep.subr.bf16.mxu1 %v12061_v53  ;;  %v5284_v9 = vld [vmem:[#allocation3 + $0x5c] sm:$0x1] }
 0x345   : > { %v5281_v28 = vsel %vm12330_vm7, %v5025_v25, %v5280_v50  ;;  %v4807_v63 = vmax.f32 %v11380_v4, 0.0  ;;  %v4805_v34 = vmax.f32 %v11381_v62, 0.0  ;;  %v4592_v38 = vpop.f32.mrb[21].mxu0  ;;  %5289 = vst [vmem:[#allocation3 + $0x60] sm:$0xf] %v5288_v10  ;;  %v5047_v27 = vrot.slane %v5045_v21, 7 }
 0x346   : > { %5282 = vst [vmem:[#allocation3 + $0x54] sm:$0xf] %v5281_v28  ;;  %v5030_v49 = vrot.slane %v5028_v5, 7  ;;  %v11383_v2 = vadd.f32 %v13279_v23, %v4579_v6  ;;  %v10923_v35 = vpop.f32.mrb[22].mxu0  ;;  %v11384_v30 = vadd.f32 %v10922_v39, %v13279_v23  ;;  %v11385_v1 = vadd.f32 %v13279_v23, %v4592_v38  ;;  %v5294_v44 = vld [vmem:[#allocation3 + $0x6c] sm:$0xf] }
 0x347   : > { %v10054_v24 = vpack.c.bf16 %v4807_v63, %v4807_v63  ;;  %v10052_v16 = vpack.c.bf16 %v4805_v34, %v4805_v34  ;;  %v4595_v26 = vpop.f32.mrb[23].mxu0  ;;  %v5050_v19 = vor.u32 %v5048_v61, %v5047_v27  ;;  %v5052_v42 = vrot.slane %v5047_v27, 4  ;;  %10989 = vmatpush3.bf16.msra.mxu1 %v12061_v53  ;;  %v12070_v10 = vld [vmem:[%s14170_s3 + $0xf8] sm:$0xff]  }
 0x348   : > { %v5033_v56 = vor.u32 %v5031_v48, %v5030_v49  ;;  %v5035_v51 = vrot.slane %v5030_v49, 4  ;;  %10990 = vmatprep.subr.bf16.mxu1 %v12064_v33  ;;  %v4808_v50 = vmax.f32 %v11382_v20, 0.0  ;;  %v4806_v53 = vmax.f32 %v11383_v2, 0.0 }
 0x349   : > { %v5071_v4 = vshrl.u32 %v10054_v24, 16  ;;  %v5074_v62 = vshll.u32 %v10054_v24, 16  ;;  %v5054_v15 = vshrl.u32 %v10052_v16, 16  ;;  %v5057_v45 = vshll.u32 %v10052_v16, 16  ;;  %v13408_v58 = vld [vmem:[#allocation3 + $0x48] sm:$0xff]  }
 0x34a   : > { %v5051_v17 = vsel %vm12325_vm5, %v5043_v54, %v5050_v19  ;;  %v5292_v36 = vsel %vm12318_vm4, %v5052_v42, %v5291_v41  ;;  %v5034_v6 = vsel %vm12325_vm5, %v5026_v59, %v5033_v56  ;;  %v5285_v14 = vsel %vm12318_vm4, %v5035_v51, %v5284_v9  ;;  %v13402_v60 = vld [vmem:[#allocation3 + $0x3c] sm:$0xff]   ;;  %v5298_v41 = vld [vmem:[#allocation3 + $0x74] sm:$0x1]  ;;  %v5315_v19 = vld [vmem:[#allocation3 + $0x90] sm:$0xf] }
 0x34b   : > { %5290 = vst [vmem:[#allocation3 + $0x64] sm:$0xf] %v5051_v17  ;;  %5293 = vst [vmem:[#allocation3 + $0x68] sm:$0x1] %v5292_v36  ;;  %v13404_v0 = vrot.slane %v5071_v4, 7  ;;  %v13406_v40 = vrot.slane %v5054_v15, 7  ;;  %v11386_v22 = vadd.f32 %v10923_v35, %v13279_v23  ;;  %v11387_v7 = vadd.f32 %v13279_v23, %v4595_v26  ;;  %10957 = vmatmul.mubr.bf16.gmra.mrb[8].mxu1 %v13402_v60 }
 0x34c   : > { %5283 = vst [vmem:[#allocation3 + $0x58] sm:$0xf] %v5034_v6  ;;  %5286 = vst [vmem:[#allocation3 + $0x5c] sm:$0x1] %v5285_v14  ;;  %v4811_v8 = vmax.f32 %v11384_v30, 0.0  ;;  %v4809_v43 = vmax.f32 %v11385_v1, 0.0  ;;  %10960 = vmatprep.mubr.bf16.mxu1 %v13408_v58  ;;  %10991 = vmatpush3.bf16.msra.mxu1 %v12064_v33  ;;  %v10055_v21 = vpack.c.bf16 %v4808_v50, %v4808_v50 }
 0x34d   : > { %v10926_v12 = vpop.f32.mrb[24].mxu0  ;;  %v5076_v31 = vor.u32 %v5074_v62, %v13404_v0  ;;  %v5077_v32 = vrot.slane %v13404_v0, 4  ;;  %v5059_v54 = vor.u32 %v5057_v45, %v13406_v40  ;;  %v5060_v25 = vrot.slane %v13406_v40, 4  ;;  %10992 = vmatprep.subr.bf16.mxu1 %v12067_v52  ;;  %v5305_v35 = vld [vmem:[#allocation3 + $0x80] sm:$0x1]  ;;  %v13434_v4 = vld [vmem:[%s14170_s3 + $0x180] sm:$0xff]  }
 0x34e   : > { %v4608_v59 = vpop.f32.mrb[25].mxu0  ;;  %v10053_v61 = vpack.c.bf16 %v4806_v53, %v4806_v53  ;;  %v10058_v5 = vpack.c.bf16 %v4811_v8, %v4811_v8  ;;  %v10056_v48 = vpack.c.bf16 %v4809_v43, %v4809_v43  ;;  %v4812_v34 = vmax.f32 %v11386_v22, 0.0  ;;  %v5308_v0 = vld [vmem:[#allocation3 + $0x84] sm:$0xf] }
 0x34f   : > { %v13418_v39 = vpop.f32.mrb[26].mxu0  ;;  %v5302_v28 = vsel %vm12330_vm7, %v5076_v31, %v5301_v29  ;;  %v5295_v63 = vsel %vm12330_vm7, %v5059_v54, %v5294_v44  ;;  %v4810_v38 = vmax.f32 %v11387_v7, 0.0  ;;  %v5079_v27 = vshrl.u32 %v10055_v21, 16 }
 0x350   : > { %v13427_v33 = vpop.f32.mrb[27].mxu0  ;;  %5303 = vst [vmem:[#allocation3 + $0x78] sm:$0xf] %v5302_v28  ;;  %5296 = vst [vmem:[#allocation3 + $0x6c] sm:$0xf] %v5295_v63  ;;  %v5082_v49 = vshll.u32 %v10055_v21, 16  ;;  %10993 = vmatpush3.bf16.msra.mxu1 %v12067_v52  ;;  %v10059_v42 = vpack.c.bf16 %v4812_v34, %v4812_v34  ;;  %v11388_v45 = vadd.f32 %v10926_v12, %v13279_v23 }
 0x351   : > { %v5062_v20 = vshrl.u32 %v10053_v61, 16  ;;  %v5065_v2 = vshll.u32 %v10053_v61, 16  ;;  %v5105_v9 = vshrl.u32 %v10058_v5, 16  ;;  %v5108_v24 = vshll.u32 %v10058_v5, 16  ;;  %10994 = vmatprep.subr.bf16.mxu1 %v12070_v10 }
 0x352   : > { %v5088_v16 = vshrl.u32 %v10056_v48, 16  ;;  %v5091_v30 = vshll.u32 %v10056_v48, 16  ;;  %v5081_v1 = vrot.slane %v5079_v27, 7  ;;  %v10057_v56 = vpack.c.bf16 %v4810_v38, %v4810_v38  ;;  %v13440_v17 = vld [vmem:[#allocation3 + $0x60] sm:$0xff]  }
 0x353   : > { %v5064_v26 = vrot.slane %v5062_v20, 7  ;;  %v13429_v51 = vld [vmem:[#allocation3 + $0x54] sm:$0xff]   ;;  %v5107_v62 = vrot.slane %v5105_v9, 7  ;;  %v11389_v52 = vadd.f32 %v13279_v23, %v4608_v59  ;;  %v10930_v40 = vpop.f32.mrb[28].mxu0  ;;  %v5113_v21 = vshrl.u32 %v10059_v42, 16 }
 0x354   : > { %v13436_v15 = vrot.slane %v5088_v16, 7  ;;  %v5084_v36 = vor.u32 %v5082_v49, %v5081_v1  ;;  %v5086_v6 = vrot.slane %v5081_v1, 4  ;;  %10961 = vmatmul.mubr.bf16.gmra.mrb[12].mxu1 %v13429_v51  ;;  %v4624_v43 = vpop.f32.mrb[29].mxu0  ;;  %v5116_v61 = vshll.u32 %v10059_v42, 16  ;;  %v5319_v49 = vld [vmem:[#allocation3 + $0x98] sm:$0x1] }
 0x355   : > { %v5067_v14 = vor.u32 %v5065_v2, %v5064_v26  ;;  %v5069_v29 = vrot.slane %v5064_v26, 4  ;;  %v5110_v50 = vor.u32 %v5108_v24, %v5107_v62  ;;  %v5111_v53 = vrot.slane %v5107_v62, 4  ;;  %10964 = vmatprep.mubr.bf16.mxu1 %v13440_v17  ;;  %10995 = vmatpush3.bf16.msra.mxu1 %v12070_v10  ;;  %v13454_v54 = vpop.f32.mrb[30].mxu0  ;;  %v5312_v16 = vld [vmem:[#allocation3 + $0x8c] sm:$0x1] }
 0x356   : > { %v5093_v44 = vor.u32 %v5091_v30, %v13436_v15  ;;  %v5094_v8 = vrot.slane %v13436_v15, 4  ;;  %v5085_v22 = vsel %vm12325_vm5, %v5077_v32, %v5084_v36  ;;  %v5306_v7 = vsel %vm12318_vm4, %v5086_v6, %v5305_v35  ;;  %11028 = vmatprep.subr.bf16.mxu1 %v13434_v4  ;;  %v5329_v62 = vld [vmem:[#allocation3 + $0xa8] sm:$0xf] }
 0x357   : > { %v5068_v12 = vsel %vm12325_vm5, %v5060_v25, %v5067_v14  ;;  %v5299_v31 = vsel %vm12318_vm4, %v5069_v29, %v5298_v41  ;;  %5304 = vst [vmem:[#allocation3 + $0x7c] sm:$0xf] %v5085_v22  ;;  %5307 = vst [vmem:[#allocation3 + $0x80] sm:$0x1] %v5306_v7  ;;  %v5316_v32 = vsel %vm12330_vm7, %v5110_v50, %v5315_v19  ;;  %v13461_v25 = vpop.f32.mrb[31].mxu0  ;;  %v5096_v5 = vshrl.u32 %v10057_v56, 16 }
 0x358   : > { %5297 = vst [vmem:[#allocation3 + $0x70] sm:$0xf] %v5068_v12  ;;  %5300 = vst [vmem:[#allocation3 + $0x74] sm:$0x1] %v5299_v31  ;;  %v5309_v59 = vsel %vm12330_vm7, %v5093_v44, %v5308_v0  ;;  %v5099_v48 = vshll.u32 %v10057_v56, 16  ;;  %v4815_v10 = vmax.f32 %v11388_v45, 0.0  ;;  %v11390_v34 = vadd.f32 %v13418_v39, %v13279_v23 }
 0x359   : > { %5317 = vst [vmem:[#allocation3 + $0x90] sm:$0xf] %v5316_v32  ;;  %5310 = vst [vmem:[#allocation3 + $0x84] sm:$0xf] %v5309_v59  ;;  %v4813_v28 = vmax.f32 %v11389_v52, 0.0  ;;  %v5115_v63 = vrot.slane %v5113_v21, 7  ;;  %v11391_v38 = vadd.f32 %v13279_v23, %v13427_v33  ;;  %v11392_v27 = vadd.f32 %v10930_v40, %v13279_v23 }
 0x35a   : > { %v5098_v20 = vrot.slane %v5096_v5, 7  ;;  %v10062_v2 = vpack.c.bf16 %v4815_v10, %v4815_v10  ;;  %v11393_v41 = vadd.f32 %v13279_v23, %v4624_v43  ;;  %v4816_v30 = vmax.f32 %v11390_v34, 0.0  ;;  %v5322_v14 = vld [vmem:[#allocation3 + $0x9c] sm:$0xf] }
 0x35b   : > { %v10060_v35 = vpack.c.bf16 %v4813_v28, %v4813_v28  ;;  %v5118_v9 = vor.u32 %v5116_v61, %v5115_v63  ;;  %v5120_v24 = vrot.slane %v5115_v63, 4  ;;  %v4814_v1 = vmax.f32 %v11391_v38, 0.0  ;;  %v5333_v63 = vld [vmem:[#allocation3 + $0xb0] sm:$0x1] }
 0x35c   : > { %v5101_v26 = vor.u32 %v5099_v48, %v5098_v20  ;;  %v5103_v19 = vrot.slane %v5098_v20, 4  ;;  %v5139_v42 = vshrl.u32 %v10062_v2, 16  ;;  %v5142_v39 = vshll.u32 %v10062_v2, 16  ;;  %v5326_v2 = vld [vmem:[#allocation3 + $0xa4] sm:$0x1] }
 0x35d   : > { %v5119_v33 = vsel %vm12325_vm5, %v5111_v53, %v5118_v9  ;;  %v5320_v56 = vsel %vm12318_vm4, %v5120_v24, %v5319_v49  ;;  %v5122_v15 = vshrl.u32 %v10060_v35, 16  ;;  %v5125_v45 = vshll.u32 %v10060_v35, 16 }
 0x35e   : > { %5318 = vst [vmem:[#allocation3 + $0x94] sm:$0xf] %v5119_v33  ;;  %5321 = vst [vmem:[#allocation3 + $0x98] sm:$0x1] %v5320_v56  ;;  %v5102_v52 = vsel %vm12325_vm5, %v5094_v8, %v5101_v26  ;;  %v5313_v36 = vsel %vm12318_vm4, %v5103_v19, %v5312_v16  ;;  %v5141_v6 = vrot.slane %v5139_v42, 7  ;;  %v10063_v29 = vpack.c.bf16 %v4816_v30, %v4816_v30  ;;  %v13479_v43 = vld [vmem:[#allocation3 + $0x78] sm:$0xff]  }
 0x35f   : > { %v13477_v0 = vld [vmem:[#allocation3 + $0x6c] sm:$0xff]   ;;  %5311 = vst [vmem:[#allocation3 + $0x88] sm:$0xf] %v5102_v52  ;;  %5314 = vst [vmem:[#allocation3 + $0x8c] sm:$0x1] %v5313_v36  ;;  %v5124_v40 = vrot.slane %v5122_v15, 7  ;;  %v10061_v50 = vpack.c.bf16 %v4814_v1, %v4814_v1  ;;  %v11394_v38 = vadd.f32 %v13454_v54, %v13279_v23 }
 0x360   : > { %v4819_v53 = vmax.f32 %v11392_v27, 0.0  ;;  %v4817_v44 = vmax.f32 %v11393_v41, 0.0  ;;  %v5144_v22 = vor.u32 %v5142_v39, %v5141_v6  ;;  %v5145_v7 = vrot.slane %v5141_v6, 4  ;;  %10965 = vmatmul.mubr.bf16.gmra.mrb[16].mxu1 %v13477_v0  ;;  %v5343_v39 = vld [vmem:[#allocation3 + $0xc0] sm:$0xf] }
 0x361   : > { %v5147_v12 = vshrl.u32 %v10063_v29, 16  ;;  %v5150_v8 = vshll.u32 %v10063_v29, 16  ;;  %v5127_v31 = vor.u32 %v5125_v45, %v5124_v40  ;;  %v5128_v32 = vrot.slane %v5124_v40, 4  ;;  %10968 = vmatprep.mubr.bf16.mxu1 %v13479_v43  ;;  %v5336_v45 = vld [vmem:[#allocation3 + $0xb4] sm:$0xf] }
 0x362   : > { %v5130_v59 = vshrl.u32 %v10061_v50, 16  ;;  %v5133_v21 = vshll.u32 %v10061_v50, 16  ;;  %v5330_v61 = vsel %vm12330_vm7, %v5144_v22, %v5329_v62  ;;  %v10066_v48 = vpack.c.bf16 %v4819_v53, %v4819_v53  ;;  %v5347_v22 = vld [vmem:[#allocation3 + $0xc8] sm:$0x1] }
 0x363   : > { %v5149_v5 = vrot.slane %v5147_v12, 7  ;;  %v10064_v10 = vpack.c.bf16 %v4817_v44, %v4817_v44  ;;  %5331 = vst [vmem:[#allocation3 + $0xa8] sm:$0xf] %v5330_v61  ;;  %v5323_v28 = vsel %vm12330_vm7, %v5127_v31, %v5322_v14  ;;  %v11395_v27 = vadd.f32 %v13279_v23, %v13461_v25 }
 0x364   : > { %v5132_v34 = vrot.slane %v5130_v59, 7  ;;  %5324 = vst [vmem:[#allocation3 + $0x9c] sm:$0xf] %v5323_v28  ;;  %v5173_v35 = vshrl.u32 %v10066_v48, 16  ;;  %v5176_v41 = vshll.u32 %v10066_v48, 16  ;;  %v4820_v19 = vmax.f32 %v11394_v38, 0.0 }
 0x365   : > { %v5152_v49 = vor.u32 %v5150_v8, %v5149_v5  ;;  %v5154_v20 = vrot.slane %v5149_v5, 4  ;;  %v5156_v16 = vshrl.u32 %v10064_v10, 16  ;;  %v5159_v30 = vshll.u32 %v10064_v10, 16  ;;  %v13501_v62 = vld [vmem:[#allocation3 + $0x90] sm:$0xff]   ;;  %v5340_v59 = vld [vmem:[#allocation3 + $0xbc] sm:$0x1] }
 0x366   : > { %v5135_v9 = vor.u32 %v5133_v21, %v5132_v34  ;;  %v5137_v24 = vrot.slane %v5132_v34, 4  ;;  %v5175_v54 = vrot.slane %v5173_v35, 7  ;;  %v13495_v42 = vld [vmem:[#allocation3 + $0x84] sm:$0xff]   ;;  %v4818_v56 = vmax.f32 %v11395_v27, 0.0  ;;  %v12076_v27 = vld [vmem:[%s14170_s3 + $0x1a8] sm:$0xff]  }
 0x367   : > { %v5153_v1 = vsel %vm12325_vm5, %v5145_v7, %v5152_v49  ;;  %v5334_v26 = vsel %vm12318_vm4, %v5154_v20, %v5333_v63  ;;  %v5158_v33 = vrot.slane %v5156_v16, 7  ;;  %v10067_v52 = vpack.c.bf16 %v4820_v19, %v4820_v19  ;;  %v12077_v49 = vld [vmem:[%s14170_s3 + $0x1b0] sm:$0xff]   ;;  %v12079_v20 = vld [vmem:[%s14170_s3 + $0x1b8] sm:$0xff]  }
 0x368   : > { %5332 = vst [vmem:[#allocation3 + $0xac] sm:$0xf] %v5153_v1  ;;  %5335 = vst [vmem:[#allocation3 + $0xb0] sm:$0x1] %v5334_v26  ;;  %v5136_v23 = vsel %vm12325_vm5, %v5128_v32, %v5135_v9  ;;  %v5327_v25 = vsel %vm12318_vm4, %v5137_v24, %v5326_v2  ;;  %v5178_v15 = vor.u32 %v5176_v41, %v5175_v54  ;;  %10969 = vmatmul.mubr.bf16.gmra.mrb[20].mxu1 %v13495_v42  ;;  %v12080_v2 = vld [vmem:[%s14170_s3 + $0x40] sm:$0xff]   ;;  %v12081_v41 = vld [vmem:[%s14170_s3 + $0x48] sm:$0xff]  }
 0x369   : > { %5325 = vst [vmem:[#allocation3 + $0xa0] sm:$0xf] %v5136_v23  ;;  %5328 = vst [vmem:[#allocation3 + $0xa4] sm:$0x1] %v5327_v25  ;;  %v5161_v36 = vor.u32 %v5159_v30, %v5158_v33  ;;  %v10065_v6 = vpack.c.bf16 %v4818_v56, %v4818_v56  ;;  %10972 = vmatprep.mubr.bf16.mxu1 %v13501_v62  ;;  %v5181_v29 = vshrl.u32 %v10067_v52, 16  ;;  %v5184_v44 = vshll.u32 %v10067_v52, 16 }
 0x36a   : > { %v5344_v14 = vsel %vm12330_vm7, %v5178_v15, %v5343_v39  ;;  %v5179_v8 = vrot.slane %v5175_v54, 4  ;;  %v5162_v21 = vrot.slane %v5158_v33, 4  ;;  %v12082_v9 = vld [vmem:[%s14170_s3 + $0x50] sm:$0xff]   ;;  %v6499_v24 = vld [vmem:[#allocation3 + $0x4] sm:$0xf] }
 0x36b   : > { %5345 = vst [vmem:[#allocation3 + $0xc0] sm:$0xf] %v5344_v14  ;;  %v5337_v40 = vsel %vm12330_vm7, %v5161_v36, %v5336_v45  ;;  %v5164_v50 = vshrl.u32 %v10065_v6, 16  ;;  %v5183_v53 = vrot.slane %v5181_v29, 7  ;;  %v5167_v12 = vshll.u32 %v10065_v6, 16 }
 0x36c   : > { %5338 = vst [vmem:[#allocation3 + $0xb4] sm:$0xf] %v5337_v40  ;;  %v6562_v30 = vshll.u32 %v6499_v24, 16  ;;  %v6501_v1 = vld [vmem:[#allocation3 + $0xc] sm:$0xf] }
 0x36d   : > { %v5166_v7 = vrot.slane %v5164_v50, 7  ;;  %v5186_v31 = vor.u32 %v5184_v44, %v5183_v53  ;;  %v5188_v32 = vrot.slane %v5183_v53, 4  ;;  %v6502_v26 = vld [vmem:[#allocation3 + $0x10] sm:$0xf]  ;;  %v6504_v54 = vld [vmem:[#allocation3 + $0x18] sm:$0xf] }
 0x36e   : > { %v6505_v19 = vld [vmem:[#allocation3 + $0x1c] sm:$0xf]  ;;  %v6507_v23 = vld [vmem:[#allocation3 + $0x24] sm:$0xf]  ;;  %v13607_v33 = vrot.slane %v6562_v30, 5  ;;  %v6577_v52 = vshrl.u32 %v6501_v1, 16 }
 0x36f   : > { %v5169_v61 = vor.u32 %v5167_v12, %v5166_v7  ;;  %v5171_v5 = vrot.slane %v5166_v7, 4  ;;  %v5187_v18 = vsel %vm12325_vm5, %v5179_v8, %v5186_v31  ;;  %v5348_v10 = vsel %vm12318_vm4, %v5188_v32, %v5347_v22  ;;  %v13515_v28 = vld [vmem:[#allocation3 + $0xa8] sm:$0xff]  }
 0x370   : > { %v13509_v48 = vld [vmem:[#allocation3 + $0x9c] sm:$0xff]   ;;  %5346 = vst [vmem:[#allocation3 + $0xc4] sm:$0xf] %v5187_v18  ;;  %5349 = vst [vmem:[#allocation3 + $0xc8] sm:$0x1] %v5348_v10  ;;  %v6586_v36 = vshll.u32 %v6502_v26, 16 }
 0x371   : > { %v5170_v63 = vsel %vm12325_vm5, %v5162_v21, %v5169_v61  ;;  %v5341_v34 = vsel %vm12318_vm4, %v5171_v5, %v5340_v59  ;;  %10973 = vmatmul.mubr.bf16.gmra.mrb[24].mxu1 %v13509_v48  ;;  %v6508_v15 = vld [vmem:[#allocation3 + $0x28] sm:$0xf]  ;;  %v6601_v6 = vshrl.u32 %v6504_v54, 16  ;;  %v6604_v14 = vshll.u32 %v6504_v54, 16  ;;  %v12087_v54 = vld [vmem:[#allocation3 + $0xcc] sm:$0xff]  }
 0x372   : > { %5339 = vst [vmem:[#allocation3 + $0xb8] sm:$0xf] %v5170_v63  ;;  %5342 = vst [vmem:[#allocation3 + $0xbc] sm:$0x1] %v5341_v34  ;;  %10976 = vmatprep.mubr.bf16.mxu1 %v13515_v28  ;;  %v6500_v45 = vld [vmem:[#allocation3 + $0x8] sm:$0x1] }
 0x373   : > { %v6610_v29 = vshll.u32 %v6505_v19, 16  ;;  %v6614_v40 = vshrl.u32 %v6505_v19, 16  ;;  %v6625_v50 = vshrl.u32 %v6507_v23, 16  ;;  %v6628_v53 = vshll.u32 %v6507_v23, 16  ;;  %v6513_v23 = vld [vmem:[#allocation3 + $0x3c] sm:$0xf] }
 0x374   : > { %v6634_v44 = vshll.u32 %v6508_v15, 16  ;;  %v6638_v22 = vshrl.u32 %v6508_v15, 16  ;;  %v6572_v8 = vshll.u32 %v6500_v45, 16  ;;  %v6579_v31 = vrot.slane %v6577_v52, 4  ;;  %v6514_v45 = vld [vmem:[#allocation3 + $0x40] sm:$0xf] }
 0x375   : > { %v13612_v59 = vrot.slane %v6586_v36, 5  ;;  %v6603_v61 = vrot.slane %v6601_v6, 4  ;;  %v6606_v5 = vrot.slane %v6604_v14, 5  ;;  %v6616_v18 = vrot.slane %v6614_v40, 4  ;;  %v6512_v52 = vld [vmem:[#allocation3 + $0x38] sm:$0x1] }
 0x376   : > { %v6627_v10 = vrot.slane %v6625_v50, 4  ;;  %v13616_v63 = vrot.slane %v6634_v44, 5  ;;  %v6640_v34 = vrot.slane %v6638_v22, 4  ;;  %v6516_v50 = vld [vmem:[#allocation3 + $0x48] sm:$0xf]  ;;  %v6676_v44 = vshll.u32 %v6513_v23, 16 }
 0x377   : > { %v13566_v35 = vld [vmem:[#allocation3 + $0xc0] sm:$0xff]   ;;  %v6682_v22 = vshll.u32 %v6514_v45, 16 }
 0x379   : > { %v13523_v38 = vld [vmem:[#allocation3 + $0xb4] sm:$0xff]  }
 0x37a   : > { %10977 = vmatmul.mubr.bf16.gmra.mrb[28].mxu1 %v13523_v38 }
 0x37b   : > { %10996 = vmatprep.mubr.bf16.mxu1 %v13320_v3  ;;  %v12074_v3 = vld [vmem:[%s14170_s3 + $0x198] sm:$0xff]  }
 0x382   : > { %10997 = vmatmul.mubr.bf16.vlgmr.msra.gmra.mrb[0].mxu1 %v13322_v47 }
 0x383   : > { %11000 = vmatprep.mubr.bf16.mxu1 %v13362_v37  ;;  %11029 = vmatpush3.bf16.msra.mxu1 %v13434_v4  ;;  %v12075_v4 = vld [vmem:[%s14170_s3 + $0x1a0] sm:$0xff]  }
 0x384   : > { %11030 = vmatprep.subr.bf16.mxu1 %v12072_v13 }
 0x387   : > { %11031 = vmatpush3.bf16.msra.mxu1 %v12072_v13 }
 0x388   : > { %11032 = vmatprep.subr.bf16.mxu1 %v12073_v11 }
 0x38a   : > { %11001 = vmatmul.mubr.bf16.gmra.mrb[4].mxu1 %v13364_v57 }
 0x38b   : > { %11004 = vmatprep.mubr.bf16.mxu1 %v13402_v60  ;;  %11033 = vmatpush3.bf16.msra.mxu1 %v12073_v11 }
 0x38c   : > { %11034 = vmatprep.subr.bf16.mxu1 %v12074_v3 }
 0x38f   : > { %11035 = vmatpush3.bf16.msra.mxu1 %v12074_v3  ;;  %v6574_v3 = vrot.slane %v6572_v8, 5 }
 0x390   : > { %11036 = vmatprep.subr.bf16.mxu1 %v12075_v4 }
 0x392   : > { %11005 = vmatmul.mubr.bf16.gmra.mrb[8].mxu1 %v13408_v58 }
 0x393   : > { %11008 = vmatprep.mubr.bf16.mxu1 %v13429_v51  ;;  %11037 = vmatpush3.bf16.msra.mxu1 %v12075_v4  ;;  %v6510_v4 = vld [vmem:[#allocation3 + $0x30] sm:$0xf] }
 0x394   : > { %11038 = vmatprep.subr.bf16.mxu1 %v12076_v27 }
 0x397   : > { %11039 = vmatpush3.bf16.msra.mxu1 %v12076_v27 }
 0x398   : > { %11040 = vmatprep.subr.bf16.mxu1 %v12077_v49 }
 0x39a   : > { %11009 = vmatmul.mubr.bf16.gmra.mrb[12].mxu1 %v13440_v17 }
 0x39b   : > { %11012 = vmatprep.mubr.bf16.mxu1 %v13477_v0  ;;  %11041 = vmatpush3.bf16.msra.mxu1 %v12077_v49  ;;  %v6511_v49 = vld [vmem:[#allocation3 + $0x34] sm:$0xf] }
 0x39c   : > { %11042 = vmatprep.subr.bf16.mxu1 %v12079_v20 }
 0x39f   : > { %11043 = vmatpush3.bf16.msra.mxu1 %v12079_v20  ;;  %v6503_v20 = vld [vmem:[#allocation3 + $0x14] sm:$0x1] }
 0x3a0   : > { %11076 = vmatprep.subr.bf16.mxu1 %v12080_v2 }
 0x3a2   : > { %11013 = vmatmul.mubr.bf16.gmra.mrb[16].mxu1 %v13479_v43 }
 0x3a3   : > { %11016 = vmatprep.mubr.bf16.mxu1 %v13495_v42 }
 0x3aa   : > { %11017 = vmatmul.mubr.bf16.gmra.mrb[20].mxu1 %v13501_v62 }
 0x3ab   : > { %11020 = vmatprep.mubr.bf16.mxu1 %v13509_v48 }
 0x3b2   : > { %11021 = vmatmul.mubr.bf16.gmra.mrb[24].mxu1 %v13515_v28 }
 0x3b3   : > { %11024 = vmatprep.mubr.bf16.mxu1 %v13523_v38 }
 0x3ba   : > { %11025 = vmatmul.mubr.bf16.gmra.mrb[28].mxu1 %v13566_v35 }
 0x3bb   : > { %11044 = vmatprep.mubr.bf16.mxu1 %v13322_v47  ;;  %v12083_v47 = vld [vmem:[%s14170_s3 + $0x58] sm:$0xff]  }
 0x3c2   : > { %11045 = vmatmul.mubr.bf16.vlgmr.msra.gmra.mrb[0].mxu1 %v13362_v37  ;;  %v12084_v37 = vld [vmem:[%s14170_s3 + $0x60] sm:$0xff]  }
 0x3c3   : > { %11048 = vmatprep.mubr.bf16.mxu1 %v13364_v57  ;;  %11077 = vmatpush3.bf16.msra.mxu1 %v12080_v2  ;;  %v12085_v57 = vld [vmem:[%s14170_s3 + $0x68] sm:$0xff]  }
 0x3c4   : > { %11078 = vmatprep.subr.bf16.mxu1 %v12081_v41 }
 0x3c7   : > { %11079 = vmatpush3.bf16.msra.mxu1 %v12081_v41  ;;  %v6506_v41 = vld [vmem:[#allocation3 + $0x20] sm:$0x1] }
 0x3c8   : > { %11080 = vmatprep.subr.bf16.mxu1 %v12082_v9 }
 0x3ca   : > { %11049 = vmatmul.mubr.bf16.gmra.mrb[4].mxu1 %v13402_v60  ;;  %v12086_v60 = vld [vmem:[%s14170_s3 + $0x70] sm:$0xff]  }
 0x3cb   : > { %11052 = vmatprep.mubr.bf16.mxu1 %v13408_v58  ;;  %11081 = vmatpush3.bf16.msra.mxu1 %v12082_v9  ;;  %v12088_v58 = vld [vmem:[%s14170_s3 + $0x78] sm:$0xff]   ;;  %v6607_v9 = vor.u32 %v6606_v5, %v6603_v61 }
 0x3cc   : > { %11082 = vmatprep.subr.bf16.mxu1 %v12083_v47 }
 0x3cd   : > { %v6608_v19 = vrot.slane %v6607_v9, 4  ;;  %v6522_v9 = vld [vmem:[#allocation3 + $0x60] sm:$0xf] }
 0x3cf   : > { %11083 = vmatpush3.bf16.msra.mxu1 %v12083_v47 }
 0x3d0   : > { %11084 = vmatprep.subr.bf16.mxu1 %v12084_v37 }
 0x3d2   : > { %11053 = vmatmul.mubr.bf16.gmra.mrb[8].mxu1 %v13429_v51  ;;  %v13602_v51 = vld [vmem:[%s14170_s3 + $0x100] sm:$0xff]  }
 0x3d3   : > { %11056 = vmatprep.mubr.bf16.mxu1 %v13440_v17  ;;  %11085 = vmatpush3.bf16.msra.mxu1 %v12084_v37  ;;  %v6498_v17 = vld [vmem:[#allocation3] sm:$0xf]  ;;  %v6509_v37 = vld [vmem:[#allocation3 + $0x2c] sm:$0x1] }
 0x3d4   : > { %11086 = vmatprep.subr.bf16.mxu1 %v12085_v57  ;;  %v6553_v16 = vshrl.u32 %v6498_v17, 16 }
 0x3d6   : > { %v6555_v25 = vrot.slane %v6553_v16, 4  ;;  %v6658_v16 = vshll.u32 %v6511_v49, 16 }
 0x3d7   : > { %11087 = vmatpush3.bf16.msra.mxu1 %v12085_v57 }
 0x3d8   : > { %11088 = vmatprep.subr.bf16.mxu1 %v12086_v60  ;;  %v13628_v36 = vrot.slane %v6658_v16, 5 }
 0x3da   : > { %11057 = vmatmul.mubr.bf16.gmra.mrb[12].mxu1 %v13477_v0  ;;  %v6556_v0 = vshll.u32 %v6498_v17, 16  ;;  %v6652_v17 = vshll.u32 %v6510_v4, 16 }
 0x3db   : > { %11060 = vmatprep.mubr.bf16.mxu1 %v13479_v43  ;;  %11089 = vmatpush3.bf16.msra.mxu1 %v12086_v60  ;;  %v6566_v43 = vshrl.u32 %v6499_v24, 16  ;;  %v6641_v60 = vor.u32 %v6640_v34, %v13616_v63  ;;  %v6700_v34 = vshll.u32 %v6516_v50, 16 }
 0x3dc   : > { %11090 = vmatprep.subr.bf16.mxu1 %v12088_v58  ;;  %v6558_v39 = vrot.slane %v6556_v0, 5  ;;  %v6662_v0 = vshrl.u32 %v6511_v49, 16 }
 0x3dd   : > { %v6568_v56 = vrot.slane %v6566_v43, 4  ;;  %v6596_v43 = vshll.u32 %v6503_v20, 16  ;;  %v6642_v15 = vrot.slane %v6641_v60, 4 }
 0x3de   : > { %v6559_v7 = vor.u32 %v6558_v39, %v6555_v25 }
 0x3df   : > { %11091 = vmatpush3.bf16.msra.mxu1 %v12088_v58  ;;  %v6569_v12 = vor.u32 %v6568_v56, %v13607_v33  ;;  %v6649_v58 = vshrl.u32 %v6510_v4, 16  ;;  %v6598_v14 = vrot.slane %v6596_v43, 5  ;;  %v13646_v4 = vrot.slane %v6682_v22, 5 }
 0x3e0   : > { %11124 = vmatprep.subr.bf16.mxu1 %v13602_v51  ;;  %v6560_v13 = vrot.slane %v6559_v7, 4  ;;  %v6686_v7 = vshrl.u32 %v6514_v45, 16 }
 0x3e1   : > { %v6570_v11 = vrot.slane %v6569_v12, 4  ;;  %v6517_v12 = vld [vmem:[#allocation3 + $0x4c] sm:$0xf] }
 0x3e2   : > { %11061 = vmatmul.mubr.bf16.gmra.mrb[16].mxu1 %v13495_v42  ;;  %v6580_v42 = vshll.u32 %v6501_v1, 16  ;;  %v6565_v24 = vsel %vm12747_vm10, %v6560_v13, %v13607_v33  ;;  %v6620_v1 = vshll.u32 %v6506_v41, 16  ;;  %v6651_v33 = vrot.slane %v6649_v58, 4  ;;  %v6520_v41 = vld [vmem:[#allocation3 + $0x58] sm:$0xf] }
 0x3e3   : > { %11064 = vmatprep.mubr.bf16.mxu1 %v13501_v62  ;;  %v6590_v62 = vshrl.u32 %v6502_v26, 16  ;;  %v6644_v26 = vshll.u32 %v6509_v37, 16  ;;  %v6706_v13 = vshll.u32 %v6517_v12, 16 }
 0x3e4   : > { %v6582_v32 = vrot.slane %v6580_v42, 5  ;;  %v6654_v42 = vrot.slane %v6652_v17, 5 }
 0x3e5   : > { %v6592_v21 = vrot.slane %v6590_v62, 4  ;;  %v6664_v62 = vrot.slane %v6662_v0, 4  ;;  %v6646_v40 = vrot.slane %v6644_v26, 5  ;;  %v6523_v0 = vld [vmem:[#allocation3 + $0x64] sm:$0xf] }
 0x3e6   : > { %v6583_v27 = vor.u32 %v6582_v32, %v6579_v31  ;;  %v6655_v61 = vor.u32 %v6654_v42, %v6651_v33  ;;  %v6754_v45 = vshll.u32 %v6523_v0, 16 }
 0x3e7   : > { %v6593_v2 = vor.u32 %v6592_v21, %v13612_v59  ;;  %v6647_v21 = vsel %vm12747_vm10, %v6642_v15, %v6646_v40  ;;  %v6665_v5 = vor.u32 %v6664_v62, %v13628_v36  ;;  %v12091_v15 = vld [vmem:[%s14170_s3 + $0x110] sm:$0xff]  }
 0x3e8   : > { %v6584_v30 = vrot.slane %v6583_v27, 4  ;;  %v6688_v27 = vrot.slane %v6686_v7, 4  ;;  %v6656_v37 = vrot.slane %v6655_v61, 4  ;;  %v6525_v7 = vld [vmem:[#allocation3 + $0x6c] sm:$0xf] }
 0x3ea   : > { %11065 = vmatmul.mubr.bf16.gmra.mrb[20].mxu1 %v13509_v48  ;;  %v13614_v48 = vrot.slane %v6610_v29, 5  ;;  %v6589_v6 = vsel %vm12747_vm10, %v6584_v30, %v13612_v59  ;;  %v6622_v29 = vrot.slane %v6620_v1, 5  ;;  %v6689_v43 = vor.u32 %v6688_v27, %v13646_v4  ;;  %v6518_v1 = vld [vmem:[#allocation3 + $0x50] sm:$0x1] }
 0x3eb   : > { %11068 = vmatprep.mubr.bf16.mxu1 %v13515_v28  ;;  %v6630_v28 = vrot.slane %v6628_v53, 5  ;;  %v6673_v53 = vshrl.u32 %v6513_v23, 16  ;;  %v6745_v23 = vshrl.u32 %v6522_v9, 16  ;;  %v6716_v62 = vshll.u32 %v6518_v1, 16  ;;  %v6527_v1 = vld [vmem:[#allocation3 + $0x74] sm:$0x1] }
 0x3ec   : > { %v6617_v47 = vor.u32 %v6616_v18, %v13614_v48  ;;  %v6613_v31 = vsel %vm12747_vm10, %v6608_v19, %v13614_v48  ;;  %v6668_v18 = vshll.u32 %v6512_v52, 16  ;;  %v6734_v19 = vshrl.u32 %v6520_v41, 16 }
 0x3ed   : > { %v6631_v57 = vor.u32 %v6630_v28, %v6627_v10  ;;  %v6515_v10 = vld [vmem:[#allocation3 + $0x44] sm:$0x1]  ;;  %v6697_v28 = vshrl.u32 %v6516_v50, 16  ;;  %v6675_v48 = vrot.slane %v6673_v53, 4  ;;  %v6758_v52 = vshrl.u32 %v6523_v0, 16 }
 0x3ee   : > { %v6618_v39 = vrot.slane %v6617_v47, 4  ;;  %v12090_v47 = vld [vmem:[%s14170_s3 + $0x108] sm:$0xff]   ;;  %v6670_v60 = vrot.slane %v6668_v18, 5  ;;  %v6692_v58 = vshll.u32 %v6515_v10, 16  ;;  %v6736_v53 = vrot.slane %v6734_v19, 4 }
 0x3ef   : > { %v6632_v56 = vrot.slane %v6631_v57, 4  ;;  %v6666_v57 = vrot.slane %v6665_v5, 4  ;;  %v6699_v17 = vrot.slane %v6697_v28, 4  ;;  %v6718_v10 = vrot.slane %v6716_v62, 5  ;;  %v6521_v28 = vld [vmem:[#allocation3 + $0x5c] sm:$0x1] }
 0x3f0   : > { %v6623_v32 = vsel %vm12747_vm10, %v6618_v39, %v6622_v29  ;;  %v6661_v39 = vsel %vm12747_vm10, %v6656_v37, %v13628_v36  ;;  %v6690_v29 = vrot.slane %v6689_v43, 4  ;;  %v6772_v27 = vshll.u32 %v6525_v7, 16 }
 0x3f1   : > { %v6637_v59 = vsel %vm12747_vm10, %v6632_v56, %v13616_v63  ;;  %v13650_v63 = vcombine.low %v6613_v31, %v6623_v32  ;;  %v6694_v56 = vrot.slane %v6692_v58, 5  ;;  %v6671_v33 = vsel %vm12747_vm10, %v6666_v57, %v6670_v60  ;;  %v12093_v57 = vld [vmem:[%s14170_s3 + $0x120] sm:$0xff]   ;;  %v6528_v60 = vld [vmem:[#allocation3 + $0x78] sm:$0xf] }
 0x3f2   : > { %11069 = vmatmul.mubr.bf16.gmra.mrb[24].mxu1 %v13523_v38  ;;  %v6575_v38 = vsel %vm12747_vm10, %v6570_v11, %v6574_v3  ;;  %v6710_v11 = vshrl.u32 %v6517_v12, 16  ;;  %v6678_v3 = vrot.slane %v6676_v44, 5  ;;  %v13652_v20 = vcombine.low %v6637_v59, %v6647_v21  ;;  %v12092_v12 = vld [vmem:[%s14170_s3 + $0x118] sm:$0xff]  }
 0x3f3   : > { %11072 = vmatprep.mubr.bf16.mxu1 %v13566_v35  ;;  %v6594_v35 = vrot.slane %v6593_v2, 4  ;;  %v9850_v25 = vcombine.low %v6565_v24, %v6575_v38  ;;  %v6519_v2 = vld [vmem:[#allocation3 + $0x54] sm:$0xf]  ;;  %v6702_v24 = vrot.slane %v6700_v34, 5  ;;  %v13657_v38 = vrot.slane %v6706_v13, 5 }
 0x3f4   : > { %v6712_v16 = vrot.slane %v6710_v11, 4  ;;  %v6679_v30 = vor.u32 %v6678_v3, %v6675_v48  ;;  %v6721_v26 = vshrl.u32 %v6519_v2, 16  ;;  %v6747_v44 = vrot.slane %v6745_v23, 4  ;;  %v6524_v48 = vld [vmem:[#allocation3 + $0x68] sm:$0x1] }
 0x3f5   : > { %v6599_v8 = vsel %vm12747_vm10, %v6594_v35, %v6598_v14  ;;  %v6730_v35 = vshll.u32 %v6520_v41, 16  ;;  %v6760_v31 = vrot.slane %v6758_v52, 4  ;;  %v13679_v21 = vcombine.low %v6661_v39, %v6671_v33  ;;  %v6531_v52 = vld [vmem:[#allocation3 + $0x84] sm:$0xf] }
 0x3f6   : > { %v13648_v49 = vcombine.low %v6589_v6, %v6599_v8  ;;  %v6713_v42 = vor.u32 %v6712_v16, %v13657_v38  ;;  %v6526_v6 = vld [vmem:[#allocation3 + $0x70] sm:$0xf]  ;;  %v6680_v14 = vrot.slane %v6679_v30, 4  ;;  %v6723_v40 = vrot.slane %v6721_v26, 4 }
 0x3f7   : > { %v13672_v36 = vrot.slane %v6730_v35, 5  ;;  %v13677_v8 = vrot.slane %v6754_v45, 5  ;;  %v6778_v32 = vshll.u32 %v6526_v6, 16  ;;  %v6782_v59 = vshrl.u32 %v6526_v6, 16  ;;  %v6532_v6 = vld [vmem:[#allocation3 + $0x88] sm:$0xf] }
 0x3f8   : > { %v6714_v5 = vrot.slane %v6713_v42, 4  ;;  %v6695_v18 = vsel %vm12747_vm10, %v6690_v29, %v6694_v56  ;;  %v6685_v13 = vsel %vm12747_vm10, %v6680_v14, %v13646_v4  ;;  %v6769_v3 = vshrl.u32 %v6525_v7, 16 }
 0x3f9   : > { %v6737_v11 = vor.u32 %v6736_v53, %v13672_v36  ;;  %v6784_v37 = vrot.slane %v6782_v59, 4  ;;  %v13695_v4 = vcombine.low %v6685_v13, %v6695_v18  ;;  %v6764_v0 = vshll.u32 %v6524_v48, 16  ;;  %v6535_v53 = vld [vmem:[#allocation3 + $0x94] sm:$0xf]  ;;  %v6534_v18 = vld [vmem:[#allocation3 + $0x90] sm:$0xf] }
 0x3fa   : > { %11073 = vmatmul.mubr.bf16.gmra.mrb[28].mxu1 %v12087_v54  ;;  %v6724_v54 = vshll.u32 %v6519_v2, 16  ;;  %v6529_v2 = vld [vmem:[#allocation3 + $0x7c] sm:$0xf]  ;;  %v6771_v26 = vrot.slane %v6769_v3, 4  ;;  %v6793_v35 = vshrl.u32 %v6528_v60, 16  ;;  %v6796_v19 = vshll.u32 %v6528_v60, 16 }
 0x3fb   : > { %11092 = vmatprep.mubr.bf16.mxu1 %v9850_v25  ;;  %v6748_v25 = vshll.u32 %v6522_v9, 16  ;;  %v6761_v9 = vor.u32 %v6760_v31, %v13677_v8  ;;  %v6802_v30 = vshll.u32 %v6529_v2, 16  ;;  %v6806_v43 = vshrl.u32 %v6529_v2, 16  ;;  %v6530_v31 = vld [vmem:[#allocation3 + $0x80] sm:$0x1] }
 0x3fc   : > { %v6726_v50 = vrot.slane %v6724_v54, 5  ;;  %v6774_v54 = vrot.slane %v6772_v27, 5  ;;  %v6738_v23 = vrot.slane %v6737_v11, 4  ;;  %v6766_v33 = vrot.slane %v6764_v0, 5 }
 0x3fd   : > { %v6750_v22 = vrot.slane %v6748_v25, 5  ;;  %v6762_v39 = vrot.slane %v6761_v9, 4  ;;  %v13709_v42 = vrot.slane %v6802_v30, 5  ;;  %v6808_v62 = vrot.slane %v6806_v43, 4  ;;  %v6538_v30 = vld [vmem:[#allocation3 + $0xa0] sm:$0xf] }
 0x3fe   : > { %v6727_v34 = vor.u32 %v6726_v50, %v6723_v40  ;;  %v6775_v29 = vor.u32 %v6774_v54, %v6771_v26  ;;  %v6795_v40 = vrot.slane %v6793_v35, 4  ;;  %v6798_v50 = vrot.slane %v6796_v19, 5  ;;  %v6533_v26 = vld [vmem:[#allocation3 + $0x8c] sm:$0x1] }
 0x3ff   : > { %v6751_v41 = vor.u32 %v6750_v22, %v6747_v44  ;;  %v6767_v7 = vsel %vm12747_vm10, %v6762_v39, %v6766_v33  ;;  %v6820_v59 = vshll.u32 %v6531_v52, 16  ;;  %v6812_v2 = vshll.u32 %v6530_v31, 16  ;;  %v6541_v54 = vld [vmem:[#allocation3 + $0xac] sm:$0xf]  ;;  %v6537_v39 = vld [vmem:[#allocation3 + $0x9c] sm:$0xf] }
 0x400   : > { %v6728_v16 = vrot.slane %v6727_v34, 4  ;;  %v6850_v34 = vshll.u32 %v6535_v53, 16  ;;  %v6776_v48 = vrot.slane %v6775_v29, 4  ;;  %v6799_v3 = vor.u32 %v6798_v50, %v6795_v40 }
 0x401   : > { %v6752_v25 = vrot.slane %v6751_v41, 4  ;;  %v6841_v41 = vshrl.u32 %v6534_v18, 16  ;;  %v6844_v9 = vshll.u32 %v6534_v18, 16  ;;  %v6822_v60 = vrot.slane %v6820_v59, 5 }
 0x402   : > { %11093 = vmatmul.mubr.bf16.vlgmr.msra.gmra.mrb[0].mxu1 %v13648_v49  ;;  %v6733_v14 = vsel %vm12747_vm10, %v6728_v16, %v13672_v36  ;;  %v12095_v36 = vld [vmem:[%s14170_s3 + $0x130] sm:$0xff]   ;;  %v13738_v16 = vrot.slane %v6850_v34, 5  ;;  %v6814_v19 = vrot.slane %v6812_v2, 5  ;;  %v6878_v33 = vshrl.u32 %v6538_v30, 16 }
 0x403   : > { %11096 = vmatprep.mubr.bf16.mxu1 %v13650_v63  ;;  %11125 = vmatpush3.bf16.msra.mxu1 %v13602_v51  ;;  %v6703_v51 = vor.u32 %v6702_v24, %v6699_v17  ;;  %v6719_v17 = vsel %vm12747_vm10, %v6714_v5, %v6718_v10  ;;  %v6740_v24 = vshll.u32 %v6521_v28, 16  ;;  %v6757_v22 = vsel %vm12747_vm10, %v6752_v25, %v13677_v8 }
 0x404   : > { %11126 = vmatprep.subr.bf16.mxu1 %v12090_v47  ;;  %v6830_v5 = vshrl.u32 %v6532_v6, 16  ;;  %v6809_v28 = vor.u32 %v6808_v62, %v13709_v42  ;;  %v6854_v8 = vshrl.u32 %v6535_v53, 16  ;;  %v13728_v11 = vcombine.low %v6757_v22, %v6767_v7 }
 0x405   : > { %v6704_v61 = vrot.slane %v6703_v51, 4  ;;  %v6742_v45 = vrot.slane %v6740_v24, 5  ;;  %v6788_v51 = vshll.u32 %v6527_v1, 16  ;;  %v6800_v1 = vrot.slane %v6799_v3, 4 }
 0x406   : > { %v6810_v24 = vrot.slane %v6809_v28, 4  ;;  %v6856_v0 = vrot.slane %v6854_v8, 4  ;;  %v6846_v25 = vrot.slane %v6844_v9, 5  ;;  %v6902_v29 = vshrl.u32 %v6541_v54, 16  ;;  %v6544_v28 = vld [vmem:[#allocation3 + $0xb8] sm:$0xf] }
 0x407   : > { %11127 = vmatpush3.bf16.msra.mxu1 %v12090_v47  ;;  %v13690_v47 = vrot.slane %v6778_v32, 5  ;;  %v6709_v58 = vsel %vm12747_vm10, %v6704_v61, %v13657_v38  ;;  %v12094_v38 = vld [vmem:[%s14170_s3 + $0x128] sm:$0xff]   ;;  %v6743_v44 = vsel %vm12747_vm10, %v6738_v23, %v6742_v45  ;;  %v6817_v32 = vshrl.u32 %v6531_v52, 16  ;;  %v6539_v8 = vld [vmem:[#allocation3 + $0xa4] sm:$0x1] }
 0x408   : > { %11128 = vmatprep.subr.bf16.mxu1 %v12091_v15  ;;  %v6826_v61 = vshll.u32 %v6532_v6, 16  ;;  %v6790_v10 = vrot.slane %v6788_v51, 5  ;;  %v13726_v13 = vcombine.low %v6733_v14, %v6743_v44  ;;  %v6843_v23 = vrot.slane %v6841_v41, 4  ;;  %v6540_v51 = vld [vmem:[#allocation3 + $0xa8] sm:$0xf] }
 0x409   : > { %v6785_v56 = vor.u32 %v6784_v37, %v13690_v47  ;;  %v12096_v37 = vld [vmem:[%s14170_s3 + $0x138] sm:$0xff]   ;;  %v6781_v43 = vsel %vm12747_vm10, %v6776_v48, %v13690_v47  ;;  %v6536_v47 = vld [vmem:[#allocation3 + $0x98] sm:$0x1]  ;;  %v6874_v52 = vshll.u32 %v6538_v30, 16  ;;  %v6815_v62 = vsel %vm12747_vm10, %v6810_v24, %v6814_v19 }
 0x40a   : > { %11097 = vmatmul.mubr.bf16.gmra.mrb[4].mxu1 %v13652_v20  ;;  %v6857_v6 = vor.u32 %v6856_v0, %v13738_v16  ;;  %v6898_v14 = vshll.u32 %v6541_v54, 16  ;;  %v6805_v40 = vsel %vm12747_vm10, %v6800_v1, %v13709_v42  ;;  %v6836_v50 = vshll.u32 %v6533_v26, 16 }
 0x40b   : > { %11100 = vmatprep.mubr.bf16.mxu1 %v13679_v21  ;;  %11129 = vmatpush3.bf16.msra.mxu1 %v12091_v15  ;;  %v13706_v15 = vcombine.low %v6709_v58, %v6719_v17  ;;  %v13735_v58 = vrot.slane %v6826_v61, 5  ;;  %v6832_v17 = vrot.slane %v6830_v5, 4  ;;  %v6865_v53 = vshrl.u32 %v6537_v39, 16 }
 0x40c   : > { %11130 = vmatprep.subr.bf16.mxu1 %v12092_v12  ;;  %v6868_v44 = vshll.u32 %v6537_v39, 16  ;;  %v6847_v22 = vor.u32 %v6846_v25, %v6843_v23  ;;  %v6860_v7 = vshll.u32 %v6536_v47, 16  ;;  %v6892_v31 = vshll.u32 %v6540_v51, 16 }
 0x40d   : > { %v6833_v45 = vor.u32 %v6832_v17, %v13735_v58  ;;  %v6876_v59 = vrot.slane %v6874_v52, 5  ;;  %v6880_v61 = vrot.slane %v6878_v33, 4  ;;  %v6858_v18 = vrot.slane %v6857_v6, 4  ;;  %v6542_v17 = vld [vmem:[#allocation3 + $0xb0] sm:$0x1] }
 0x40e   : > { %v6900_v42 = vrot.slane %v6898_v14, 5  ;;  %v6838_v34 = vrot.slane %v6836_v50, 5  ;;  %v6867_v48 = vrot.slane %v6865_v53, 4  ;;  %v6870_v3 = vrot.slane %v6868_v44, 5  ;;  %v6545_v53 = vld [vmem:[#allocation3 + $0xbc] sm:$0x1] }
 0x40f   : > { %11131 = vmatpush3.bf16.msra.mxu1 %v12092_v12  ;;  %v6786_v12 = vrot.slane %v6785_v56, 4  ;;  %v13749_v56 = vld [vmem:[%s14170_s3 + $0x1c0] sm:$0xff]   ;;  %v6862_v2 = vrot.slane %v6860_v7, 5  ;;  %v6894_v9 = vrot.slane %v6892_v31, 5  ;;  %v6922_v24 = vshll.u32 %v6544_v28, 16 }
 0x410   : > { %11132 = vmatprep.subr.bf16.mxu1 %v12093_v57  ;;  %v6926_v0 = vshrl.u32 %v6544_v28, 16  ;;  %v6871_v26 = vor.u32 %v6870_v3, %v6867_v48  ;;  %v6884_v54 = vshll.u32 %v6539_v8, 16  ;;  %v6932_v31 = vshll.u32 %v6545_v53, 16  ;;  %v12099_v48 = vld [vmem:[%s14170_s3 + $0x1d0] sm:$0xff]   ;;  %v12102_v3 = vld [vmem:[%s14170_s3 + $0x1e8] sm:$0xff]  }
 0x411   : > { %v6791_v27 = vsel %vm12747_vm10, %v6786_v12, %v6790_v10  ;;  %v6889_v12 = vshrl.u32 %v6540_v51, 16  ;;  %v6904_v10 = vrot.slane %v6902_v29, 4 }
 0x412   : > { %11101 = vmatmul.mubr.bf16.gmra.mrb[8].mxu1 %v13695_v4  ;;  %v13744_v35 = vcombine.low %v6781_v43, %v6791_v27  ;;  %v6848_v27 = vrot.slane %v6847_v22, 4  ;;  %v6863_v43 = vsel %vm12747_vm10, %v6858_v18, %v6862_v2  ;;  %v6928_v33 = vrot.slane %v6926_v0, 4  ;;  %v12104_v2 = vld [vmem:[%s14170_s3 + $0x1f8] sm:$0xff]  }
 0x413   : > { %11104 = vmatprep.mubr.bf16.mxu1 %v13706_v15  ;;  %11133 = vmatpush3.bf16.msra.mxu1 %v12093_v57  ;;  %v6819_v57 = vrot.slane %v6817_v32, 4  ;;  %v6834_v32 = vrot.slane %v6833_v45, 4  ;;  %v6891_v41 = vrot.slane %v6889_v12, 4  ;;  %v6905_v1 = vor.u32 %v6904_v10, %v6900_v42 }
 0x414   : > { %11134 = vmatprep.subr.bf16.mxu1 %v12094_v38  ;;  %v6853_v39 = vsel %vm12747_vm10, %v6848_v27, %v13738_v16  ;;  %v6908_v45 = vshll.u32 %v6542_v17, 16  ;;  %v6886_v6 = vrot.slane %v6884_v54, 5  ;;  %v6934_v28 = vrot.slane %v6932_v31, 5  ;;  %v12103_v27 = vld [vmem:[%s14170_s3 + $0x1f0] sm:$0xff]  }
 0x415   : > { %v13775_v47 = vcombine.low %v6853_v39, %v6863_v43  ;;  %v6906_v51 = vrot.slane %v6905_v1, 4 }
 0x416   : > { %v6910_v50 = vrot.slane %v6908_v45, 5 }
 0x417   : > { %11135 = vmatpush3.bf16.msra.mxu1 %v12094_v38  ;;  %v6823_v38 = vor.u32 %v6822_v60, %v6819_v57  ;;  %v6839_v57 = vsel %vm12747_vm10, %v6834_v32, %v6838_v34  ;;  %v6881_v60 = vor.u32 %v6880_v61, %v6876_v59 }
 0x418   : > { %11136 = vmatprep.subr.bf16.mxu1 %v12095_v36  ;;  %v6911_v22 = vsel %vm12747_vm10, %v6906_v51, %v6910_v50  ;;  %v12106_v51 = vld [vmem:[%s14170_s3 + $0x88] sm:$0xff]  }
 0x419   : > { %v6824_v5 = vrot.slane %v6823_v38, 4  ;;  %v6895_v38 = vor.u32 %v6894_v9, %v6891_v41  ;;  %v6882_v52 = vrot.slane %v6881_v60, 4  ;;  %v12105_v41 = vld [vmem:[%s14170_s3 + $0x80] sm:$0xff]   ;;  %v6547_v9 = vld [vmem:[#allocation3 + $0xc4] sm:$0xf] }
 0x41a   : > { %11105 = vmatmul.mubr.bf16.gmra.mrb[12].mxu1 %v13726_v13  ;;  %v7336_v60 = vshrl.u32 %v6547_v9, 16 }
 0x41b   : > { %11108 = vmatprep.mubr.bf16.mxu1 %v13728_v11  ;;  %11137 = vmatpush3.bf16.msra.mxu1 %v12095_v36  ;;  %v13759_v36 = vcombine.low %v6805_v40, %v6815_v62  ;;  %v6829_v30 = vsel %vm12747_vm10, %v6824_v5, %v13735_v58  ;;  %v6924_v58 = vrot.slane %v6922_v24, 5  ;;  %v6872_v62 = vrot.slane %v6871_v26, 4  ;;  %v6548_v26 = vld [vmem:[#allocation3 + $0xc8] sm:$0x1] }
 0x41c   : > { %11138 = vmatprep.subr.bf16.mxu1 %v12096_v37  ;;  %v13770_v25 = vcombine.low %v6829_v30, %v6839_v57  ;;  %v6896_v40 = vrot.slane %v6895_v38, 4  ;;  %v6887_v16 = vsel %vm12747_vm10, %v6882_v52, %v6886_v6  ;;  %v7332_v57 = vshll.u32 %v6547_v9, 16  ;;  %v6550_v6 = vld [vmem:[#allocation3 + $0xd0] sm:$0xf]  ;;  %v8027_v9 = vld [vmem:[#allocation3 + $0x14] sm:$0x1] }
 0x41d   : > { %v6929_v44 = vor.u32 %v6928_v33, %v6924_v58  ;;  %v6877_v7 = vsel %vm12747_vm10, %v6872_v62, %v6876_v59  ;;  %v7338_v30 = vrot.slane %v7336_v60, 4  ;;  %v12107_v62 = vld [vmem:[%s14170_s3 + $0x90] sm:$0xff]   ;;  %v8025_v60 = vld [vmem:[#allocation3 + $0xc] sm:$0xe]  ;;  %v8136_v55 = vrot.slane %v8027_v9, 5 }
 0x41e   : > { %v13785_v32 = vcombine.low %v6877_v7, %v6887_v16  ;;  %v6901_v61 = vsel %vm12747_vm10, %v6896_v40, %v6900_v42  ;;  %v12098_v42 = vld [vmem:[%s14170_s3 + $0x1c8] sm:$0xff]   ;;  %v7334_v0 = vrot.slane %v7332_v57, 5  ;;  %v8030_v57 = vld [vmem:[#allocation3 + $0x20] sm:$0x1]  ;;  %v8045_v9 = vld [vmem:[#allocation3 + $0x5c] sm:$0x1] }
 0x41f   : > { %11139 = vmatpush3.bf16.msra.mxu1 %v12096_v37  ;;  %v6543_v37 = vld [vmem:[#allocation3 + $0xb4] sm:$0xf]  ;;  %v13789_v5 = vcombine.low %v6901_v61, %v6911_v22  ;;  %v6930_v18 = vrot.slane %v6929_v44, 4  ;;  %v8023_v22 = vld [vmem:[#allocation3 + $0x4] sm:$0xf] }
 0x420   : > { %11172 = vmatprep.subr.bf16.mxu1 %v13749_v56  ;;  %v6913_v19 = vshrl.u32 %v6543_v37, 16  ;;  %v6916_v23 = vshll.u32 %v6543_v37, 16  ;;  %v6546_v37 = vld [vmem:[#allocation3 + $0xc0] sm:$0xf]  ;;  %v7339_v54 = vor.u32 %v7338_v30, %v7334_v0  ;;  %v6551_v44 = vld [vmem:[#allocation3 + $0xd4] sm:$0x1] }
 0x421   : > { %v6935_v34 = vsel %vm12747_vm10, %v6930_v18, %v6934_v28  ;;  %v7323_v17 = vshrl.u32 %v6546_v37, 16  ;;  %v7326_v24 = vshll.u32 %v6546_v37, 16  ;;  %v7692_v31 = vshll.u32 %v6551_v44, 16  ;;  %v8022_v61 = vld [vmem:[#allocation3] sm:$0xe] }
 0x422   : > { %11109 = vmatmul.mubr.bf16.gmra.mrb[16].mxu1 %v13744_v35  ;;  %v6915_v14 = vrot.slane %v6913_v19, 4  ;;  %v6918_v29 = vrot.slane %v6916_v23, 5  ;;  %v7342_v23 = vshll.u32 %v6548_v26, 16  ;;  %v7340_v39 = vrot.slane %v7339_v54, 4  ;;  %v8035_v30 = vld [vmem:[#allocation3 + $0x34] sm:$0xf] }
 0x423   : > { %11112 = vmatprep.mubr.bf16.mxu1 %v13759_v36  ;;  %v7325_v43 = vrot.slane %v7323_v17, 4  ;;  %v7328_v1 = vrot.slane %v7326_v24, 5  ;;  %v7694_v28 = vrot.slane %v7692_v31, 5  ;;  %v8032_v24 = vld [vmem:[#allocation3 + $0x28] sm:$0xf] }
 0x424   : > { %v6919_v12 = vor.u32 %v6918_v29, %v6915_v14  ;;  %v7344_v45 = vrot.slane %v7342_v23, 5  ;;  %v7682_v29 = vshll.u32 %v6550_v6, 16  ;;  %v8147_v54 = vrot.slane %v8032_v24, 5  ;;  %v8043_v24 = vld [vmem:[#allocation3 + $0x54] sm:$0xe] }
 0x425   : > { %v7329_v19 = vor.u32 %v7328_v1, %v7325_v43  ;;  %v8143_v43 = vrot.slane %v8030_v57, 5  ;;  %v9925_v1 = vrot.slane %v8025_v60, 9 }
 0x426   : > { %v6920_v10 = vrot.slane %v6919_v12, 4  ;;  %v7345_v52 = vsel %vm12747_vm10, %v7340_v39, %v7344_v45  ;;  %v7684_v53 = vrot.slane %v7682_v29, 5  ;;  %v8154_v39 = vrot.slane %v8035_v30, 5 }
 0x427   : > { %v7330_v38 = vrot.slane %v7329_v19, 4  ;;  %v8178_v30 = vrot.slane %v8045_v9, 5 }
 0x428   : > { %v6925_v59 = vsel %vm12747_vm10, %v6920_v10, %v6924_v58 }
 0x429   : > { %v13797_v8 = vcombine.low %v6925_v59, %v6935_v34  ;;  %v7335_v58 = vsel %vm12747_vm10, %v7330_v38, %v7334_v0  ;;  %v9924_v34 = vrot.slane %v8022_v61, 9  ;;  %v8028_v0 = vld [vmem:[#allocation3 + $0x18] sm:$0xe]  ;;  %v8042_v61 = vld [vmem:[#allocation3 + $0x50] sm:$0x1] }
 0x42a   : > { %11113 = vmatmul.mubr.bf16.gmra.mrb[20].mxu1 %v13770_v25  ;;  %v13844_v33 = vcombine.low %v7335_v58, %v7345_v52  ;;  %v9926_v19 = vrot.slane %v8028_v0, 9  ;;  %v8033_v58 = vld [vmem:[#allocation3 + $0x2c] sm:$0x1]  ;;  %v8050_v0 = vld [vmem:[#allocation3 + $0x70] sm:$0xf] }
 0x42b   : > { %11116 = vmatprep.mubr.bf16.mxu1 %v13775_v47 }
 0x432   : > { %11117 = vmatmul.mubr.bf16.gmra.mrb[24].mxu1 %v13785_v32 }
 0x433   : > { %11120 = vmatprep.mubr.bf16.mxu1 %v13789_v5 }
 0x43a   : > { %11121 = vmatmul.mubr.bf16.gmra.mrb[28].mxu1 %v13797_v8 }
 0x43b   : > { %11140 = vmatprep.mubr.bf16.mxu1 %v13648_v49  ;;  %v12100_v49 = vld [vmem:[%s14170_s3 + $0x1d8] sm:$0xff]  }
 0x442   : > { %11141 = vmatmul.mubr.bf16.vlgmr.msra.gmra.mrb[0].mxu1 %v13650_v63 }
 0x443   : > { %11144 = vmatprep.mubr.bf16.mxu1 %v13652_v20  ;;  %11173 = vmatpush3.bf16.msra.mxu1 %v13749_v56  ;;  %v12101_v56 = vld [vmem:[%s14170_s3 + $0x1e0] sm:$0xff]  }
 0x444   : > { %11174 = vmatprep.subr.bf16.mxu1 %v12098_v42 }
 0x447   : > { %11175 = vmatpush3.bf16.msra.mxu1 %v12098_v42 }
 0x448   : > { %11176 = vmatprep.subr.bf16.mxu1 %v12099_v48 }
 0x44a   : > { %11145 = vmatmul.mubr.bf16.gmra.mrb[4].mxu1 %v13679_v21 }
 0x44b   : > { %11148 = vmatprep.mubr.bf16.mxu1 %v13695_v4  ;;  %11177 = vmatpush3.bf16.msra.mxu1 %v12099_v48  ;;  %v8026_v48 = vld [vmem:[#allocation3 + $0x10] sm:$0xf] }
 0x44c   : > { %11178 = vmatprep.subr.bf16.mxu1 %v12100_v49 }
 0x44f   : > { %11179 = vmatpush3.bf16.msra.mxu1 %v12100_v49  ;;  %v8029_v49 = vld [vmem:[#allocation3 + $0x1c] sm:$0xf] }
 0x450   : > { %11180 = vmatprep.subr.bf16.mxu1 %v12101_v56 }
 0x452   : > { %11149 = vmatmul.mubr.bf16.gmra.mrb[8].mxu1 %v13706_v15 }
 0x453   : > { %11152 = vmatprep.mubr.bf16.mxu1 %v13726_v13  ;;  %11181 = vmatpush3.bf16.msra.mxu1 %v12101_v56 }
 0x454   : > { %11182 = vmatprep.subr.bf16.mxu1 %v12102_v3 }
 0x457   : > { %11183 = vmatpush3.bf16.msra.mxu1 %v12102_v3 }
 0x458   : > { %11184 = vmatprep.subr.bf16.mxu1 %v12103_v27 }
 0x45a   : > { %11153 = vmatmul.mubr.bf16.gmra.mrb[12].mxu1 %v13728_v11 }
 0x45b   : > { %11156 = vmatprep.mubr.bf16.mxu1 %v13744_v35  ;;  %11185 = vmatpush3.bf16.msra.mxu1 %v12103_v27  ;;  %v8133_v27 = vrot.slane %v8026_v48, 5  ;;  %v12117_v48 = vld [vmem:[%s14170_s3 + $0x160] sm:$0xff]  }
 0x45c   : > { %11186 = vmatprep.subr.bf16.mxu1 %v12104_v2 }
 0x45d   : > { %v8135_v37 = vrot.slane %v8133_v27, 4  ;;  %v8134_v38 = vsel %vm13040_vm13, %v9925_v1, %v8133_v27  ;;  %v8053_v1 = vld [vmem:[#allocation3 + $0x7c] sm:$0xf] }
 0x45f   : > { %11187 = vmatpush3.bf16.msra.mxu1 %v12104_v2  ;;  %v8137_v26 = vsel %vm13040_vm13, %v8135_v37, %v8136_v55  ;;  %v12118_v37 = vld [vmem:[%s14170_s3 + $0x168] sm:$0xff]  }
 0x460   : > { %11220 = vmatprep.subr.bf16.mxu1 %v12105_v41  ;;  %v13903_v45 = vcombine.low %v8134_v38, %v8137_v26 }
 0x462   : > { %11157 = vmatmul.mubr.bf16.gmra.mrb[16].mxu1 %v13759_v36 }
 0x463   : > { %11160 = vmatprep.mubr.bf16.mxu1 %v13770_v25 }
 0x46a   : > { %11161 = vmatmul.mubr.bf16.gmra.mrb[20].mxu1 %v13775_v47 }
 0x46b   : > { %11164 = vmatprep.mubr.bf16.mxu1 %v13785_v32 }
 0x472   : > { %11165 = vmatmul.mubr.bf16.gmra.mrb[24].mxu1 %v13789_v5 }
 0x473   : > { %11168 = vmatprep.mubr.bf16.mxu1 %v13797_v8 }
 0x47a   : > { %11169 = vmatmul.mubr.bf16.gmra.mrb[28].mxu1 %v13844_v33 }
 0x47b   : > { %11188 = vmatprep.mubr.bf16.mxu1 %v13650_v63  ;;  %v12108_v63 = vld [vmem:[%s14170_s3 + $0x98] sm:$0xff]  }
 0x482   : > { %11189 = vmatmul.mubr.bf16.vlgmr.msra.gmra.mrb[0].mxu1 %v13652_v20  ;;  %v12109_v20 = vld [vmem:[%s14170_s3 + $0xa0] sm:$0xff]  }
 0x483   : > { %11192 = vmatprep.mubr.bf16.mxu1 %v13679_v21  ;;  %11221 = vmatpush3.bf16.msra.mxu1 %v12105_v41  ;;  %v12110_v21 = vld [vmem:[%s14170_s3 + $0xa8] sm:$0xff]   ;;  %v8140_v41 = vrot.slane %v8029_v49, 5 }
 0x484   : > { %11222 = vmatprep.subr.bf16.mxu1 %v12106_v51 }
 0x485   : > { %v8142_v17 = vrot.slane %v8140_v41, 4  ;;  %v8141_v52 = vsel %vm13040_vm13, %v9926_v19, %v8140_v41  ;;  %v9931_v19 = vrot.slane %v8043_v24, 9 }
 0x487   : > { %11223 = vmatpush3.bf16.msra.mxu1 %v12106_v51  ;;  %v8144_v23 = vsel %vm13040_vm13, %v8142_v17, %v8143_v43  ;;  %v8048_v17 = vld [vmem:[#allocation3 + $0x68] sm:$0x1]  ;;  %v8046_v43 = vld [vmem:[#allocation3 + $0x60] sm:$0xe] }
 0x488   : > { %11224 = vmatprep.subr.bf16.mxu1 %v12107_v62  ;;  %v13910_v51 = vcombine.low %v8141_v52, %v8144_v23  ;;  %v8185_v26 = vrot.slane %v8048_v17, 5  ;;  %v9932_v38 = vrot.slane %v8046_v43, 9 }
 0x48a   : > { %11193 = vmatmul.mubr.bf16.gmra.mrb[4].mxu1 %v13695_v4  ;;  %v12111_v4 = vld [vmem:[%s14170_s3 + $0xb0] sm:$0xff]  }
 0x48b   : > { %11196 = vmatprep.mubr.bf16.mxu1 %v13706_v15  ;;  %11225 = vmatpush3.bf16.msra.mxu1 %v12107_v62  ;;  %v12112_v15 = vld [vmem:[%s14170_s3 + $0xb8] sm:$0xff]   ;;  %v8149_v62 = vrot.slane %v8147_v54, 4 }
 0x48c   : > { %11226 = vmatprep.subr.bf16.mxu1 %v12108_v63 }
 0x48f   : > { %11227 = vmatpush3.bf16.msra.mxu1 %v12108_v63  ;;  %v8036_v63 = vld [vmem:[#allocation3 + $0x38] sm:$0x1] }
 0x490   : > { %11228 = vmatprep.subr.bf16.mxu1 %v12109_v20 }
 0x492   : > { %11197 = vmatmul.mubr.bf16.gmra.mrb[8].mxu1 %v13726_v13  ;;  %v13880_v13 = vld [vmem:[%s14170_s3 + $0x140] sm:$0xff]  }
 0x493   : > { %11200 = vmatprep.mubr.bf16.mxu1 %v13728_v11  ;;  %11229 = vmatpush3.bf16.msra.mxu1 %v12109_v20  ;;  %v6549_v11 = vld [vmem:[#allocation3 + $0xcc] sm:$0xf]  ;;  %v8031_v20 = vld [vmem:[#allocation3 + $0x24] sm:$0xe] }
 0x494   : > { %11230 = vmatprep.subr.bf16.mxu1 %v12110_v21  ;;  %v7673_v14 = vshrl.u32 %v6549_v11, 16  ;;  %v9927_v29 = vrot.slane %v8031_v20, 9  ;;  %v8051_v20 = vld [vmem:[#allocation3 + $0x74] sm:$0x1] }
 0x496   : > { %v7675_v40 = vrot.slane %v7673_v14, 4  ;;  %v8157_v14 = vrot.slane %v8036_v63, 5 }
 0x497   : > { %11231 = vmatpush3.bf16.msra.mxu1 %v12110_v21  ;;  %v8156_v21 = vrot.slane %v8154_v39, 4 }
 0x498   : > { %11232 = vmatprep.subr.bf16.mxu1 %v12111_v4 }
 0x49a   : > { %11201 = vmatmul.mubr.bf16.gmra.mrb[12].mxu1 %v13744_v35  ;;  %v7676_v35 = vshll.u32 %v6549_v11, 16  ;;  %v8034_v11 = vld [vmem:[#allocation3 + $0x30] sm:$0xe] }
 0x49b   : > { %11204 = vmatprep.mubr.bf16.mxu1 %v13759_v36  ;;  %11233 = vmatpush3.bf16.msra.mxu1 %v12111_v4  ;;  %v7686_v36 = vshrl.u32 %v6550_v6, 16  ;;  %v8038_v4 = vld [vmem:[#allocation3 + $0x40] sm:$0xf]  ;;  %v8041_v6 = vld [vmem:[#allocation3 + $0x4c] sm:$0xf] }
 0x49c   : > { %11234 = vmatprep.subr.bf16.mxu1 %v12112_v15  ;;  %v7678_v50 = vrot.slane %v7676_v35, 5  ;;  %v12115_v35 = vld [vmem:[%s14170_s3 + $0x150] sm:$0xff]  }
 0x49d   : > { %v7688_v16 = vrot.slane %v7686_v36, 4 }
 0x49e   : > { %v7679_v7 = vor.u32 %v7678_v50, %v7675_v40  ;;  %v8161_v40 = vrot.slane %v8038_v4, 5  ;;  %v9928_v50 = vrot.slane %v8034_v11, 9  ;;  %v8054_v11 = vld [vmem:[#allocation3 + $0x80] sm:$0x1] }
 0x49f   : > { %11235 = vmatpush3.bf16.msra.mxu1 %v12112_v15  ;;  %v7689_v12 = vor.u32 %v7688_v16, %v7684_v53  ;;  %v8150_v15 = vrot.slane %v8033_v58, 5  ;;  %v8168_v16 = vrot.slane %v8041_v6, 5  ;;  %v8196_v58 = vrot.slane %v8053_v1, 5  ;;  %v8049_v6 = vld [vmem:[#allocation3 + $0x6c] sm:$0xe] }
 0x4a0   : > { %11268 = vmatprep.subr.bf16.mxu1 %v13880_v13  ;;  %v7680_v18 = vrot.slane %v7679_v7, 4  ;;  %v8039_v7 = vld [vmem:[#allocation3 + $0x44] sm:$0x1]  ;;  %v8066_v1 = vld [vmem:[#allocation3 + $0xb0] sm:$0x1] }
 0x4a1   : > { %v7690_v10 = vrot.slane %v7689_v12, 4  ;;  %v8151_v36 = vsel %vm13040_vm13, %v8149_v62, %v8150_v15  ;;  %v12116_v12 = vld [vmem:[%s14170_s3 + $0x158] sm:$0xff]  }
 0x4a2   : > { %11205 = vmatmul.mubr.bf16.gmra.mrb[16].mxu1 %v13770_v25  ;;  %v8126_v25 = vrot.slane %v8023_v22, 5  ;;  %v8155_v22 = vsel %vm13040_vm13, %v9928_v50, %v8154_v39  ;;  %v8189_v39 = vrot.slane %v8050_v0, 5  ;;  %v8199_v50 = vrot.slane %v8054_v11, 5  ;;  %v8063_v0 = vld [vmem:[#allocation3 + $0xa4] sm:$0x1] }
 0x4a3   : > { %11208 = vmatprep.mubr.bf16.mxu1 %v13775_v47  ;;  %v8024_v47 = vld [vmem:[#allocation3 + $0x8] sm:$0x1] }
 0x4a4   : > { %v8128_v59 = vrot.slane %v8126_v25, 4  ;;  %v8129_v42 = vrot.slane %v8024_v47, 5  ;;  %v8127_v56 = vsel %vm13040_vm13, %v9924_v34, %v8126_v25  ;;  %v8163_v25 = vrot.slane %v8161_v40, 4  ;;  %v8037_v47 = vld [vmem:[#allocation3 + $0x3c] sm:$0xe] }
 0x4a5   : > { %v8040_v34 = vld [vmem:[#allocation3 + $0x48] sm:$0xe]  ;;  %v8191_v15 = vrot.slane %v8189_v39, 4 }
 0x4a6   : > { %v8130_v3 = vsel %vm13040_vm13, %v8128_v59, %v8129_v42  ;;  %v8047_v59 = vld [vmem:[#allocation3 + $0x64] sm:$0xf]  ;;  %v8171_v42 = vrot.slane %v8042_v61, 5 }
 0x4a7   : > { %v8182_v27 = vrot.slane %v8047_v59, 5  ;;  %v8060_v59 = vld [vmem:[#allocation3 + $0x98] sm:$0x1] }
 0x4a9   : > { %v8184_v55 = vrot.slane %v8182_v27, 4  ;;  %v8183_v63 = vsel %vm13040_vm13, %v9932_v38, %v8182_v27  ;;  %v8227_v38 = vrot.slane %v8066_v1, 5 }
 0x4aa   : > { %11209 = vmatmul.mubr.bf16.gmra.mrb[20].mxu1 %v13785_v32  ;;  %v7685_v32 = vsel %vm12747_vm10, %v7680_v18, %v7684_v53  ;;  %v8158_v53 = vsel %vm13040_vm13, %v8156_v21, %v8157_v14  ;;  %v8170_v18 = vrot.slane %v8168_v16, 4  ;;  %v12120_v21 = vld [vmem:[%s14170_s3 + $0x178] sm:$0xff]   ;;  %v8198_v14 = vrot.slane %v8196_v58, 4 }
 0x4ab   : > { %11212 = vmatprep.mubr.bf16.mxu1 %v13789_v5  ;;  %v7695_v5 = vsel %vm12747_vm10, %v7690_v10, %v7694_v28  ;;  %v13931_v31 = vcombine.low %v8155_v22, %v8158_v53  ;;  %v8044_v10 = vld [vmem:[#allocation3 + $0x58] sm:$0xf]  ;;  %v8164_v28 = vrot.slane %v8039_v7, 5  ;;  %v8186_v52 = vsel %vm13040_vm13, %v8184_v55, %v8185_v26  ;;  %v13978_v53 = vld [vmem:[%s14170_s3 + $0x200] sm:$0xff]   ;;  %v8061_v26 = vld [vmem:[#allocation3 + $0x9c] sm:$0xe] }
 0x4ac   : > { %v9915_v2 = vcombine.low %v7685_v32, %v7695_v5  ;;  %v9929_v32 = vrot.slane %v8037_v47, 9  ;;  %v8175_v49 = vrot.slane %v8044_v10, 5  ;;  %v13971_v4 = vcombine.low %v8183_v63, %v8186_v52  ;;  %v8057_v10 = vld [vmem:[#allocation3 + $0x8c] sm:$0x1] }
 0x4ad   : > { %v8165_v5 = vsel %vm13040_vm13, %v8163_v25, %v8164_v28  ;;  %v9937_v52 = vrot.slane %v8061_v26, 9 }
 0x4ae   : > { %v8177_v60 = vrot.slane %v8175_v49, 4 }
 0x4b0   : > { %v8179_v23 = vsel %vm13040_vm13, %v8177_v60, %v8178_v30 }
 0x4b2   : > { %11213 = vmatmul.mubr.bf16.gmra.mrb[24].mxu1 %v13797_v8  ;;  %v9956_v8 = vcombine.low %v8127_v56, %v8130_v3  ;;  %v9930_v56 = vrot.slane %v8040_v34, 9  ;;  %v8172_v3 = vsel %vm13040_vm13, %v8170_v18, %v8171_v42  ;;  %v8055_v42 = vld [vmem:[#allocation3 + $0x84] sm:$0xe] }
 0x4b3   : > { %11216 = vmatprep.mubr.bf16.mxu1 %v13844_v33  ;;  %v12114_v33 = vld [vmem:[%s14170_s3 + $0x148] sm:$0xff]   ;;  %v9935_v27 = vrot.slane %v8055_v42, 9  ;;  %v8070_v42 = vld [vmem:[#allocation3 + $0xc0] sm:$0xe] }
 0x4ba   : > { %11217 = vmatmul.mubr.bf16.gmra.mrb[28].mxu1 %v9915_v2  ;;  %v8162_v2 = vsel %vm13040_vm13, %v9929_v32, %v8161_v40  ;;  %v8059_v40 = vld [vmem:[#allocation3 + $0x94] sm:$0xf]  ;;  %v8062_v32 = vld [vmem:[#allocation3 + $0xa0] sm:$0xf] }
 0x4bb   : > { %11236 = vmatprep.mubr.bf16.mxu1 %v9956_v8  ;;  %v13944_v41 = vcombine.low %v8162_v2, %v8165_v5  ;;  %v8169_v8 = vsel %vm13040_vm13, %v9930_v56, %v8168_v16  ;;  %v9933_v16 = vrot.slane %v8049_v6, 9  ;;  %v8210_v25 = vrot.slane %v8059_v40, 5  ;;  %v8065_v56 = vld [vmem:[#allocation3 + $0xac] sm:$0xf]  ;;  %v8069_v6 = vld [vmem:[#allocation3 + $0xbc] sm:$0x1] }
 0x4bc   : > { %v13951_v57 = vcombine.low %v8169_v8, %v8172_v3  ;;  %v8206_v5 = vrot.slane %v8057_v10, 5  ;;  %v8213_v3 = vrot.slane %v8060_v59, 5  ;;  %v8217_v8 = vrot.slane %v8062_v32, 5 }
 0x4bd   : > { %v8190_v61 = vsel %vm13040_vm13, %v9933_v16, %v8189_v39  ;;  %v8224_v60 = vrot.slane %v8065_v56, 5  ;;  %v8064_v39 = vld [vmem:[#allocation3 + $0xa8] sm:$0xe]  ;;  %v9980_v32 = vrot.slane %v8070_v42, 9 }
 0x4be   : > { %v8219_v43 = vrot.slane %v8217_v8, 4  ;;  %v9938_v63 = vrot.slane %v8064_v39, 9 }
 0x4c0   : > { %v8225_v11 = vsel %vm13040_vm13, %v9938_v63, %v8224_v60 }
 0x4c2   : > { %11237 = vmatmul.mubr.bf16.vlgmr.msra.gmra.mrb[0].mxu1 %v13903_v45 }
 0x4c3   : > { %11240 = vmatprep.mubr.bf16.mxu1 %v13910_v51  ;;  %11269 = vmatpush3.bf16.msra.mxu1 %v13880_v13  ;;  %v8148_v13 = vsel %vm13040_vm13, %v9927_v29, %v8147_v54  ;;  %v12119_v54 = vld [vmem:[%s14170_s3 + $0x170] sm:$0xff]   ;;  %v8192_v29 = vrot.slane %v8051_v20, 5 }
 0x4c4   : > { %11270 = vmatprep.subr.bf16.mxu1 %v12114_v33  ;;  %v13924_v44 = vcombine.low %v8148_v13, %v8151_v36  ;;  %v8052_v36 = vld [vmem:[#allocation3 + $0x78] sm:$0xe] }
 0x4c5   : > { %v8193_v13 = vsel %vm13040_vm13, %v8191_v15, %v8192_v29  ;;  %v9934_v7 = vrot.slane %v8052_v36, 9  ;;  %v8067_v29 = vld [vmem:[#allocation3 + $0xb4] sm:$0xe]  ;;  %v8234_v36 = vrot.slane %v8069_v6, 5 }
 0x4c6   : > { %v13986_v47 = vcombine.low %v8190_v61, %v8193_v13  ;;  %v9939_v40 = vrot.slane %v8067_v29, 9  ;;  %v12128_v61 = vld [vmem:[%s14170_s3 + $0x238] sm:$0xff]  }
 0x4c7   : > { %11271 = vmatpush3.bf16.msra.mxu1 %v12114_v33  ;;  %v8176_v33 = vsel %vm13040_vm13, %v9931_v19, %v8175_v49  ;;  %v8197_v18 = vsel %vm13040_vm13, %v9934_v7, %v8196_v58  ;;  %v8058_v49 = vld [vmem:[#allocation3 + $0x90] sm:$0xe]  ;;  %v8068_v19 = vld [vmem:[#allocation3 + $0xb8] sm:$0xf] }
 0x4c8   : > { %11272 = vmatprep.subr.bf16.mxu1 %v12115_v35  ;;  %v13964_v62 = vcombine.low %v8176_v33, %v8179_v23  ;;  %v9936_v9 = vrot.slane %v8058_v49, 9  ;;  %v8220_v23 = vrot.slane %v8063_v0, 5  ;;  %v8231_v33 = vrot.slane %v8068_v19, 5  ;;  %v12123_v7 = vld [vmem:[%s14170_s3 + $0x210] sm:$0xff]  }
 0x4ca   : > { %11241 = vmatmul.mubr.bf16.gmra.mrb[4].mxu1 %v13924_v44  ;;  %v8211_v55 = vsel %vm13040_vm13, %v9936_v9, %v8210_v25  ;;  %v8221_v58 = vsel %vm13040_vm13, %v8219_v43, %v8220_v23  ;;  %v8232_v16 = vsel %vm13040_vm13, %v9939_v40, %v8231_v33 }
 0x4cb   : > { %11244 = vmatprep.mubr.bf16.mxu1 %v13931_v31  ;;  %11273 = vmatpush3.bf16.msra.mxu1 %v12115_v35  ;;  %v8056_v35 = vld [vmem:[#allocation3 + $0x88] sm:$0xf] }
 0x4cc   : > { %11274 = vmatprep.subr.bf16.mxu1 %v12116_v12  ;;  %v8203_v22 = vrot.slane %v8056_v35, 5  ;;  %v8233_v35 = vrot.slane %v8231_v33, 4 }
 0x4ce   : > { %v8205_v34 = vrot.slane %v8203_v22, 4  ;;  %v8204_v17 = vsel %vm13040_vm13, %v9935_v27, %v8203_v22  ;;  %v12122_v22 = vld [vmem:[%s14170_s3 + $0x208] sm:$0xff]   ;;  %v14092_v27 = vld [vmem:[%s14171_s4] ss:$0 sm:$0xff] }
 0x4cf   : > { %11275 = vmatpush3.bf16.msra.mxu1 %v12116_v12  ;;  %v8200_v12 = vsel %vm13040_vm13, %v8198_v14, %v8199_v50  ;;  %v8235_v50 = vsel %vm13040_vm13, %v8233_v35, %v8234_v36 }
 0x4d0   : > { %11276 = vmatprep.subr.bf16.mxu1 %v12117_v48  ;;  %v13991_v28 = vcombine.low %v8197_v18, %v8200_v12  ;;  %v8207_v2 = vsel %vm13040_vm13, %v8205_v34, %v8206_v5  ;;  %v14027_v13 = vcombine.low %v8232_v16, %v8235_v50  ;;  %v12126_v12 = vld [vmem:[%s14170_s3 + $0x228] sm:$0xff]   ;;  %v8071_v18 = vld [vmem:[#allocation3 + $0xc4] sm:$0xf]  ;;  %v8072_v34 = vld [vmem:[#allocation3 + $0xc8] sm:$0x1] }
 0x4d1   : > { %v14001_v24 = vcombine.low %v8204_v17, %v8207_v2  ;;  %v8627_v10 = vrot.slane %v8071_v18, 5 }
 0x4d2   : > { %11245 = vmatmul.mubr.bf16.gmra.mrb[8].mxu1 %v13944_v41 }
 0x4d3   : > { %11248 = vmatprep.mubr.bf16.mxu1 %v13951_v57  ;;  %11277 = vmatpush3.bf16.msra.mxu1 %v12117_v48  ;;  %v8212_v48 = vrot.slane %v8210_v25, 4  ;;  %v12127_v25 = vld [vmem:[%s14170_s3 + $0x230] sm:$0xff]   ;;  %v8629_v59 = vrot.slane %v8627_v10, 4  ;;  %v8628_v49 = vsel %vm13040_vm13, %v9980_v32, %v8627_v10 }
 0x4d4   : > { %11278 = vmatprep.subr.bf16.mxu1 %v12118_v37 }
 0x4d7   : > { %11279 = vmatpush3.bf16.msra.mxu1 %v12118_v37  ;;  %v8214_v37 = vsel %vm13040_vm13, %v8212_v48, %v8213_v3  ;;  %v8630_v48 = vrot.slane %v8072_v34, 5 }
 0x4d8   : > { %11280 = vmatprep.subr.bf16.mxu1 %v12119_v54  ;;  %v14005_v30 = vcombine.low %v8211_v55, %v8214_v37 }
 0x4d9   : > { %v8631_v5 = vsel %vm13040_vm13, %v8629_v59, %v8630_v48 }
 0x4da   : > { %11249 = vmatmul.mubr.bf16.gmra.mrb[12].mxu1 %v13964_v62  ;;  %v9997_v56 = vcombine.low %v8628_v49, %v8631_v5 }
 0x4db   : > { %11252 = vmatprep.mubr.bf16.mxu1 %v13971_v4  ;;  %11281 = vmatpush3.bf16.msra.mxu1 %v12119_v54  ;;  %v8226_v54 = vrot.slane %v8224_v60, 4 }
 0x4dc   : > { %11282 = vmatprep.subr.bf16.mxu1 %v12120_v21 }
 0x4dd   : > { %v8228_v20 = vsel %vm13040_vm13, %v8226_v54, %v8227_v38 }
 0x4de   : > { %v14019_v14 = vcombine.low %v8225_v11, %v8228_v20 }
 0x4df   : > { %11283 = vmatpush3.bf16.msra.mxu1 %v12120_v21  ;;  %v8218_v21 = vsel %vm13040_vm13, %v9937_v52, %v8217_v8 }
 0x4e0   : > { %11316 = vmatprep.subr.bf16.mxu1 %v13978_v53  ;;  %v14015_v15 = vcombine.low %v8218_v21, %v8221_v58 }
 0x4e2   : > { %11253 = vmatmul.mubr.bf16.gmra.mrb[16].mxu1 %v13986_v47 }
 0x4e3   : > { %11256 = vmatprep.mubr.bf16.mxu1 %v13991_v28 }
 0x4ea   : > { %11257 = vmatmul.mubr.bf16.gmra.mrb[20].mxu1 %v14001_v24 }
 0x4eb   : > { %11260 = vmatprep.mubr.bf16.mxu1 %v14005_v30 }
 0x4f2   : > { %11261 = vmatmul.mubr.bf16.gmra.mrb[24].mxu1 %v14015_v15 }
 0x4f3   : > { %11264 = vmatprep.mubr.bf16.mxu1 %v14019_v14 }
 0x4fa   : > { %11265 = vmatmul.mubr.bf16.gmra.mrb[28].mxu1 %v14027_v13 }
 0x4fb   : > { %11284 = vmatprep.mubr.bf16.mxu1 %v13903_v45  ;;  %v12124_v45 = vld [vmem:[%s14170_s3 + $0x218] sm:$0xff]  }
 0x502   : > { %11285 = vmatmul.mubr.bf16.vlgmr.msra.gmra.mrb[0].mxu1 %v13910_v51 }
 0x503   : > { %11288 = vmatprep.mubr.bf16.mxu1 %v13924_v44  ;;  %11317 = vmatpush3.bf16.msra.mxu1 %v13978_v53  ;;  %v12125_v53 = vld [vmem:[%s14170_s3 + $0x220] sm:$0xff]  }
 0x504   : > { %11318 = vmatprep.subr.bf16.mxu1 %v12122_v22 }
 0x507   : > { %11319 = vmatpush3.bf16.msra.mxu1 %v12122_v22 }
 0x508   : > { %11320 = vmatprep.subr.bf16.mxu1 %v12123_v7 }
 0x50a   : > { %11289 = vmatmul.mubr.bf16.gmra.mrb[4].mxu1 %v13931_v31 }
 0x50b   : > { %11292 = vmatprep.mubr.bf16.mxu1 %v13944_v41  ;;  %11321 = vmatpush3.bf16.msra.mxu1 %v12123_v7 }
 0x50c   : > { %11322 = vmatprep.subr.bf16.mxu1 %v12124_v45 }
 0x50f   : > { %11323 = vmatpush3.bf16.msra.mxu1 %v12124_v45 }
 0x510   : > { %11324 = vmatprep.subr.bf16.mxu1 %v12125_v53 }
 0x512   : > { %11293 = vmatmul.mubr.bf16.gmra.mrb[8].mxu1 %v13951_v57 }
 0x513   : > { %11296 = vmatprep.mubr.bf16.mxu1 %v13964_v62  ;;  %11325 = vmatpush3.bf16.msra.mxu1 %v12125_v53 }
 0x514   : > { %11326 = vmatprep.subr.bf16.mxu1 %v12126_v12 }
 0x517   : > { %11327 = vmatpush3.bf16.msra.mxu1 %v12126_v12 }
 0x518   : > { %11328 = vmatprep.subr.bf16.mxu1 %v12127_v25 }
 0x51a   : > { %11297 = vmatmul.mubr.bf16.gmra.mrb[12].mxu1 %v13971_v4 }
 0x51b   : > { %11300 = vmatprep.mubr.bf16.mxu1 %v13986_v47  ;;  %11329 = vmatpush3.bf16.msra.mxu1 %v12127_v25 }
 0x51c   : > { %11330 = vmatprep.subr.bf16.mxu1 %v12128_v61 }
 0x51f   : > { %11331 = vmatpush3.bf16.msra.mxu1 %v12128_v61 }
 0x522   : > { %11301 = vmatmul.mubr.bf16.gmra.mrb[16].mxu1 %v13991_v28 }
 0x523   : > { %11304 = vmatprep.mubr.bf16.mxu1 %v14001_v24 }
 0x52a   : > { %11305 = vmatmul.mubr.bf16.gmra.mrb[20].mxu1 %v14005_v30 }
 0x52b   : > { %11308 = vmatprep.mubr.bf16.mxu1 %v14015_v15 }
 0x532   : > { %11309 = vmatmul.mubr.bf16.gmra.mrb[24].mxu1 %v14019_v14 }
 0x533   : > { %11312 = vmatprep.mubr.bf16.mxu1 %v14027_v13 }
 0x53a   : > { %11313 = vmatmul.mubr.bf16.gmra.mrb[28].mxu1 %v9997_v56 }
 0x53b   : > { %11332 = vmatprep.mubr.bf16.mxu1 %v13910_v51  ;;  %v8074_v51 = vld [vmem:[#allocation3 + $0xd0] sm:$0xf] }
 0x542   : > { %11333 = vmatmul.mubr.bf16.vlgmr.msra.gmra.mrb[0].mxu1 %v13924_v44  ;;  %v8963_v44 = vrot.slane %v8074_v51, 5 }
 0x543   : > { %11336 = vmatprep.mubr.bf16.mxu1 %v13931_v31  ;;  %v8073_v31 = vld [vmem:[#allocation3 + $0xcc] sm:$0xe] }
 0x54a   : > { %11337 = vmatmul.mubr.bf16.gmra.mrb[4].mxu1 %v13944_v41  ;;  %v8075_v41 = vld [vmem:[#allocation3 + $0xd4] sm:$0x1] }
 0x54b   : > { %11340 = vmatprep.mubr.bf16.mxu1 %v13951_v57  ;;  %v10006_v57 = vrot.slane %v8073_v31, 9 }
 0x552   : > { %11341 = vmatmul.mubr.bf16.gmra.mrb[8].mxu1 %v13964_v62  ;;  %v8965_v62 = vrot.slane %v8963_v44, 4 }
 0x553   : > { %11344 = vmatprep.mubr.bf16.mxu1 %v13971_v4  ;;  %v8966_v4 = vrot.slane %v8075_v41, 5 }
 0x55a   : > { %11345 = vmatmul.mubr.bf16.gmra.mrb[12].mxu1 %v13986_v47  ;;  %v8964_v47 = vsel %vm13040_vm13, %v10006_v57, %v8963_v44 }
 0x55b   : > { %11348 = vmatprep.mubr.bf16.mxu1 %v13991_v28  ;;  %v8967_v28 = vsel %vm13040_vm13, %v8965_v62, %v8966_v4 }
 0x55c   : > { %v10023_v3 = vcombine.low %v8964_v47, %v8967_v28 }
 0x562   : > { %11349 = vmatmul.mubr.bf16.gmra.mrb[16].mxu1 %v14001_v24 }
 0x563   : > { %11352 = vmatprep.mubr.bf16.mxu1 %v14005_v30 }
 0x56a   : > { %11353 = vmatmul.mubr.bf16.gmra.mrb[20].mxu1 %v14015_v15 }
 0x56b   : > { %11356 = vmatprep.mubr.bf16.mxu1 %v14019_v14 }
 0x572   : > { %11357 = vmatmul.mubr.bf16.gmra.mrb[24].mxu1 %v14027_v13 }
 0x573   : > { %11360 = vmatprep.mubr.bf16.mxu1 %v9997_v56 }
 0x57a   : > { %11361 = vmatmul.mubr.bf16.gmra.mrb[28].mxu1 %v10023_v3 }
 0x615   : > { %v11334_v2 = vpop.f32.mrb[0].mxu1 }
 0x616   : > { %v11396_v8 = vadd.f32 %v11334_v2, %v14092_v27  ;;  %v9103_v9 = vpop.f32.mrb[1].mxu1 }
 0x617   : > { %v11397_v46 = vadd.f32 %v14092_v27, %v9103_v9  ;;  %v11335_v37 = vpop.f32.mrb[2].mxu1 }
 0x618   : > { %v9328_v60 = vmax.f32 %v11396_v8, 0.0  ;;  %v11398_v17 = vadd.f32 %v11335_v37, %v14092_v27  ;;  %v9106_v24 = vpop.f32.mrb[3].mxu1 }
 0x619   : > { %v9326_v55 = vmax.f32 %v11397_v46, 0.0  ;;  %v11399_v0 = vadd.f32 %v14092_v27, %v9106_v24 }
 0x61a   : > { %9360 = vst [vmem:[%s14099_s20 + $0x10] sm:$0xff] %v9328_v60  ;;  %v9329_v30 = vmax.f32 %v11398_v17, 0.0 }
 0x61b   : > { %9358 = vst [vmem:[%s14099_s20] sm:$0xff] %v9326_v55  ;;  %v9327_v43 = vmax.f32 %v11399_v0, 0.0 }
 0x61c   : > { %9361 = vst [vmem:[%s14099_s20 + $0x18] sm:$0xff] %v9329_v30 }
 0x61d   : > { %9359 = vst [vmem:[%s14099_s20 + $0x8] sm:$0xff] %v9327_v43  ;;  %v11338_v1 = vpop.f32.mrb[4].mxu1 }
 0x61e   : > { %v11400_v26 = vadd.f32 %v11338_v1, %v14092_v27  ;;  %v9119_v54 = vpop.f32.mrb[5].mxu1 }
 0x61f   : > { %v11401_v19 = vadd.f32 %v14092_v27, %v9119_v54  ;;  %v11339_v23 = vpop.f32.mrb[6].mxu1 }
 0x620   : > { %v9332_v39 = vmax.f32 %v11400_v26, 0.0  ;;  %v11402_v38 = vadd.f32 %v11339_v23, %v14092_v27  ;;  %v9122_v52 = vpop.f32.mrb[7].mxu1 }
 0x621   : > { %v9330_v58 = vmax.f32 %v11401_v19, 0.0  ;;  %v11403_v33 = vadd.f32 %v14092_v27, %v9122_v52 }
 0x622   : > { %9364 = vst [vmem:[%s14099_s20 + $0x30] sm:$0xff] %v9332_v39  ;;  %v9333_v63 = vmax.f32 %v11402_v38, 0.0 }
 0x623   : > { %9362 = vst [vmem:[%s14099_s20 + $0x20] sm:$0xff] %v9330_v58  ;;  %v9331_v20 = vmax.f32 %v11403_v33, 0.0 }
 0x624   : > { %9365 = vst [vmem:[%s14099_s20 + $0x38] sm:$0xff] %v9333_v63 }
 0x625   : > { %9363 = vst [vmem:[%s14099_s20 + $0x28] sm:$0xff] %v9331_v20  ;;  %v11342_v21 = vpop.f32.mrb[8].mxu1 }
 0x626   : > { %v11404_v15 = vadd.f32 %v11342_v21, %v14092_v27  ;;  %v9135_v11 = vpop.f32.mrb[9].mxu1 }
 0x627   : > { %v11405_v6 = vadd.f32 %v14092_v27, %v9135_v11  ;;  %v11343_v14 = vpop.f32.mrb[10].mxu1 }
 0x628   : > { %v9336_v35 = vmax.f32 %v11404_v15, 0.0  ;;  %v11406_v29 = vadd.f32 %v11343_v14, %v14092_v27  ;;  %v9138_v36 = vpop.f32.mrb[11].mxu1 }
 0x629   : > { %v9334_v40 = vmax.f32 %v11405_v6, 0.0  ;;  %v11407_v50 = vadd.f32 %v14092_v27, %v9138_v36 }
 0x62a   : > { %9368 = vst [vmem:[%s14099_s20 + $0x50] sm:$0xff] %v9336_v35  ;;  %v9337_v16 = vmax.f32 %v11406_v29, 0.0 }
 0x62b   : > { %9366 = vst [vmem:[%s14099_s20 + $0x40] sm:$0xff] %v9334_v40  ;;  %v9335_v13 = vmax.f32 %v11407_v50, 0.0 }
 0x62c   : > { %9369 = vst [vmem:[%s14099_s20 + $0x58] sm:$0xff] %v9337_v16 }
 0x62d   : > { %9367 = vst [vmem:[%s14099_s20 + $0x48] sm:$0xff] %v9335_v13  ;;  %v11346_v22 = vpop.f32.mrb[12].mxu1 }
 0x62e   : > { %v11408_v7 = vadd.f32 %v11346_v22, %v14092_v27  ;;  %v9151_v45 = vpop.f32.mrb[13].mxu1 }
 0x62f   : > { %v11409_v53 = vadd.f32 %v14092_v27, %v9151_v45  ;;  %v11347_v12 = vpop.f32.mrb[14].mxu1 }
 0x630   : > { %v9340_v25 = vmax.f32 %v11408_v7, 0.0  ;;  %v11410_v61 = vadd.f32 %v11347_v12, %v14092_v27  ;;  %v9154_v18 = vpop.f32.mrb[15].mxu1 }
 0x631   : > { %v9338_v10 = vmax.f32 %v11409_v53, 0.0  ;;  %v11411_v34 = vadd.f32 %v14092_v27, %v9154_v18 }
 0x632   : > { %9372 = vst [vmem:[%s14099_s20 + $0x70] sm:$0xff] %v9340_v25  ;;  %v9341_v59 = vmax.f32 %v11410_v61, 0.0 }
 0x633   : > { %9370 = vst [vmem:[%s14099_s20 + $0x60] sm:$0xff] %v9338_v10  ;;  %v9339_v42 = vmax.f32 %v11411_v34, 0.0 }
 0x634   : > { %9373 = vst [vmem:[%s14099_s20 + $0x78] sm:$0xff] %v9341_v59 }
 0x635   : > { %9371 = vst [vmem:[%s14099_s20 + $0x68] sm:$0xff] %v9339_v42  ;;  %v11350_v48 = vpop.f32.mrb[16].mxu1 }
 0x636   : > { %v11412_v32 = vadd.f32 %v11350_v48, %v14092_v27  ;;  %v9167_v5 = vpop.f32.mrb[17].mxu1 }
 0x637   : > { %v11413_v49 = vadd.f32 %v14092_v27, %v9167_v5  ;;  %v11351_v56 = vpop.f32.mrb[18].mxu1 }
 0x638   : > { %v9344_v51 = vmax.f32 %v11412_v32, 0.0  ;;  %v11414_v44 = vadd.f32 %v11351_v56, %v14092_v27  ;;  %v9170_v31 = vpop.f32.mrb[19].mxu1 }
 0x639   : > { %v9342_v41 = vmax.f32 %v11413_v49, 0.0  ;;  %v11415_v57 = vadd.f32 %v14092_v27, %v9170_v31 }
 0x63a   : > { %9376 = vst [vmem:[%s14099_s20 + $0x90] sm:$0xff] %v9344_v51  ;;  %v9345_v62 = vmax.f32 %v11414_v44, 0.0 }
 0x63b   : > { %9374 = vst [vmem:[%s14099_s20 + $0x80] sm:$0xff] %v9342_v41  ;;  %v9343_v4 = vmax.f32 %v11415_v57, 0.0 }
 0x63c   : > { %9377 = vst [vmem:[%s14099_s20 + $0x98] sm:$0xff] %v9345_v62 }
 0x63d   : > { %9375 = vst [vmem:[%s14099_s20 + $0x88] sm:$0xff] %v9343_v4  ;;  %v11354_v47 = vpop.f32.mrb[20].mxu1 }
 0x63e   : > { %v11416_v28 = vadd.f32 %v11354_v47, %v14092_v27  ;;  %v9183_v3 = vpop.f32.mrb[21].mxu1 }
 0x63f   : > { %v11417_v2 = vadd.f32 %v14092_v27, %v9183_v3  ;;  %v11355_v8 = vpop.f32.mrb[22].mxu1 }
 0x640   : > { %v9348_v9 = vmax.f32 %v11416_v28, 0.0  ;;  %v11418_v46 = vadd.f32 %v11355_v8, %v14092_v27  ;;  %v9186_v37 = vpop.f32.mrb[23].mxu1 }
 0x641   : > { %v9346_v60 = vmax.f32 %v11417_v2, 0.0  ;;  %v11419_v17 = vadd.f32 %v14092_v27, %v9186_v37 }
 0x642   : > { %9380 = vst [vmem:[%s14099_s20 + $0xb0] sm:$0xff] %v9348_v9  ;;  %v9349_v24 = vmax.f32 %v11418_v46, 0.0 }
 0x643   : > { %9378 = vst [vmem:[%s14099_s20 + $0xa0] sm:$0xff] %v9346_v60  ;;  %v9347_v55 = vmax.f32 %v11419_v17, 0.0 }
 0x644   : > { %9381 = vst [vmem:[%s14099_s20 + $0xb8] sm:$0xff] %v9349_v24 }
 0x645   : > { %9379 = vst [vmem:[%s14099_s20 + $0xa8] sm:$0xff] %v9347_v55  ;;  %v11358_v0 = vpop.f32.mrb[24].mxu1 }
 0x646   : > { %v11420_v30 = vadd.f32 %v11358_v0, %v14092_v27  ;;  %v9199_v43 = vpop.f32.mrb[25].mxu1 }
 0x647   : > { %v11421_v1 = vadd.f32 %v14092_v27, %v9199_v43  ;;  %v11359_v26 = vpop.f32.mrb[26].mxu1 }
 0x648   : > { %v9352_v54 = vmax.f32 %v11420_v30, 0.0  ;;  %v11422_v19 = vadd.f32 %v11359_v26, %v14092_v27  ;;  %v9202_v23 = vpop.f32.mrb[27].mxu1 }
 0x649   : > { %v9350_v39 = vmax.f32 %v11421_v1, 0.0  ;;  %v11423_v38 = vadd.f32 %v14092_v27, %v9202_v23 }
 0x64a   : > { %9384 = vst [vmem:[%s14099_s20 + $0xd0] sm:$0xff] %v9352_v54  ;;  %v9353_v52 = vmax.f32 %v11422_v19, 0.0 }
 0x64b   : > { %9382 = vst [vmem:[%s14099_s20 + $0xc0] sm:$0xff] %v9350_v39  ;;  %v9351_v58 = vmax.f32 %v11423_v38, 0.0 }
 0x64c   : > { %9385 = vst [vmem:[%s14099_s20 + $0xd8] sm:$0xff] %v9353_v52 }
 0x64d   : > { %9383 = vst [vmem:[%s14099_s20 + $0xc8] sm:$0xff] %v9351_v58  ;;  %v11362_v33 = vpop.f32.mrb[28].mxu1 }
 0x64e   : > { %v11424_v63 = vadd.f32 %v11362_v33, %v14092_v27  ;;  %v9215_v20 = vpop.f32.mrb[29].mxu1 }
 0x64f   : > { %v11425_v21 = vadd.f32 %v14092_v27, %v9215_v20  ;;  %v11363_v15 = vpop.f32.mrb[30].mxu1 }
 0x650   : > { %v9356_v11 = vmax.f32 %v11424_v63, 0.0  ;;  %v11426_v6 = vadd.f32 %v11363_v15, %v14092_v27  ;;  %v9218_v14 = vpop.f32.mrb[31].mxu1 }
 0x651   : > { %v9354_v35 = vmax.f32 %v11425_v21, 0.0  ;;  %v11427_v29 = vadd.f32 %v14092_v27, %v9218_v14 }
 0x652   : > { %9388 = vst [vmem:[%s14099_s20 + $0xf0] sm:$0xff] %v9356_v11  ;;  %v9357_v36 = vmax.f32 %v11426_v6, 0.0 }
 0x653   : > { %9386 = vst [vmem:[%s14099_s20 + $0xe0] sm:$0xff] %v9354_v35  ;;  %v9355_v40 = vmax.f32 %v11427_v29, 0.0 }
 0x654   : > { %9389 = vst [vmem:[%s14099_s20 + $0xf8] sm:$0xff] %v9357_v36 }
 0x655   : > { %9387 = vst [vmem:[%s14099_s20 + $0xe8] sm:$0xff] %v9355_v40 }
 0x656 PF: > { %s15_s18 = sadd.s32 1, %s12135_s18  }
 0x657   : > { %p12_p4 = scmp.ge.s32.totalorder %s15_s18, 4  }
 0x659   :  { %14 = sbr.rel (!%p12_p4) target bundleno = 1 (0x1), region = 88 }

</bundles_post_ra>
